<compile_context>
chip_gen: v5e
topology: v5e:2x2
jax: 0.10.0
libtpu: 0.0.40
codegen_flags: <defaults>
</compile_context>

<pallas_src>
import functools

import jax
import jax.numpy as jnp
from jax import lax
from jax.experimental import pallas as pl
from jax.experimental.pallas import tpu as pltpu


def _bilstm_kernel(gxf_ref, gxb_ref, whhf_ref, whhb_ref,
                   yf_ref, yb_ref, hf_ref, cf_ref, hb_ref, cb_ref,
                   *, unroll):
    """One grid step == one chunk of timesteps for BOTH directions.

    gxf_ref : (Tc, B, 4H) precomputed x@W_ih_f + b_f for this chunk (natural time)
    gxb_ref : (Tc, B, 4H) precomputed x@W_ih_b + b_b for the MIRROR chunk
    whhf/whhb : (H, 4H) recurrent weights
    yf_ref  : (Tc, B, H) forward per-timestep hidden, this chunk
    yb_ref  : (Tc, B, H) backward per-timestep hidden, mirror chunk
    hf/cf/hb/cb : (B, H) grid-resident final states, doubling as recurrent state
    """
    c = pl.program_id(0)

    @pl.when(c == 0)
    def _():
        hf_ref[...] = jnp.zeros_like(hf_ref)
        cf_ref[...] = jnp.zeros_like(cf_ref)
        hb_ref[...] = jnp.zeros_like(hb_ref)
        cb_ref[...] = jnp.zeros_like(cb_ref)

    tc = gxf_ref.shape[0]
    H = hf_ref.shape[-1]
    whh_f = whhf_ref[...]
    whh_b = whhb_ref[...]

    def cell_update(gates, c_prev):
        i_g = jax.nn.sigmoid(gates[:, 0 * H:1 * H])
        f_g = jax.nn.sigmoid(gates[:, 1 * H:2 * H])
        g_g = jnp.tanh(gates[:, 2 * H:3 * H])
        o_g = jax.nn.sigmoid(gates[:, 3 * H:4 * H])
        c_new = f_g * c_prev + i_g * g_g
        h_new = o_g * jnp.tanh(c_new)
        return h_new, c_new

    def step(i, carry):
        # ---- forward direction, natural time (global t = c*Tc + i) ----
        gates_f = gxf_ref[i] + jnp.dot(hf_ref[...], whh_f,
                                       preferred_element_type=jnp.float32)
        h_f, c_f = cell_update(gates_f, cf_ref[...])
        hf_ref[...] = h_f
        cf_ref[...] = c_f
        yf_ref[i] = h_f

        # ---- backward direction, reversed time ----
        # Backward processing step k = c*Tc + i consumes global time T-1-k,
        # which lives in gxb's mirror chunk at local index Tc-1-i; the output
        # is stored at the same global index (PyTorch bidirectional layout).
        j = tc - 1 - i
        gates_b = gxb_ref[j] + jnp.dot(hb_ref[...], whh_b,
                                       preferred_element_type=jnp.float32)
        h_b, c_b = cell_update(gates_b, cb_ref[...])
        hb_ref[...] = h_b
        cb_ref[...] = c_b
        yb_ref[j] = h_b
        return carry

    lax.fori_loop(0, tc, step, 0, unroll=unroll)


def _pick_chunk(T, max_chunk=128):
    """Largest divisor of T not exceeding max_chunk."""
    if T <= max_chunk:
        return T
    for tc in range(max_chunk, 0, -1):
        if T % tc == 0:
            return tc
    return 1


def bilstm_layer(gx_f, gx_b, w_hh_f, w_hh_b):
    """One bidirectional LSTM layer (both directions) in a single pallas_call.

    gx_f, gx_b : (T, B, 4H) precomputed input projections (natural time order
                 for both directions; the kernel reads gx_b reversed).
    w_hh_f/_b  : (H, 4H)
    Returns y_f, y_b : (T, B, H) and final h_f, c_f, h_b, c_b : (B, H).
    """
    T, B, _ = gx_f.shape
    H = w_hh_f.shape[0]
    tc = _pick_chunk(T)
    nc = T // tc
    kern = functools.partial(_bilstm_kernel, unroll=(tc <= 32))

    out_shape = (
        jax.ShapeDtypeStruct((T, B, H), jnp.float32),  # y_f
        jax.ShapeDtypeStruct((T, B, H), jnp.float32),  # y_b
        jax.ShapeDtypeStruct((B, H), jnp.float32),     # h_f
        jax.ShapeDtypeStruct((B, H), jnp.float32),     # c_f
        jax.ShapeDtypeStruct((B, H), jnp.float32),     # h_b
        jax.ShapeDtypeStruct((B, H), jnp.float32),     # c_b
    )
    grid_spec = pltpu.PrefetchScalarGridSpec(
        num_scalar_prefetch=0,
        grid=(nc,),
        in_specs=[
            pl.BlockSpec((tc, B, 4 * H), lambda c: (c, 0, 0)),
            pl.BlockSpec((tc, B, 4 * H), lambda c: (nc - 1 - c, 0, 0)),
            pl.BlockSpec((H, 4 * H), lambda c: (0, 0)),
            pl.BlockSpec((H, 4 * H), lambda c: (0, 0)),
        ],
        out_specs=[
            pl.BlockSpec((tc, B, H), lambda c: (c, 0, 0)),
            pl.BlockSpec((tc, B, H), lambda c: (nc - 1 - c, 0, 0)),
            pl.BlockSpec((B, H), lambda c: (0, 0)),
            pl.BlockSpec((B, H), lambda c: (0, 0)),
            pl.BlockSpec((B, H), lambda c: (0, 0)),
            pl.BlockSpec((B, H), lambda c: (0, 0)),
        ],
    )
    return pl.pallas_call(
        kern,
        out_shape=out_shape,
        grid_spec=grid_spec,
        compiler_params=pltpu.CompilerParams(
            dimension_semantics=("arbitrary",),  # strict sequential recurrence
        ),
    )(gx_f, gx_b, w_hh_f, w_hh_b)


def init_encoder_params(key, input_dim, hid_dim, n_layers):
    """Deterministic init matching PyTorch nn.LSTM parameter shapes.

    PyTorch: weight_ih_l{k}[_reverse] : (4H, in), weight_hh : (4H, H),
             bias_ih/bias_hh : (4H,). We store transposed weights and a fused bias.
    """
    k = 1.0 / jnp.sqrt(jnp.float32(hid_dim))
    params = []
    for layer in range(n_layers):
        in_dim = input_dim if layer == 0 else 2 * hid_dim
        layer_p = {}
        for direction in ("f", "b"):
            key, k1, k2, k3, k4 = jax.random.split(key, 5)
            w_ih = jax.random.uniform(k1, (4 * hid_dim, in_dim), jnp.float32, -k, k)
            w_hh = jax.random.uniform(k2, (4 * hid_dim, hid_dim), jnp.float32, -k, k)
            b_ih = jax.random.uniform(k3, (4 * hid_dim,), jnp.float32, -k, k)
            b_hh = jax.random.uniform(k4, (4 * hid_dim,), jnp.float32, -k, k)
            layer_p["w_ih_" + direction] = w_ih.T       # (in, 4H)
            layer_p["w_hh_" + direction] = w_hh.T       # (H, 4H)
            layer_p["b_" + direction] = b_ih + b_hh     # (4H,)
        params.append(layer_p)
    return params


@functools.partial(jax.jit, static_argnames=("n_layers",))
def encoder_forward(src, params, n_layers):
    """Equivalent of Encoder.forward: returns (hidden, cell).

    hidden, cell: (n_layers * 2, batch, hid_dim)
    """
    # TODO(synk): inter-layer dropout from nn.LSTM(dropout=...) is a
    # training-time stochastic op; omitted here (inference semantics).
    hs, cs = [], []
    y_f, y_b = src, None
    for layer in range(n_layers):
        p = params[layer]
        if layer == 0:
            # One big MXU GEMM per direction (hoisted out of the recurrence).
            gx_f = jnp.einsum("tbd,dg->tbg", src, p["w_ih_f"]) + p["b_f"]
            gx_b = jnp.einsum("tbd,dg->tbg", src, p["w_ih_b"]) + p["b_b"]
        else:
            # Fold the [y_f, y_b] concat into the projection GEMM:
            # [y_f, y_b] @ W_ih == y_f @ W_ih[:H] + y_b @ W_ih[H:]
            H = y_f.shape[-1]
            gx_f = (jnp.einsum("tbh,hg->tbg", y_f, p["w_ih_f"][:H])
                    + jnp.einsum("tbh,hg->tbg", y_b, p["w_ih_f"][H:])
                    + p["b_f"])
            gx_b = (jnp.einsum("tbh,hg->tbg", y_f, p["w_ih_b"][:H])
                    + jnp.einsum("tbh,hg->tbg", y_b, p["w_ih_b"][H:])
                    + p["b_b"])
        y_f, y_b, h_f, c_f, h_b, c_b = bilstm_layer(
            gx_f, gx_b, p["w_hh_f"], p["w_hh_b"])
        hs.extend([h_f, h_b])
        cs.extend([c_f, c_b])
    hidden = jnp.stack(hs, axis=0)
    cell = jnp.stack(cs, axis=0)
    return hidden, cell


if __name__ == "__main__":
    seq_len = 8
    batch = 2
    input_dim = 16   # emb_dim = input_dim in the module
    hid_dim = 32
    n_layers = 2

    key = jax.random.PRNGKey(0)
    key, src_key, param_key = jax.random.split(key, 3)
    src = jax.random.normal(src_key, (seq_len, batch, input_dim), jnp.float32)
    params = init_encoder_params(param_key, input_dim, hid_dim, n_layers)

    hidden, cell = encoder_forward(src, params, n_layers)
    jax.block_until_ready((hidden, cell))

    assert hidden.shape == (n_layers * 2, batch, hid_dim)
    assert cell.shape == (n_layers * 2, batch, hid_dim)
    assert bool(jnp.all(jnp.isfinite(hidden))) and bool(jnp.all(jnp.isfinite(cell)))
    print("KERNEL_OK")
</pallas_src>

<mosaic_0001>
module attributes {stable_mosaic.version = 11 : i64} {
  func.func @_bilstm_kernel(%arg0: i32, %arg1: memref<8x2x128xf32, #tpu.memory_space<vmem>>, %arg2: memref<8x2x128xf32, #tpu.memory_space<vmem>>, %arg3: memref<32x128xf32, #tpu.memory_space<vmem>>, %arg4: memref<32x128xf32, #tpu.memory_space<vmem>>, %arg5: memref<8x2x32xf32, #tpu.memory_space<vmem>>, %arg6: memref<8x2x32xf32, #tpu.memory_space<vmem>>, %arg7: memref<2x32xf32, #tpu.memory_space<vmem>>, %arg8: memref<2x32xf32, #tpu.memory_space<vmem>>, %arg9: memref<2x32xf32, #tpu.memory_space<vmem>>, %arg10: memref<2x32xf32, #tpu.memory_space<vmem>>) attributes {dimension_semantics = [#tpu.dimension_semantics<arbitrary>], iteration_bounds = array<i64: 1>, scalar_prefetch = 0 : i64, scratch_operands = 0 : i64, tpu.core_type = #tpu.core_type<tc>, window_params = [{transform_indices = @transform_0, window_bounds = array<i64: 8, 2, 128>}, {transform_indices = @transform_1, window_bounds = array<i64: 8, 2, 128>}, {pipeline_mode = #tpu.pipeline_mode<synchronous>, transform_indices = @transform_2, window_bounds = array<i64: 32, 128>}, {pipeline_mode = #tpu.pipeline_mode<synchronous>, transform_indices = @transform_3, window_bounds = array<i64: 32, 128>}, {transform_indices = @transform_4, window_bounds = array<i64: 8, 2, 32>}, {transform_indices = @transform_5, window_bounds = array<i64: 8, 2, 32>}, {pipeline_mode = #tpu.pipeline_mode<synchronous>, transform_indices = @transform_6, window_bounds = array<i64: 2, 32>}, {pipeline_mode = #tpu.pipeline_mode<synchronous>, transform_indices = @transform_7, window_bounds = array<i64: 2, 32>}, {pipeline_mode = #tpu.pipeline_mode<synchronous>, transform_indices = @transform_8, window_bounds = array<i64: 2, 32>}, {pipeline_mode = #tpu.pipeline_mode<synchronous>, transform_indices = @transform_9, window_bounds = array<i64: 2, 32>}]} {
    %c0_i32 = arith.constant 0 : i32
    %0 = arith.cmpi eq, %arg0, %c0_i32 : i32
    %1 = arith.extui %0 : i1 to i32
    %c0_i32_0 = arith.constant 0 : i32
    %2 = arith.cmpi ne, %1, %c0_i32_0 : i32
    scf.if %2 {
      %cst_268 = arith.constant 0.000000e+00 : f32
      %621 = vector.broadcast %cst_268 : f32 to vector<2x32xf32>
      %c0_269 = arith.constant 0 : index
      %c0_270 = arith.constant 0 : index
      %622 = vector.load %arg7[%c0_269, %c0_270] : memref<2x32xf32, #tpu.memory_space<vmem>>, vector<2x32xf32>
      tpu.vector_store %arg7[%c0_269, %c0_270], %621 {strides = array<i32>} : memref<2x32xf32, #tpu.memory_space<vmem>>, vector<2x32xf32>,
      %cst_271 = arith.constant 0.000000e+00 : f32
      %623 = vector.broadcast %cst_271 : f32 to vector<2x32xf32>
      %c0_272 = arith.constant 0 : index
      %c0_273 = arith.constant 0 : index
      %624 = vector.load %arg8[%c0_272, %c0_273] : memref<2x32xf32, #tpu.memory_space<vmem>>, vector<2x32xf32>
      tpu.vector_store %arg8[%c0_272, %c0_273], %623 {strides = array<i32>} : memref<2x32xf32, #tpu.memory_space<vmem>>, vector<2x32xf32>,
      %cst_274 = arith.constant 0.000000e+00 : f32
      %625 = vector.broadcast %cst_274 : f32 to vector<2x32xf32>
      %c0_275 = arith.constant 0 : index
      %c0_276 = arith.constant 0 : index
      %626 = vector.load %arg9[%c0_275, %c0_276] : memref<2x32xf32, #tpu.memory_space<vmem>>, vector<2x32xf32>
      tpu.vector_store %arg9[%c0_275, %c0_276], %625 {strides = array<i32>} : memref<2x32xf32, #tpu.memory_space<vmem>>, vector<2x32xf32>,
      %cst_277 = arith.constant 0.000000e+00 : f32
      %627 = vector.broadcast %cst_277 : f32 to vector<2x32xf32>
      %c0_278 = arith.constant 0 : index
      %c0_279 = arith.constant 0 : index
      %628 = vector.load %arg10[%c0_278, %c0_279] : memref<2x32xf32, #tpu.memory_space<vmem>>, vector<2x32xf32>
      tpu.vector_store %arg10[%c0_278, %c0_279], %627 {strides = array<i32>} : memref<2x32xf32, #tpu.memory_space<vmem>>, vector<2x32xf32>,
    } else {
    }
    %c0 = arith.constant 0 : index
    %c0_1 = arith.constant 0 : index
    %3 = vector.load %arg3[%c0, %c0_1] : memref<32x128xf32, #tpu.memory_space<vmem>>, vector<32x128xf32>
    %c0_2 = arith.constant 0 : index
    %c0_3 = arith.constant 0 : index
    %4 = vector.load %arg4[%c0_2, %c0_3] : memref<32x128xf32, #tpu.memory_space<vmem>>, vector<32x128xf32>
    %c0_i32_4 = arith.constant 0 : i32
    %5 = arith.index_cast %c0_i32_4 : i32 to index
    %c0_5 = arith.constant 0 : index
    %c0_6 = arith.constant 0 : index
    %6 = vector.load %arg1[%5, %c0_5, %c0_6] : memref<8x2x128xf32, #tpu.memory_space<vmem>>, vector<1x2x128xf32>
    %7 = vector.shape_cast %6 : vector<1x2x128xf32> to vector<2x128xf32>
    %c0_7 = arith.constant 0 : index
    %c0_8 = arith.constant 0 : index
    %8 = vector.load %arg7[%c0_7, %c0_8] : memref<2x32xf32, #tpu.memory_space<vmem>>, vector<2x32xf32>
    %cst = arith.constant dense<0.000000e+00> : vector<2x128xf32>
    %9 = tpu.matmul %8, %3, %cst {dimension_numbers = #tpu.dot_dimension_numbers<[1], [0], [0], [1], [0, 0, 1, 1], [], []>} : vector<2x32xf32>, vector<32x128xf32>, vector<2x128xf32> -> vector<2x128xf32>
    %10 = arith.addf %7, %9 : vector<2x128xf32>
    %c0_9 = arith.constant 0 : index
    %c0_10 = arith.constant 0 : index
    %11 = vector.load %arg8[%c0_9, %c0_10] : memref<2x32xf32, #tpu.memory_space<vmem>>, vector<2x32xf32>
    %12 = vector.extract_strided_slice %10 {offsets = [0, 0], sizes = [2, 32], strides = [1, 1]} : vector<2x128xf32> to vector<2x32xf32>
    %13 = arith.negf %12 : vector<2x32xf32>
    %14 = math.exp %13 : vector<2x32xf32>
    %cst_11 = arith.constant 1.000000e+00 : f32
    %15 = vector.broadcast %cst_11 : f32 to vector<2x32xf32>
    %16 = arith.addf %15, %14 : vector<2x32xf32>
    %17 = arith.divf %15, %16 : vector<2x32xf32>
    %18 = vector.extract_strided_slice %10 {offsets = [0, 32], sizes = [2, 32], strides = [1, 1]} : vector<2x128xf32> to vector<2x32xf32>
    %19 = arith.negf %18 : vector<2x32xf32>
    %20 = math.exp %19 : vector<2x32xf32>
    %cst_12 = arith.constant 1.000000e+00 : f32
    %21 = vector.broadcast %cst_12 : f32 to vector<2x32xf32>
    %22 = arith.addf %21, %20 : vector<2x32xf32>
    %23 = arith.divf %21, %22 : vector<2x32xf32>
    %24 = vector.extract_strided_slice %10 {offsets = [0, 64], sizes = [2, 32], strides = [1, 1]} : vector<2x128xf32> to vector<2x32xf32>
    %25 = math.tanh %24 : vector<2x32xf32>
    %26 = vector.extract_strided_slice %10 {offsets = [0, 96], sizes = [2, 32], strides = [1, 1]} : vector<2x128xf32> to vector<2x32xf32>
    %27 = arith.negf %26 : vector<2x32xf32>
    %28 = math.exp %27 : vector<2x32xf32>
    %cst_13 = arith.constant 1.000000e+00 : f32
    %29 = vector.broadcast %cst_13 : f32 to vector<2x32xf32>
    %30 = arith.addf %29, %28 : vector<2x32xf32>
    %31 = arith.divf %29, %30 : vector<2x32xf32>
    %32 = arith.mulf %23, %11 : vector<2x32xf32>
    %33 = arith.mulf %17, %25 : vector<2x32xf32>
    %34 = arith.addf %32, %33 : vector<2x32xf32>
    %35 = math.tanh %34 : vector<2x32xf32>
    %36 = arith.mulf %31, %35 : vector<2x32xf32>
    %c0_14 = arith.constant 0 : index
    %c0_15 = arith.constant 0 : index
    %37 = vector.load %arg7[%c0_14, %c0_15] : memref<2x32xf32, #tpu.memory_space<vmem>>, vector<2x32xf32>
    tpu.vector_store %arg7[%c0_14, %c0_15], %36 {strides = array<i32>} : memref<2x32xf32, #tpu.memory_space<vmem>>, vector<2x32xf32>,
    %c0_16 = arith.constant 0 : index
    %c0_17 = arith.constant 0 : index
    %38 = vector.load %arg8[%c0_16, %c0_17] : memref<2x32xf32, #tpu.memory_space<vmem>>, vector<2x32xf32>
    tpu.vector_store %arg8[%c0_16, %c0_17], %34 {strides = array<i32>} : memref<2x32xf32, #tpu.memory_space<vmem>>, vector<2x32xf32>,
    %39 = arith.index_cast %c0_i32_4 : i32 to index
    %c0_18 = arith.constant 0 : index
    %c0_19 = arith.constant 0 : index
    %40 = vector.load %arg5[%39, %c0_18, %c0_19] : memref<8x2x32xf32, #tpu.memory_space<vmem>>, vector<1x2x32xf32>
    %41 = vector.shape_cast %40 : vector<1x2x32xf32> to vector<2x32xf32>
    %42 = vector.shape_cast %36 : vector<2x32xf32> to vector<1x2x32xf32>
    tpu.vector_store %arg5[%39, %c0_18, %c0_19], %42 {strides = array<i32>} : memref<8x2x32xf32, #tpu.memory_space<vmem>>, vector<1x2x32xf32>,
    %c7_i32 = arith.constant 7 : i32
    %43 = arith.subi %c7_i32, %c0_i32_4 : i32
    %44 = arith.index_cast %43 : i32 to index
    %c0_20 = arith.constant 0 : index
    %c0_21 = arith.constant 0 : index
    %45 = vector.load %arg2[%44, %c0_20, %c0_21] : memref<8x2x128xf32, #tpu.memory_space<vmem>>, vector<1x2x128xf32>
    %46 = vector.shape_cast %45 : vector<1x2x128xf32> to vector<2x128xf32>
    %c0_22 = arith.constant 0 : index
    %c0_23 = arith.constant 0 : index
    %47 = vector.load %arg9[%c0_22, %c0_23] : memref<2x32xf32, #tpu.memory_space<vmem>>, vector<2x32xf32>
    %cst_24 = arith.constant dense<0.000000e+00> : vector<2x128xf32>
    %48 = tpu.matmul %47, %4, %cst_24 {dimension_numbers = #tpu.dot_dimension_numbers<[1], [0], [0], [1], [0, 0, 1, 1], [], []>} : vector<2x32xf32>, vector<32x128xf32>, vector<2x128xf32> -> vector<2x128xf32>
    %49 = arith.addf %46, %48 : vector<2x128xf32>
    %c0_25 = arith.constant 0 : index
    %c0_26 = arith.constant 0 : index
    %50 = vector.load %arg10[%c0_25, %c0_26] : memref<2x32xf32, #tpu.memory_space<vmem>>, vector<2x32xf32>
    %51 = vector.extract_strided_slice %49 {offsets = [0, 0], sizes = [2, 32], strides = [1, 1]} : vector<2x128xf32> to vector<2x32xf32>
    %52 = arith.negf %51 : vector<2x32xf32>
    %53 = math.exp %52 : vector<2x32xf32>
    %cst_27 = arith.constant 1.000000e+00 : f32
    %54 = vector.broadcast %cst_27 : f32 to vector<2x32xf32>
    %55 = arith.addf %54, %53 : vector<2x32xf32>
    %56 = arith.divf %54, %55 : vector<2x32xf32>
    %57 = vector.extract_strided_slice %49 {offsets = [0, 32], sizes = [2, 32], strides = [1, 1]} : vector<2x128xf32> to vector<2x32xf32>
    %58 = arith.negf %57 : vector<2x32xf32>
    %59 = math.exp %58 : vector<2x32xf32>
    %cst_28 = arith.constant 1.000000e+00 : f32
    %60 = vector.broadcast %cst_28 : f32 to vector<2x32xf32>
    %61 = arith.addf %60, %59 : vector<2x32xf32>
    %62 = arith.divf %60, %61 : vector<2x32xf32>
    %63 = vector.extract_strided_slice %49 {offsets = [0, 64], sizes = [2, 32], strides = [1, 1]} : vector<2x128xf32> to vector<2x32xf32>
    %64 = math.tanh %63 : vector<2x32xf32>
    %65 = vector.extract_strided_slice %49 {offsets = [0, 96], sizes = [2, 32], strides = [1, 1]} : vector<2x128xf32> to vector<2x32xf32>
    %66 = arith.negf %65 : vector<2x32xf32>
    %67 = math.exp %66 : vector<2x32xf32>
    %cst_29 = arith.constant 1.000000e+00 : f32
    %68 = vector.broadcast %cst_29 : f32 to vector<2x32xf32>
    %69 = arith.addf %68, %67 : vector<2x32xf32>
    %70 = arith.divf %68, %69 : vector<2x32xf32>
    %71 = arith.mulf %62, %50 : vector<2x32xf32>
    %72 = arith.mulf %56, %64 : vector<2x32xf32>
    %73 = arith.addf %71, %72 : vector<2x32xf32>
    %74 = math.tanh %73 : vector<2x32xf32>
    %75 = arith.mulf %70, %74 : vector<2x32xf32>
    %c0_30 = arith.constant 0 : index
    %c0_31 = arith.constant 0 : index
    %76 = vector.load %arg9[%c0_30, %c0_31] : memref<2x32xf32, #tpu.memory_space<vmem>>, vector<2x32xf32>
    tpu.vector_store %arg9[%c0_30, %c0_31], %75 {strides = array<i32>} : memref<2x32xf32, #tpu.memory_space<vmem>>, vector<2x32xf32>,
    %c0_32 = arith.constant 0 : index
    %c0_33 = arith.constant 0 : index
    %77 = vector.load %arg10[%c0_32, %c0_33] : memref<2x32xf32, #tpu.memory_space<vmem>>, vector<2x32xf32>
    tpu.vector_store %arg10[%c0_32, %c0_33], %73 {strides = array<i32>} : memref<2x32xf32, #tpu.memory_space<vmem>>, vector<2x32xf32>,
    %78 = arith.index_cast %43 : i32 to index
    %c0_34 = arith.constant 0 : index
    %c0_35 = arith.constant 0 : index
    %79 = vector.load %arg6[%78, %c0_34, %c0_35] : memref<8x2x32xf32, #tpu.memory_space<vmem>>, vector<1x2x32xf32>
    %80 = vector.shape_cast %79 : vector<1x2x32xf32> to vector<2x32xf32>
    %81 = vector.shape_cast %75 : vector<2x32xf32> to vector<1x2x32xf32>
    tpu.vector_store %arg6[%78, %c0_34, %c0_35], %81 {strides = array<i32>} : memref<8x2x32xf32, #tpu.memory_space<vmem>>, vector<1x2x32xf32>,
    %c1_i32 = arith.constant 1 : i32
    %82 = arith.index_cast %c1_i32 : i32 to index
    %c0_36 = arith.constant 0 : index
    %c0_37 = arith.constant 0 : index
    %83 = vector.load %arg1[%82, %c0_36, %c0_37] : memref<8x2x128xf32, #tpu.memory_space<vmem>>, vector<1x2x128xf32>
    %84 = vector.shape_cast %83 : vector<1x2x128xf32> to vector<2x128xf32>
    %c0_38 = arith.constant 0 : index
    %c0_39 = arith.constant 0 : index
    %85 = vector.load %arg7[%c0_38, %c0_39] : memref<2x32xf32, #tpu.memory_space<vmem>>, vector<2x32xf32>
    %cst_40 = arith.constant dense<0.000000e+00> : vector<2x128xf32>
    %86 = tpu.matmul %85, %3, %cst_40 {dimension_numbers = #tpu.dot_dimension_numbers<[1], [0], [0], [1], [0, 0, 1, 1], [], []>} : vector<2x32xf32>, vector<32x128xf32>, vector<2x128xf32> -> vector<2x128xf32>
    %87 = arith.addf %84, %86 : vector<2x128xf32>
    %c0_41 = arith.constant 0 : index
    %c0_42 = arith.constant 0 : index
    %88 = vector.load %arg8[%c0_41, %c0_42] : memref<2x32xf32, #tpu.memory_space<vmem>>, vector<2x32xf32>
    %89 = vector.extract_strided_slice %87 {offsets = [0, 0], sizes = [2, 32], strides = [1, 1]} : vector<2x128xf32> to vector<2x32xf32>
    %90 = arith.negf %89 : vector<2x32xf32>
    %91 = math.exp %90 : vector<2x32xf32>
    %cst_43 = arith.constant 1.000000e+00 : f32
    %92 = vector.broadcast %cst_43 : f32 to vector<2x32xf32>
    %93 = arith.addf %92, %91 : vector<2x32xf32>
    %94 = arith.divf %92, %93 : vector<2x32xf32>
    %95 = vector.extract_strided_slice %87 {offsets = [0, 32], sizes = [2, 32], strides = [1, 1]} : vector<2x128xf32> to vector<2x32xf32>
    %96 = arith.negf %95 : vector<2x32xf32>
    %97 = math.exp %96 : vector<2x32xf32>
    %cst_44 = arith.constant 1.000000e+00 : f32
    %98 = vector.broadcast %cst_44 : f32 to vector<2x32xf32>
    %99 = arith.addf %98, %97 : vector<2x32xf32>
    %100 = arith.divf %98, %99 : vector<2x32xf32>
    %101 = vector.extract_strided_slice %87 {offsets = [0, 64], sizes = [2, 32], strides = [1, 1]} : vector<2x128xf32> to vector<2x32xf32>
    %102 = math.tanh %101 : vector<2x32xf32>
    %103 = vector.extract_strided_slice %87 {offsets = [0, 96], sizes = [2, 32], strides = [1, 1]} : vector<2x128xf32> to vector<2x32xf32>
    %104 = arith.negf %103 : vector<2x32xf32>
    %105 = math.exp %104 : vector<2x32xf32>
    %cst_45 = arith.constant 1.000000e+00 : f32
    %106 = vector.broadcast %cst_45 : f32 to vector<2x32xf32>
    %107 = arith.addf %106, %105 : vector<2x32xf32>
    %108 = arith.divf %106, %107 : vector<2x32xf32>
    %109 = arith.mulf %100, %88 : vector<2x32xf32>
    %110 = arith.mulf %94, %102 : vector<2x32xf32>
    %111 = arith.addf %109, %110 : vector<2x32xf32>
    %112 = math.tanh %111 : vector<2x32xf32>
    %113 = arith.mulf %108, %112 : vector<2x32xf32>
    %c0_46 = arith.constant 0 : index
    %c0_47 = arith.constant 0 : index
    %114 = vector.load %arg7[%c0_46, %c0_47] : memref<2x32xf32, #tpu.memory_space<vmem>>, vector<2x32xf32>
    tpu.vector_store %arg7[%c0_46, %c0_47], %113 {strides = array<i32>} : memref<2x32xf32, #tpu.memory_space<vmem>>, vector<2x32xf32>,
    %c0_48 = arith.constant 0 : index
    %c0_49 = arith.constant 0 : index
    %115 = vector.load %arg8[%c0_48, %c0_49] : memref<2x32xf32, #tpu.memory_space<vmem>>, vector<2x32xf32>
    tpu.vector_store %arg8[%c0_48, %c0_49], %111 {strides = array<i32>} : memref<2x32xf32, #tpu.memory_space<vmem>>, vector<2x32xf32>,
    %116 = arith.index_cast %c1_i32 : i32 to index
    %c0_50 = arith.constant 0 : index
    %c0_51 = arith.constant 0 : index
    %117 = vector.load %arg5[%116, %c0_50, %c0_51] : memref<8x2x32xf32, #tpu.memory_space<vmem>>, vector<1x2x32xf32>
    %118 = vector.shape_cast %117 : vector<1x2x32xf32> to vector<2x32xf32>
    %119 = vector.shape_cast %113 : vector<2x32xf32> to vector<1x2x32xf32>
    tpu.vector_store %arg5[%116, %c0_50, %c0_51], %119 {strides = array<i32>} : memref<8x2x32xf32, #tpu.memory_space<vmem>>, vector<1x2x32xf32>,
    %c7_i32_52 = arith.constant 7 : i32
    %120 = arith.subi %c7_i32_52, %c1_i32 : i32
    %121 = arith.index_cast %120 : i32 to index
    %c0_53 = arith.constant 0 : index
    %c0_54 = arith.constant 0 : index
    %122 = vector.load %arg2[%121, %c0_53, %c0_54] : memref<8x2x128xf32, #tpu.memory_space<vmem>>, vector<1x2x128xf32>
    %123 = vector.shape_cast %122 : vector<1x2x128xf32> to vector<2x128xf32>
    %c0_55 = arith.constant 0 : index
    %c0_56 = arith.constant 0 : index
    %124 = vector.load %arg9[%c0_55, %c0_56] : memref<2x32xf32, #tpu.memory_space<vmem>>, vector<2x32xf32>
    %cst_57 = arith.constant dense<0.000000e+00> : vector<2x128xf32>
    %125 = tpu.matmul %124, %4, %cst_57 {dimension_numbers = #tpu.dot_dimension_numbers<[1], [0], [0], [1], [0, 0, 1, 1], [], []>} : vector<2x32xf32>, vector<32x128xf32>, vector<2x128xf32> -> vector<2x128xf32>
    %126 = arith.addf %123, %125 : vector<2x128xf32>
    %c0_58 = arith.constant 0 : index
    %c0_59 = arith.constant 0 : index
    %127 = vector.load %arg10[%c0_58, %c0_59] : memref<2x32xf32, #tpu.memory_space<vmem>>, vector<2x32xf32>
    %128 = vector.extract_strided_slice %126 {offsets = [0, 0], sizes = [2, 32], strides = [1, 1]} : vector<2x128xf32> to vector<2x32xf32>
    %129 = arith.negf %128 : vector<2x32xf32>
    %130 = math.exp %129 : vector<2x32xf32>
    %cst_60 = arith.constant 1.000000e+00 : f32
    %131 = vector.broadcast %cst_60 : f32 to vector<2x32xf32>
    %132 = arith.addf %131, %130 : vector<2x32xf32>
    %133 = arith.divf %131, %132 : vector<2x32xf32>
    %134 = vector.extract_strided_slice %126 {offsets = [0, 32], sizes = [2, 32], strides = [1, 1]} : vector<2x128xf32> to vector<2x32xf32>
    %135 = arith.negf %134 : vector<2x32xf32>
    %136 = math.exp %135 : vector<2x32xf32>
    %cst_61 = arith.constant 1.000000e+00 : f32
    %137 = vector.broadcast %cst_61 : f32 to vector<2x32xf32>
    %138 = arith.addf %137, %136 : vector<2x32xf32>
    %139 = arith.divf %137, %138 : vector<2x32xf32>
    %140 = vector.extract_strided_slice %126 {offsets = [0, 64], sizes = [2, 32], strides = [1, 1]} : vector<2x128xf32> to vector<2x32xf32>
    %141 = math.tanh %140 : vector<2x32xf32>
    %142 = vector.extract_strided_slice %126 {offsets = [0, 96], sizes = [2, 32], strides = [1, 1]} : vector<2x128xf32> to vector<2x32xf32>
    %143 = arith.negf %142 : vector<2x32xf32>
    %144 = math.exp %143 : vector<2x32xf32>
    %cst_62 = arith.constant 1.000000e+00 : f32
    %145 = vector.broadcast %cst_62 : f32 to vector<2x32xf32>
    %146 = arith.addf %145, %144 : vector<2x32xf32>
    %147 = arith.divf %145, %146 : vector<2x32xf32>
    %148 = arith.mulf %139, %127 : vector<2x32xf32>
    %149 = arith.mulf %133, %141 : vector<2x32xf32>
    %150 = arith.addf %148, %149 : vector<2x32xf32>
    %151 = math.tanh %150 : vector<2x32xf32>
    %152 = arith.mulf %147, %151 : vector<2x32xf32>
    %c0_63 = arith.constant 0 : index
    %c0_64 = arith.constant 0 : index
    %153 = vector.load %arg9[%c0_63, %c0_64] : memref<2x32xf32, #tpu.memory_space<vmem>>, vector<2x32xf32>
    tpu.vector_store %arg9[%c0_63, %c0_64], %152 {strides = array<i32>} : memref<2x32xf32, #tpu.memory_space<vmem>>, vector<2x32xf32>,
    %c0_65 = arith.constant 0 : index
    %c0_66 = arith.constant 0 : index
    %154 = vector.load %arg10[%c0_65, %c0_66] : memref<2x32xf32, #tpu.memory_space<vmem>>, vector<2x32xf32>
    tpu.vector_store %arg10[%c0_65, %c0_66], %150 {strides = array<i32>} : memref<2x32xf32, #tpu.memory_space<vmem>>, vector<2x32xf32>,
    %155 = arith.index_cast %120 : i32 to index
    %c0_67 = arith.constant 0 : index
    %c0_68 = arith.constant 0 : index
    %156 = vector.load %arg6[%155, %c0_67, %c0_68] : memref<8x2x32xf32, #tpu.memory_space<vmem>>, vector<1x2x32xf32>
    %157 = vector.shape_cast %156 : vector<1x2x32xf32> to vector<2x32xf32>
    %158 = vector.shape_cast %152 : vector<2x32xf32> to vector<1x2x32xf32>
    tpu.vector_store %arg6[%155, %c0_67, %c0_68], %158 {strides = array<i32>} : memref<8x2x32xf32, #tpu.memory_space<vmem>>, vector<1x2x32xf32>,
    %c2_i32 = arith.constant 2 : i32
    %159 = arith.index_cast %c2_i32 : i32 to index
    %c0_69 = arith.constant 0 : index
    %c0_70 = arith.constant 0 : index
    %160 = vector.load %arg1[%159, %c0_69, %c0_70] : memref<8x2x128xf32, #tpu.memory_space<vmem>>, vector<1x2x128xf32>
    %161 = vector.shape_cast %160 : vector<1x2x128xf32> to vector<2x128xf32>
    %c0_71 = arith.constant 0 : index
    %c0_72 = arith.constant 0 : index
    %162 = vector.load %arg7[%c0_71, %c0_72] : memref<2x32xf32, #tpu.memory_space<vmem>>, vector<2x32xf32>
    %cst_73 = arith.constant dense<0.000000e+00> : vector<2x128xf32>
    %163 = tpu.matmul %162, %3, %cst_73 {dimension_numbers = #tpu.dot_dimension_numbers<[1], [0], [0], [1], [0, 0, 1, 1], [], []>} : vector<2x32xf32>, vector<32x128xf32>, vector<2x128xf32> -> vector<2x128xf32>
    %164 = arith.addf %161, %163 : vector<2x128xf32>
    %c0_74 = arith.constant 0 : index
    %c0_75 = arith.constant 0 : index
    %165 = vector.load %arg8[%c0_74, %c0_75] : memref<2x32xf32, #tpu.memory_space<vmem>>, vector<2x32xf32>
    %166 = vector.extract_strided_slice %164 {offsets = [0, 0], sizes = [2, 32], strides = [1, 1]} : vector<2x128xf32> to vector<2x32xf32>
    %167 = arith.negf %166 : vector<2x32xf32>
    %168 = math.exp %167 : vector<2x32xf32>
    %cst_76 = arith.constant 1.000000e+00 : f32
    %169 = vector.broadcast %cst_76 : f32 to vector<2x32xf32>
    %170 = arith.addf %169, %168 : vector<2x32xf32>
    %171 = arith.divf %169, %170 : vector<2x32xf32>
    %172 = vector.extract_strided_slice %164 {offsets = [0, 32], sizes = [2, 32], strides = [1, 1]} : vector<2x128xf32> to vector<2x32xf32>
    %173 = arith.negf %172 : vector<2x32xf32>
    %174 = math.exp %173 : vector<2x32xf32>
    %cst_77 = arith.constant 1.000000e+00 : f32
    %175 = vector.broadcast %cst_77 : f32 to vector<2x32xf32>
    %176 = arith.addf %175, %174 : vector<2x32xf32>
    %177 = arith.divf %175, %176 : vector<2x32xf32>
    %178 = vector.extract_strided_slice %164 {offsets = [0, 64], sizes = [2, 32], strides = [1, 1]} : vector<2x128xf32> to vector<2x32xf32>
    %179 = math.tanh %178 : vector<2x32xf32>
    %180 = vector.extract_strided_slice %164 {offsets = [0, 96], sizes = [2, 32], strides = [1, 1]} : vector<2x128xf32> to vector<2x32xf32>
    %181 = arith.negf %180 : vector<2x32xf32>
    %182 = math.exp %181 : vector<2x32xf32>
    %cst_78 = arith.constant 1.000000e+00 : f32
    %183 = vector.broadcast %cst_78 : f32 to vector<2x32xf32>
    %184 = arith.addf %183, %182 : vector<2x32xf32>
    %185 = arith.divf %183, %184 : vector<2x32xf32>
    %186 = arith.mulf %177, %165 : vector<2x32xf32>
    %187 = arith.mulf %171, %179 : vector<2x32xf32>
    %188 = arith.addf %186, %187 : vector<2x32xf32>
    %189 = math.tanh %188 : vector<2x32xf32>
    %190 = arith.mulf %185, %189 : vector<2x32xf32>
    %c0_79 = arith.constant 0 : index
    %c0_80 = arith.constant 0 : index
    %191 = vector.load %arg7[%c0_79, %c0_80] : memref<2x32xf32, #tpu.memory_space<vmem>>, vector<2x32xf32>
    tpu.vector_store %arg7[%c0_79, %c0_80], %190 {strides = array<i32>} : memref<2x32xf32, #tpu.memory_space<vmem>>, vector<2x32xf32>,
    %c0_81 = arith.constant 0 : index
    %c0_82 = arith.constant 0 : index
    %192 = vector.load %arg8[%c0_81, %c0_82] : memref<2x32xf32, #tpu.memory_space<vmem>>, vector<2x32xf32>
    tpu.vector_store %arg8[%c0_81, %c0_82], %188 {strides = array<i32>} : memref<2x32xf32, #tpu.memory_space<vmem>>, vector<2x32xf32>,
    %193 = arith.index_cast %c2_i32 : i32 to index
    %c0_83 = arith.constant 0 : index
    %c0_84 = arith.constant 0 : index
    %194 = vector.load %arg5[%193, %c0_83, %c0_84] : memref<8x2x32xf32, #tpu.memory_space<vmem>>, vector<1x2x32xf32>
    %195 = vector.shape_cast %194 : vector<1x2x32xf32> to vector<2x32xf32>
    %196 = vector.shape_cast %190 : vector<2x32xf32> to vector<1x2x32xf32>
    tpu.vector_store %arg5[%193, %c0_83, %c0_84], %196 {strides = array<i32>} : memref<8x2x32xf32, #tpu.memory_space<vmem>>, vector<1x2x32xf32>,
    %c7_i32_85 = arith.constant 7 : i32
    %197 = arith.subi %c7_i32_85, %c2_i32 : i32
    %198 = arith.index_cast %197 : i32 to index
    %c0_86 = arith.constant 0 : index
    %c0_87 = arith.constant 0 : index
    %199 = vector.load %arg2[%198, %c0_86, %c0_87] : memref<8x2x128xf32, #tpu.memory_space<vmem>>, vector<1x2x128xf32>
    %200 = vector.shape_cast %199 : vector<1x2x128xf32> to vector<2x128xf32>
    %c0_88 = arith.constant 0 : index
    %c0_89 = arith.constant 0 : index
    %201 = vector.load %arg9[%c0_88, %c0_89] : memref<2x32xf32, #tpu.memory_space<vmem>>, vector<2x32xf32>
    %cst_90 = arith.constant dense<0.000000e+00> : vector<2x128xf32>
    %202 = tpu.matmul %201, %4, %cst_90 {dimension_numbers = #tpu.dot_dimension_numbers<[1], [0], [0], [1], [0, 0, 1, 1], [], []>} : vector<2x32xf32>, vector<32x128xf32>, vector<2x128xf32> -> vector<2x128xf32>
    %203 = arith.addf %200, %202 : vector<2x128xf32>
    %c0_91 = arith.constant 0 : index
    %c0_92 = arith.constant 0 : index
    %204 = vector.load %arg10[%c0_91, %c0_92] : memref<2x32xf32, #tpu.memory_space<vmem>>, vector<2x32xf32>
    %205 = vector.extract_strided_slice %203 {offsets = [0, 0], sizes = [2, 32], strides = [1, 1]} : vector<2x128xf32> to vector<2x32xf32>
    %206 = arith.negf %205 : vector<2x32xf32>
    %207 = math.exp %206 : vector<2x32xf32>
    %cst_93 = arith.constant 1.000000e+00 : f32
    %208 = vector.broadcast %cst_93 : f32 to vector<2x32xf32>
    %209 = arith.addf %208, %207 : vector<2x32xf32>
    %210 = arith.divf %208, %209 : vector<2x32xf32>
    %211 = vector.extract_strided_slice %203 {offsets = [0, 32], sizes = [2, 32], strides = [1, 1]} : vector<2x128xf32> to vector<2x32xf32>
    %212 = arith.negf %211 : vector<2x32xf32>
    %213 = math.exp %212 : vector<2x32xf32>
    %cst_94 = arith.constant 1.000000e+00 : f32
    %214 = vector.broadcast %cst_94 : f32 to vector<2x32xf32>
    %215 = arith.addf %214, %213 : vector<2x32xf32>
    %216 = arith.divf %214, %215 : vector<2x32xf32>
    %217 = vector.extract_strided_slice %203 {offsets = [0, 64], sizes = [2, 32], strides = [1, 1]} : vector<2x128xf32> to vector<2x32xf32>
    %218 = math.tanh %217 : vector<2x32xf32>
    %219 = vector.extract_strided_slice %203 {offsets = [0, 96], sizes = [2, 32], strides = [1, 1]} : vector<2x128xf32> to vector<2x32xf32>
    %220 = arith.negf %219 : vector<2x32xf32>
    %221 = math.exp %220 : vector<2x32xf32>
    %cst_95 = arith.constant 1.000000e+00 : f32
    %222 = vector.broadcast %cst_95 : f32 to vector<2x32xf32>
    %223 = arith.addf %222, %221 : vector<2x32xf32>
    %224 = arith.divf %222, %223 : vector<2x32xf32>
    %225 = arith.mulf %216, %204 : vector<2x32xf32>
    %226 = arith.mulf %210, %218 : vector<2x32xf32>
    %227 = arith.addf %225, %226 : vector<2x32xf32>
    %228 = math.tanh %227 : vector<2x32xf32>
    %229 = arith.mulf %224, %228 : vector<2x32xf32>
    %c0_96 = arith.constant 0 : index
    %c0_97 = arith.constant 0 : index
    %230 = vector.load %arg9[%c0_96, %c0_97] : memref<2x32xf32, #tpu.memory_space<vmem>>, vector<2x32xf32>
    tpu.vector_store %arg9[%c0_96, %c0_97], %229 {strides = array<i32>} : memref<2x32xf32, #tpu.memory_space<vmem>>, vector<2x32xf32>,
    %c0_98 = arith.constant 0 : index
    %c0_99 = arith.constant 0 : index
    %231 = vector.load %arg10[%c0_98, %c0_99] : memref<2x32xf32, #tpu.memory_space<vmem>>, vector<2x32xf32>
    tpu.vector_store %arg10[%c0_98, %c0_99], %227 {strides = array<i32>} : memref<2x32xf32, #tpu.memory_space<vmem>>, vector<2x32xf32>,
    %232 = arith.index_cast %197 : i32 to index
    %c0_100 = arith.constant 0 : index
    %c0_101 = arith.constant 0 : index
    %233 = vector.load %arg6[%232, %c0_100, %c0_101] : memref<8x2x32xf32, #tpu.memory_space<vmem>>, vector<1x2x32xf32>
    %234 = vector.shape_cast %233 : vector<1x2x32xf32> to vector<2x32xf32>
    %235 = vector.shape_cast %229 : vector<2x32xf32> to vector<1x2x32xf32>
    tpu.vector_store %arg6[%232, %c0_100, %c0_101], %235 {strides = array<i32>} : memref<8x2x32xf32, #tpu.memory_space<vmem>>, vector<1x2x32xf32>,
    %c3_i32 = arith.constant 3 : i32
    %236 = arith.index_cast %c3_i32 : i32 to index
    %c0_102 = arith.constant 0 : index
    %c0_103 = arith.constant 0 : index
    %237 = vector.load %arg1[%236, %c0_102, %c0_103] : memref<8x2x128xf32, #tpu.memory_space<vmem>>, vector<1x2x128xf32>
    %238 = vector.shape_cast %237 : vector<1x2x128xf32> to vector<2x128xf32>
    %c0_104 = arith.constant 0 : index
    %c0_105 = arith.constant 0 : index
    %239 = vector.load %arg7[%c0_104, %c0_105] : memref<2x32xf32, #tpu.memory_space<vmem>>, vector<2x32xf32>
    %cst_106 = arith.constant dense<0.000000e+00> : vector<2x128xf32>
    %240 = tpu.matmul %239, %3, %cst_106 {dimension_numbers = #tpu.dot_dimension_numbers<[1], [0], [0], [1], [0, 0, 1, 1], [], []>} : vector<2x32xf32>, vector<32x128xf32>, vector<2x128xf32> -> vector<2x128xf32>
    %241 = arith.addf %238, %240 : vector<2x128xf32>
    %c0_107 = arith.constant 0 : index
    %c0_108 = arith.constant 0 : index
    %242 = vector.load %arg8[%c0_107, %c0_108] : memref<2x32xf32, #tpu.memory_space<vmem>>, vector<2x32xf32>
    %243 = vector.extract_strided_slice %241 {offsets = [0, 0], sizes = [2, 32], strides = [1, 1]} : vector<2x128xf32> to vector<2x32xf32>
    %244 = arith.negf %243 : vector<2x32xf32>
    %245 = math.exp %244 : vector<2x32xf32>
    %cst_109 = arith.constant 1.000000e+00 : f32
    %246 = vector.broadcast %cst_109 : f32 to vector<2x32xf32>
    %247 = arith.addf %246, %245 : vector<2x32xf32>
    %248 = arith.divf %246, %247 : vector<2x32xf32>
    %249 = vector.extract_strided_slice %241 {offsets = [0, 32], sizes = [2, 32], strides = [1, 1]} : vector<2x128xf32> to vector<2x32xf32>
    %250 = arith.negf %249 : vector<2x32xf32>
    %251 = math.exp %250 : vector<2x32xf32>
    %cst_110 = arith.constant 1.000000e+00 : f32
    %252 = vector.broadcast %cst_110 : f32 to vector<2x32xf32>
    %253 = arith.addf %252, %251 : vector<2x32xf32>
    %254 = arith.divf %252, %253 : vector<2x32xf32>
    %255 = vector.extract_strided_slice %241 {offsets = [0, 64], sizes = [2, 32], strides = [1, 1]} : vector<2x128xf32> to vector<2x32xf32>
    %256 = math.tanh %255 : vector<2x32xf32>
    %257 = vector.extract_strided_slice %241 {offsets = [0, 96], sizes = [2, 32], strides = [1, 1]} : vector<2x128xf32> to vector<2x32xf32>
    %258 = arith.negf %257 : vector<2x32xf32>
    %259 = math.exp %258 : vector<2x32xf32>
    %cst_111 = arith.constant 1.000000e+00 : f32
    %260 = vector.broadcast %cst_111 : f32 to vector<2x32xf32>
    %261 = arith.addf %260, %259 : vector<2x32xf32>
    %262 = arith.divf %260, %261 : vector<2x32xf32>
    %263 = arith.mulf %254, %242 : vector<2x32xf32>
    %264 = arith.mulf %248, %256 : vector<2x32xf32>
    %265 = arith.addf %263, %264 : vector<2x32xf32>
    %266 = math.tanh %265 : vector<2x32xf32>
    %267 = arith.mulf %262, %266 : vector<2x32xf32>
    %c0_112 = arith.constant 0 : index
    %c0_113 = arith.constant 0 : index
    %268 = vector.load %arg7[%c0_112, %c0_113] : memref<2x32xf32, #tpu.memory_space<vmem>>, vector<2x32xf32>
    tpu.vector_store %arg7[%c0_112, %c0_113], %267 {strides = array<i32>} : memref<2x32xf32, #tpu.memory_space<vmem>>, vector<2x32xf32>,
    %c0_114 = arith.constant 0 : index
    %c0_115 = arith.constant 0 : index
    %269 = vector.load %arg8[%c0_114, %c0_115] : memref<2x32xf32, #tpu.memory_space<vmem>>, vector<2x32xf32>
    tpu.vector_store %arg8[%c0_114, %c0_115], %265 {strides = array<i32>} : memref<2x32xf32, #tpu.memory_space<vmem>>, vector<2x32xf32>,
    %270 = arith.index_cast %c3_i32 : i32 to index
    %c0_116 = arith.constant 0 : index
    %c0_117 = arith.constant 0 : index
    %271 = vector.load %arg5[%270, %c0_116, %c0_117] : memref<8x2x32xf32, #tpu.memory_space<vmem>>, vector<1x2x32xf32>
    %272 = vector.shape_cast %271 : vector<1x2x32xf32> to vector<2x32xf32>
    %273 = vector.shape_cast %267 : vector<2x32xf32> to vector<1x2x32xf32>
    tpu.vector_store %arg5[%270, %c0_116, %c0_117], %273 {strides = array<i32>} : memref<8x2x32xf32, #tpu.memory_space<vmem>>, vector<1x2x32xf32>,
    %c7_i32_118 = arith.constant 7 : i32
    %274 = arith.subi %c7_i32_118, %c3_i32 : i32
    %275 = arith.index_cast %274 : i32 to index
    %c0_119 = arith.constant 0 : index
    %c0_120 = arith.constant 0 : index
    %276 = vector.load %arg2[%275, %c0_119, %c0_120] : memref<8x2x128xf32, #tpu.memory_space<vmem>>, vector<1x2x128xf32>
    %277 = vector.shape_cast %276 : vector<1x2x128xf32> to vector<2x128xf32>
    %c0_121 = arith.constant 0 : index
    %c0_122 = arith.constant 0 : index
    %278 = vector.load %arg9[%c0_121, %c0_122] : memref<2x32xf32, #tpu.memory_space<vmem>>, vector<2x32xf32>
    %cst_123 = arith.constant dense<0.000000e+00> : vector<2x128xf32>
    %279 = tpu.matmul %278, %4, %cst_123 {dimension_numbers = #tpu.dot_dimension_numbers<[1], [0], [0], [1], [0, 0, 1, 1], [], []>} : vector<2x32xf32>, vector<32x128xf32>, vector<2x128xf32> -> vector<2x128xf32>
    %280 = arith.addf %277, %279 : vector<2x128xf32>
    %c0_124 = arith.constant 0 : index
    %c0_125 = arith.constant 0 : index
    %281 = vector.load %arg10[%c0_124, %c0_125] : memref<2x32xf32, #tpu.memory_space<vmem>>, vector<2x32xf32>
    %282 = vector.extract_strided_slice %280 {offsets = [0, 0], sizes = [2, 32], strides = [1, 1]} : vector<2x128xf32> to vector<2x32xf32>
    %283 = arith.negf %282 : vector<2x32xf32>
    %284 = math.exp %283 : vector<2x32xf32>
    %cst_126 = arith.constant 1.000000e+00 : f32
    %285 = vector.broadcast %cst_126 : f32 to vector<2x32xf32>
    %286 = arith.addf %285, %284 : vector<2x32xf32>
    %287 = arith.divf %285, %286 : vector<2x32xf32>
    %288 = vector.extract_strided_slice %280 {offsets = [0, 32], sizes = [2, 32], strides = [1, 1]} : vector<2x128xf32> to vector<2x32xf32>
    %289 = arith.negf %288 : vector<2x32xf32>
    %290 = math.exp %289 : vector<2x32xf32>
    %cst_127 = arith.constant 1.000000e+00 : f32
    %291 = vector.broadcast %cst_127 : f32 to vector<2x32xf32>
    %292 = arith.addf %291, %290 : vector<2x32xf32>
    %293 = arith.divf %291, %292 : vector<2x32xf32>
    %294 = vector.extract_strided_slice %280 {offsets = [0, 64], sizes = [2, 32], strides = [1, 1]} : vector<2x128xf32> to vector<2x32xf32>
    %295 = math.tanh %294 : vector<2x32xf32>
    %296 = vector.extract_strided_slice %280 {offsets = [0, 96], sizes = [2, 32], strides = [1, 1]} : vector<2x128xf32> to vector<2x32xf32>
    %297 = arith.negf %296 : vector<2x32xf32>
    %298 = math.exp %297 : vector<2x32xf32>
    %cst_128 = arith.constant 1.000000e+00 : f32
    %299 = vector.broadcast %cst_128 : f32 to vector<2x32xf32>
    %300 = arith.addf %299, %298 : vector<2x32xf32>
    %301 = arith.divf %299, %300 : vector<2x32xf32>
    %302 = arith.mulf %293, %281 : vector<2x32xf32>
    %303 = arith.mulf %287, %295 : vector<2x32xf32>
    %304 = arith.addf %302, %303 : vector<2x32xf32>
    %305 = math.tanh %304 : vector<2x32xf32>
    %306 = arith.mulf %301, %305 : vector<2x32xf32>
    %c0_129 = arith.constant 0 : index
    %c0_130 = arith.constant 0 : index
    %307 = vector.load %arg9[%c0_129, %c0_130] : memref<2x32xf32, #tpu.memory_space<vmem>>, vector<2x32xf32>
    tpu.vector_store %arg9[%c0_129, %c0_130], %306 {strides = array<i32>} : memref<2x32xf32, #tpu.memory_space<vmem>>, vector<2x32xf32>,
    %c0_131 = arith.constant 0 : index
    %c0_132 = arith.constant 0 : index
    %308 = vector.load %arg10[%c0_131, %c0_132] : memref<2x32xf32, #tpu.memory_space<vmem>>, vector<2x32xf32>
    tpu.vector_store %arg10[%c0_131, %c0_132], %304 {strides = array<i32>} : memref<2x32xf32, #tpu.memory_space<vmem>>, vector<2x32xf32>,
    %309 = arith.index_cast %274 : i32 to index
    %c0_133 = arith.constant 0 : index
    %c0_134 = arith.constant 0 : index
    %310 = vector.load %arg6[%309, %c0_133, %c0_134] : memref<8x2x32xf32, #tpu.memory_space<vmem>>, vector<1x2x32xf32>
    %311 = vector.shape_cast %310 : vector<1x2x32xf32> to vector<2x32xf32>
    %312 = vector.shape_cast %306 : vector<2x32xf32> to vector<1x2x32xf32>
    tpu.vector_store %arg6[%309, %c0_133, %c0_134], %312 {strides = array<i32>} : memref<8x2x32xf32, #tpu.memory_space<vmem>>, vector<1x2x32xf32>,
    %c4_i32 = arith.constant 4 : i32
    %313 = arith.index_cast %c4_i32 : i32 to index
    %c0_135 = arith.constant 0 : index
    %c0_136 = arith.constant 0 : index
    %314 = vector.load %arg1[%313, %c0_135, %c0_136] : memref<8x2x128xf32, #tpu.memory_space<vmem>>, vector<1x2x128xf32>
    %315 = vector.shape_cast %314 : vector<1x2x128xf32> to vector<2x128xf32>
    %c0_137 = arith.constant 0 : index
    %c0_138 = arith.constant 0 : index
    %316 = vector.load %arg7[%c0_137, %c0_138] : memref<2x32xf32, #tpu.memory_space<vmem>>, vector<2x32xf32>
    %cst_139 = arith.constant dense<0.000000e+00> : vector<2x128xf32>
    %317 = tpu.matmul %316, %3, %cst_139 {dimension_numbers = #tpu.dot_dimension_numbers<[1], [0], [0], [1], [0, 0, 1, 1], [], []>} : vector<2x32xf32>, vector<32x128xf32>, vector<2x128xf32> -> vector<2x128xf32>
    %318 = arith.addf %315, %317 : vector<2x128xf32>
    %c0_140 = arith.constant 0 : index
    %c0_141 = arith.constant 0 : index
    %319 = vector.load %arg8[%c0_140, %c0_141] : memref<2x32xf32, #tpu.memory_space<vmem>>, vector<2x32xf32>
    %320 = vector.extract_strided_slice %318 {offsets = [0, 0], sizes = [2, 32], strides = [1, 1]} : vector<2x128xf32> to vector<2x32xf32>
    %321 = arith.negf %320 : vector<2x32xf32>
    %322 = math.exp %321 : vector<2x32xf32>
    %cst_142 = arith.constant 1.000000e+00 : f32
    %323 = vector.broadcast %cst_142 : f32 to vector<2x32xf32>
    %324 = arith.addf %323, %322 : vector<2x32xf32>
    %325 = arith.divf %323, %324 : vector<2x32xf32>
    %326 = vector.extract_strided_slice %318 {offsets = [0, 32], sizes = [2, 32], strides = [1, 1]} : vector<2x128xf32> to vector<2x32xf32>
    %327 = arith.negf %326 : vector<2x32xf32>
    %328 = math.exp %327 : vector<2x32xf32>
    %cst_143 = arith.constant 1.000000e+00 : f32
    %329 = vector.broadcast %cst_143 : f32 to vector<2x32xf32>
    %330 = arith.addf %329, %328 : vector<2x32xf32>
    %331 = arith.divf %329, %330 : vector<2x32xf32>
    %332 = vector.extract_strided_slice %318 {offsets = [0, 64], sizes = [2, 32], strides = [1, 1]} : vector<2x128xf32> to vector<2x32xf32>
    %333 = math.tanh %332 : vector<2x32xf32>
    %334 = vector.extract_strided_slice %318 {offsets = [0, 96], sizes = [2, 32], strides = [1, 1]} : vector<2x128xf32> to vector<2x32xf32>
    %335 = arith.negf %334 : vector<2x32xf32>
    %336 = math.exp %335 : vector<2x32xf32>
    %cst_144 = arith.constant 1.000000e+00 : f32
    %337 = vector.broadcast %cst_144 : f32 to vector<2x32xf32>
    %338 = arith.addf %337, %336 : vector<2x32xf32>
    %339 = arith.divf %337, %338 : vector<2x32xf32>
    %340 = arith.mulf %331, %319 : vector<2x32xf32>
    %341 = arith.mulf %325, %333 : vector<2x32xf32>
    %342 = arith.addf %340, %341 : vector<2x32xf32>
    %343 = math.tanh %342 : vector<2x32xf32>
    %344 = arith.mulf %339, %343 : vector<2x32xf32>
    %c0_145 = arith.constant 0 : index
    %c0_146 = arith.constant 0 : index
    %345 = vector.load %arg7[%c0_145, %c0_146] : memref<2x32xf32, #tpu.memory_space<vmem>>, vector<2x32xf32>
    tpu.vector_store %arg7[%c0_145, %c0_146], %344 {strides = array<i32>} : memref<2x32xf32, #tpu.memory_space<vmem>>, vector<2x32xf32>,
    %c0_147 = arith.constant 0 : index
    %c0_148 = arith.constant 0 : index
    %346 = vector.load %arg8[%c0_147, %c0_148] : memref<2x32xf32, #tpu.memory_space<vmem>>, vector<2x32xf32>
    tpu.vector_store %arg8[%c0_147, %c0_148], %342 {strides = array<i32>} : memref<2x32xf32, #tpu.memory_space<vmem>>, vector<2x32xf32>,
    %347 = arith.index_cast %c4_i32 : i32 to index
    %c0_149 = arith.constant 0 : index
    %c0_150 = arith.constant 0 : index
    %348 = vector.load %arg5[%347, %c0_149, %c0_150] : memref<8x2x32xf32, #tpu.memory_space<vmem>>, vector<1x2x32xf32>
    %349 = vector.shape_cast %348 : vector<1x2x32xf32> to vector<2x32xf32>
    %350 = vector.shape_cast %344 : vector<2x32xf32> to vector<1x2x32xf32>
    tpu.vector_store %arg5[%347, %c0_149, %c0_150], %350 {strides = array<i32>} : memref<8x2x32xf32, #tpu.memory_space<vmem>>, vector<1x2x32xf32>,
    %c7_i32_151 = arith.constant 7 : i32
    %351 = arith.subi %c7_i32_151, %c4_i32 : i32
    %352 = arith.index_cast %351 : i32 to index
    %c0_152 = arith.constant 0 : index
    %c0_153 = arith.constant 0 : index
    %353 = vector.load %arg2[%352, %c0_152, %c0_153] : memref<8x2x128xf32, #tpu.memory_space<vmem>>, vector<1x2x128xf32>
    %354 = vector.shape_cast %353 : vector<1x2x128xf32> to vector<2x128xf32>
    %c0_154 = arith.constant 0 : index
    %c0_155 = arith.constant 0 : index
    %355 = vector.load %arg9[%c0_154, %c0_155] : memref<2x32xf32, #tpu.memory_space<vmem>>, vector<2x32xf32>
    %cst_156 = arith.constant dense<0.000000e+00> : vector<2x128xf32>
    %356 = tpu.matmul %355, %4, %cst_156 {dimension_numbers = #tpu.dot_dimension_numbers<[1], [0], [0], [1], [0, 0, 1, 1], [], []>} : vector<2x32xf32>, vector<32x128xf32>, vector<2x128xf32> -> vector<2x128xf32>
    %357 = arith.addf %354, %356 : vector<2x128xf32>
    %c0_157 = arith.constant 0 : index
    %c0_158 = arith.constant 0 : index
    %358 = vector.load %arg10[%c0_157, %c0_158] : memref<2x32xf32, #tpu.memory_space<vmem>>, vector<2x32xf32>
    %359 = vector.extract_strided_slice %357 {offsets = [0, 0], sizes = [2, 32], strides = [1, 1]} : vector<2x128xf32> to vector<2x32xf32>
    %360 = arith.negf %359 : vector<2x32xf32>
    %361 = math.exp %360 : vector<2x32xf32>
    %cst_159 = arith.constant 1.000000e+00 : f32
    %362 = vector.broadcast %cst_159 : f32 to vector<2x32xf32>
    %363 = arith.addf %362, %361 : vector<2x32xf32>
    %364 = arith.divf %362, %363 : vector<2x32xf32>
    %365 = vector.extract_strided_slice %357 {offsets = [0, 32], sizes = [2, 32], strides = [1, 1]} : vector<2x128xf32> to vector<2x32xf32>
    %366 = arith.negf %365 : vector<2x32xf32>
    %367 = math.exp %366 : vector<2x32xf32>
    %cst_160 = arith.constant 1.000000e+00 : f32
    %368 = vector.broadcast %cst_160 : f32 to vector<2x32xf32>
    %369 = arith.addf %368, %367 : vector<2x32xf32>
    %370 = arith.divf %368, %369 : vector<2x32xf32>
    %371 = vector.extract_strided_slice %357 {offsets = [0, 64], sizes = [2, 32], strides = [1, 1]} : vector<2x128xf32> to vector<2x32xf32>
    %372 = math.tanh %371 : vector<2x32xf32>
    %373 = vector.extract_strided_slice %357 {offsets = [0, 96], sizes = [2, 32], strides = [1, 1]} : vector<2x128xf32> to vector<2x32xf32>
    %374 = arith.negf %373 : vector<2x32xf32>
    %375 = math.exp %374 : vector<2x32xf32>
    %cst_161 = arith.constant 1.000000e+00 : f32
    %376 = vector.broadcast %cst_161 : f32 to vector<2x32xf32>
    %377 = arith.addf %376, %375 : vector<2x32xf32>
    %378 = arith.divf %376, %377 : vector<2x32xf32>
    %379 = arith.mulf %370, %358 : vector<2x32xf32>
    %380 = arith.mulf %364, %372 : vector<2x32xf32>
    %381 = arith.addf %379, %380 : vector<2x32xf32>
    %382 = math.tanh %381 : vector<2x32xf32>
    %383 = arith.mulf %378, %382 : vector<2x32xf32>
    %c0_162 = arith.constant 0 : index
    %c0_163 = arith.constant 0 : index
    %384 = vector.load %arg9[%c0_162, %c0_163] : memref<2x32xf32, #tpu.memory_space<vmem>>, vector<2x32xf32>
    tpu.vector_store %arg9[%c0_162, %c0_163], %383 {strides = array<i32>} : memref<2x32xf32, #tpu.memory_space<vmem>>, vector<2x32xf32>,
    %c0_164 = arith.constant 0 : index
    %c0_165 = arith.constant 0 : index
    %385 = vector.load %arg10[%c0_164, %c0_165] : memref<2x32xf32, #tpu.memory_space<vmem>>, vector<2x32xf32>
    tpu.vector_store %arg10[%c0_164, %c0_165], %381 {strides = array<i32>} : memref<2x32xf32, #tpu.memory_space<vmem>>, vector<2x32xf32>,
    %386 = arith.index_cast %351 : i32 to index
    %c0_166 = arith.constant 0 : index
    %c0_167 = arith.constant 0 : index
    %387 = vector.load %arg6[%386, %c0_166, %c0_167] : memref<8x2x32xf32, #tpu.memory_space<vmem>>, vector<1x2x32xf32>
    %388 = vector.shape_cast %387 : vector<1x2x32xf32> to vector<2x32xf32>
    %389 = vector.shape_cast %383 : vector<2x32xf32> to vector<1x2x32xf32>
    tpu.vector_store %arg6[%386, %c0_166, %c0_167], %389 {strides = array<i32>} : memref<8x2x32xf32, #tpu.memory_space<vmem>>, vector<1x2x32xf32>,
    %c5_i32 = arith.constant 5 : i32
    %390 = arith.index_cast %c5_i32 : i32 to index
    %c0_168 = arith.constant 0 : index
    %c0_169 = arith.constant 0 : index
    %391 = vector.load %arg1[%390, %c0_168, %c0_169] : memref<8x2x128xf32, #tpu.memory_space<vmem>>, vector<1x2x128xf32>
    %392 = vector.shape_cast %391 : vector<1x2x128xf32> to vector<2x128xf32>
    %c0_170 = arith.constant 0 : index
    %c0_171 = arith.constant 0 : index
    %393 = vector.load %arg7[%c0_170, %c0_171] : memref<2x32xf32, #tpu.memory_space<vmem>>, vector<2x32xf32>
    %cst_172 = arith.constant dense<0.000000e+00> : vector<2x128xf32>
    %394 = tpu.matmul %393, %3, %cst_172 {dimension_numbers = #tpu.dot_dimension_numbers<[1], [0], [0], [1], [0, 0, 1, 1], [], []>} : vector<2x32xf32>, vector<32x128xf32>, vector<2x128xf32> -> vector<2x128xf32>
    %395 = arith.addf %392, %394 : vector<2x128xf32>
    %c0_173 = arith.constant 0 : index
    %c0_174 = arith.constant 0 : index
    %396 = vector.load %arg8[%c0_173, %c0_174] : memref<2x32xf32, #tpu.memory_space<vmem>>, vector<2x32xf32>
    %397 = vector.extract_strided_slice %395 {offsets = [0, 0], sizes = [2, 32], strides = [1, 1]} : vector<2x128xf32> to vector<2x32xf32>
    %398 = arith.negf %397 : vector<2x32xf32>
    %399 = math.exp %398 : vector<2x32xf32>
    %cst_175 = arith.constant 1.000000e+00 : f32
    %400 = vector.broadcast %cst_175 : f32 to vector<2x32xf32>
    %401 = arith.addf %400, %399 : vector<2x32xf32>
    %402 = arith.divf %400, %401 : vector<2x32xf32>
    %403 = vector.extract_strided_slice %395 {offsets = [0, 32], sizes = [2, 32], strides = [1, 1]} : vector<2x128xf32> to vector<2x32xf32>
    %404 = arith.negf %403 : vector<2x32xf32>
    %405 = math.exp %404 : vector<2x32xf32>
    %cst_176 = arith.constant 1.000000e+00 : f32
    %406 = vector.broadcast %cst_176 : f32 to vector<2x32xf32>
    %407 = arith.addf %406, %405 : vector<2x32xf32>
    %408 = arith.divf %406, %407 : vector<2x32xf32>
    %409 = vector.extract_strided_slice %395 {offsets = [0, 64], sizes = [2, 32], strides = [1, 1]} : vector<2x128xf32> to vector<2x32xf32>
    %410 = math.tanh %409 : vector<2x32xf32>
    %411 = vector.extract_strided_slice %395 {offsets = [0, 96], sizes = [2, 32], strides = [1, 1]} : vector<2x128xf32> to vector<2x32xf32>
    %412 = arith.negf %411 : vector<2x32xf32>
    %413 = math.exp %412 : vector<2x32xf32>
    %cst_177 = arith.constant 1.000000e+00 : f32
    %414 = vector.broadcast %cst_177 : f32 to vector<2x32xf32>
    %415 = arith.addf %414, %413 : vector<2x32xf32>
    %416 = arith.divf %414, %415 : vector<2x32xf32>
    %417 = arith.mulf %408, %396 : vector<2x32xf32>
    %418 = arith.mulf %402, %410 : vector<2x32xf32>
    %419 = arith.addf %417, %418 : vector<2x32xf32>
    %420 = math.tanh %419 : vector<2x32xf32>
    %421 = arith.mulf %416, %420 : vector<2x32xf32>
    %c0_178 = arith.constant 0 : index
    %c0_179 = arith.constant 0 : index
    %422 = vector.load %arg7[%c0_178, %c0_179] : memref<2x32xf32, #tpu.memory_space<vmem>>, vector<2x32xf32>
    tpu.vector_store %arg7[%c0_178, %c0_179], %421 {strides = array<i32>} : memref<2x32xf32, #tpu.memory_space<vmem>>, vector<2x32xf32>,
    %c0_180 = arith.constant 0 : index
    %c0_181 = arith.constant 0 : index
    %423 = vector.load %arg8[%c0_180, %c0_181] : memref<2x32xf32, #tpu.memory_space<vmem>>, vector<2x32xf32>
    tpu.vector_store %arg8[%c0_180, %c0_181], %419 {strides = array<i32>} : memref<2x32xf32, #tpu.memory_space<vmem>>, vector<2x32xf32>,
    %424 = arith.index_cast %c5_i32 : i32 to index
    %c0_182 = arith.constant 0 : index
    %c0_183 = arith.constant 0 : index
    %425 = vector.load %arg5[%424, %c0_182, %c0_183] : memref<8x2x32xf32, #tpu.memory_space<vmem>>, vector<1x2x32xf32>
    %426 = vector.shape_cast %425 : vector<1x2x32xf32> to vector<2x32xf32>
    %427 = vector.shape_cast %421 : vector<2x32xf32> to vector<1x2x32xf32>
    tpu.vector_store %arg5[%424, %c0_182, %c0_183], %427 {strides = array<i32>} : memref<8x2x32xf32, #tpu.memory_space<vmem>>, vector<1x2x32xf32>,
    %c7_i32_184 = arith.constant 7 : i32
    %428 = arith.subi %c7_i32_184, %c5_i32 : i32
    %429 = arith.index_cast %428 : i32 to index
    %c0_185 = arith.constant 0 : index
    %c0_186 = arith.constant 0 : index
    %430 = vector.load %arg2[%429, %c0_185, %c0_186] : memref<8x2x128xf32, #tpu.memory_space<vmem>>, vector<1x2x128xf32>
    %431 = vector.shape_cast %430 : vector<1x2x128xf32> to vector<2x128xf32>
    %c0_187 = arith.constant 0 : index
    %c0_188 = arith.constant 0 : index
    %432 = vector.load %arg9[%c0_187, %c0_188] : memref<2x32xf32, #tpu.memory_space<vmem>>, vector<2x32xf32>
    %cst_189 = arith.constant dense<0.000000e+00> : vector<2x128xf32>
    %433 = tpu.matmul %432, %4, %cst_189 {dimension_numbers = #tpu.dot_dimension_numbers<[1], [0], [0], [1], [0, 0, 1, 1], [], []>} : vector<2x32xf32>, vector<32x128xf32>, vector<2x128xf32> -> vector<2x128xf32>
    %434 = arith.addf %431, %433 : vector<2x128xf32>
    %c0_190 = arith.constant 0 : index
    %c0_191 = arith.constant 0 : index
    %435 = vector.load %arg10[%c0_190, %c0_191] : memref<2x32xf32, #tpu.memory_space<vmem>>, vector<2x32xf32>
    %436 = vector.extract_strided_slice %434 {offsets = [0, 0], sizes = [2, 32], strides = [1, 1]} : vector<2x128xf32> to vector<2x32xf32>
    %437 = arith.negf %436 : vector<2x32xf32>
    %438 = math.exp %437 : vector<2x32xf32>
    %cst_192 = arith.constant 1.000000e+00 : f32
    %439 = vector.broadcast %cst_192 : f32 to vector<2x32xf32>
    %440 = arith.addf %439, %438 : vector<2x32xf32>
    %441 = arith.divf %439, %440 : vector<2x32xf32>
    %442 = vector.extract_strided_slice %434 {offsets = [0, 32], sizes = [2, 32], strides = [1, 1]} : vector<2x128xf32> to vector<2x32xf32>
    %443 = arith.negf %442 : vector<2x32xf32>
    %444 = math.exp %443 : vector<2x32xf32>
    %cst_193 = arith.constant 1.000000e+00 : f32
    %445 = vector.broadcast %cst_193 : f32 to vector<2x32xf32>
    %446 = arith.addf %445, %444 : vector<2x32xf32>
    %447 = arith.divf %445, %446 : vector<2x32xf32>
    %448 = vector.extract_strided_slice %434 {offsets = [0, 64], sizes = [2, 32], strides = [1, 1]} : vector<2x128xf32> to vector<2x32xf32>
    %449 = math.tanh %448 : vector<2x32xf32>
    %450 = vector.extract_strided_slice %434 {offsets = [0, 96], sizes = [2, 32], strides = [1, 1]} : vector<2x128xf32> to vector<2x32xf32>
    %451 = arith.negf %450 : vector<2x32xf32>
    %452 = math.exp %451 : vector<2x32xf32>
    %cst_194 = arith.constant 1.000000e+00 : f32
    %453 = vector.broadcast %cst_194 : f32 to vector<2x32xf32>
    %454 = arith.addf %453, %452 : vector<2x32xf32>
    %455 = arith.divf %453, %454 : vector<2x32xf32>
    %456 = arith.mulf %447, %435 : vector<2x32xf32>
    %457 = arith.mulf %441, %449 : vector<2x32xf32>
    %458 = arith.addf %456, %457 : vector<2x32xf32>
    %459 = math.tanh %458 : vector<2x32xf32>
    %460 = arith.mulf %455, %459 : vector<2x32xf32>
    %c0_195 = arith.constant 0 : index
    %c0_196 = arith.constant 0 : index
    %461 = vector.load %arg9[%c0_195, %c0_196] : memref<2x32xf32, #tpu.memory_space<vmem>>, vector<2x32xf32>
    tpu.vector_store %arg9[%c0_195, %c0_196], %460 {strides = array<i32>} : memref<2x32xf32, #tpu.memory_space<vmem>>, vector<2x32xf32>,
    %c0_197 = arith.constant 0 : index
    %c0_198 = arith.constant 0 : index
    %462 = vector.load %arg10[%c0_197, %c0_198] : memref<2x32xf32, #tpu.memory_space<vmem>>, vector<2x32xf32>
    tpu.vector_store %arg10[%c0_197, %c0_198], %458 {strides = array<i32>} : memref<2x32xf32, #tpu.memory_space<vmem>>, vector<2x32xf32>,
    %463 = arith.index_cast %428 : i32 to index
    %c0_199 = arith.constant 0 : index
    %c0_200 = arith.constant 0 : index
    %464 = vector.load %arg6[%463, %c0_199, %c0_200] : memref<8x2x32xf32, #tpu.memory_space<vmem>>, vector<1x2x32xf32>
    %465 = vector.shape_cast %464 : vector<1x2x32xf32> to vector<2x32xf32>
    %466 = vector.shape_cast %460 : vector<2x32xf32> to vector<1x2x32xf32>
    tpu.vector_store %arg6[%463, %c0_199, %c0_200], %466 {strides = array<i32>} : memref<8x2x32xf32, #tpu.memory_space<vmem>>, vector<1x2x32xf32>,
    %c6_i32 = arith.constant 6 : i32
    %467 = arith.index_cast %c6_i32 : i32 to index
    %c0_201 = arith.constant 0 : index
    %c0_202 = arith.constant 0 : index
    %468 = vector.load %arg1[%467, %c0_201, %c0_202] : memref<8x2x128xf32, #tpu.memory_space<vmem>>, vector<1x2x128xf32>
    %469 = vector.shape_cast %468 : vector<1x2x128xf32> to vector<2x128xf32>
    %c0_203 = arith.constant 0 : index
    %c0_204 = arith.constant 0 : index
    %470 = vector.load %arg7[%c0_203, %c0_204] : memref<2x32xf32, #tpu.memory_space<vmem>>, vector<2x32xf32>
    %cst_205 = arith.constant dense<0.000000e+00> : vector<2x128xf32>
    %471 = tpu.matmul %470, %3, %cst_205 {dimension_numbers = #tpu.dot_dimension_numbers<[1], [0], [0], [1], [0, 0, 1, 1], [], []>} : vector<2x32xf32>, vector<32x128xf32>, vector<2x128xf32> -> vector<2x128xf32>
    %472 = arith.addf %469, %471 : vector<2x128xf32>
    %c0_206 = arith.constant 0 : index
    %c0_207 = arith.constant 0 : index
    %473 = vector.load %arg8[%c0_206, %c0_207] : memref<2x32xf32, #tpu.memory_space<vmem>>, vector<2x32xf32>
    %474 = vector.extract_strided_slice %472 {offsets = [0, 0], sizes = [2, 32], strides = [1, 1]} : vector<2x128xf32> to vector<2x32xf32>
    %475 = arith.negf %474 : vector<2x32xf32>
    %476 = math.exp %475 : vector<2x32xf32>
    %cst_208 = arith.constant 1.000000e+00 : f32
    %477 = vector.broadcast %cst_208 : f32 to vector<2x32xf32>
    %478 = arith.addf %477, %476 : vector<2x32xf32>
    %479 = arith.divf %477, %478 : vector<2x32xf32>
    %480 = vector.extract_strided_slice %472 {offsets = [0, 32], sizes = [2, 32], strides = [1, 1]} : vector<2x128xf32> to vector<2x32xf32>
    %481 = arith.negf %480 : vector<2x32xf32>
    %482 = math.exp %481 : vector<2x32xf32>
    %cst_209 = arith.constant 1.000000e+00 : f32
    %483 = vector.broadcast %cst_209 : f32 to vector<2x32xf32>
    %484 = arith.addf %483, %482 : vector<2x32xf32>
    %485 = arith.divf %483, %484 : vector<2x32xf32>
    %486 = vector.extract_strided_slice %472 {offsets = [0, 64], sizes = [2, 32], strides = [1, 1]} : vector<2x128xf32> to vector<2x32xf32>
    %487 = math.tanh %486 : vector<2x32xf32>
    %488 = vector.extract_strided_slice %472 {offsets = [0, 96], sizes = [2, 32], strides = [1, 1]} : vector<2x128xf32> to vector<2x32xf32>
    %489 = arith.negf %488 : vector<2x32xf32>
    %490 = math.exp %489 : vector<2x32xf32>
    %cst_210 = arith.constant 1.000000e+00 : f32
    %491 = vector.broadcast %cst_210 : f32 to vector<2x32xf32>
    %492 = arith.addf %491, %490 : vector<2x32xf32>
    %493 = arith.divf %491, %492 : vector<2x32xf32>
    %494 = arith.mulf %485, %473 : vector<2x32xf32>
    %495 = arith.mulf %479, %487 : vector<2x32xf32>
    %496 = arith.addf %494, %495 : vector<2x32xf32>
    %497 = math.tanh %496 : vector<2x32xf32>
    %498 = arith.mulf %493, %497 : vector<2x32xf32>
    %c0_211 = arith.constant 0 : index
    %c0_212 = arith.constant 0 : index
    %499 = vector.load %arg7[%c0_211, %c0_212] : memref<2x32xf32, #tpu.memory_space<vmem>>, vector<2x32xf32>
    tpu.vector_store %arg7[%c0_211, %c0_212], %498 {strides = array<i32>} : memref<2x32xf32, #tpu.memory_space<vmem>>, vector<2x32xf32>,
    %c0_213 = arith.constant 0 : index
    %c0_214 = arith.constant 0 : index
    %500 = vector.load %arg8[%c0_213, %c0_214] : memref<2x32xf32, #tpu.memory_space<vmem>>, vector<2x32xf32>
    tpu.vector_store %arg8[%c0_213, %c0_214], %496 {strides = array<i32>} : memref<2x32xf32, #tpu.memory_space<vmem>>, vector<2x32xf32>,
    %501 = arith.index_cast %c6_i32 : i32 to index
    %c0_215 = arith.constant 0 : index
    %c0_216 = arith.constant 0 : index
    %502 = vector.load %arg5[%501, %c0_215, %c0_216] : memref<8x2x32xf32, #tpu.memory_space<vmem>>, vector<1x2x32xf32>
    %503 = vector.shape_cast %502 : vector<1x2x32xf32> to vector<2x32xf32>
    %504 = vector.shape_cast %498 : vector<2x32xf32> to vector<1x2x32xf32>
    tpu.vector_store %arg5[%501, %c0_215, %c0_216], %504 {strides = array<i32>} : memref<8x2x32xf32, #tpu.memory_space<vmem>>, vector<1x2x32xf32>,
    %c7_i32_217 = arith.constant 7 : i32
    %505 = arith.subi %c7_i32_217, %c6_i32 : i32
    %506 = arith.index_cast %505 : i32 to index
    %c0_218 = arith.constant 0 : index
    %c0_219 = arith.constant 0 : index
    %507 = vector.load %arg2[%506, %c0_218, %c0_219] : memref<8x2x128xf32, #tpu.memory_space<vmem>>, vector<1x2x128xf32>
    %508 = vector.shape_cast %507 : vector<1x2x128xf32> to vector<2x128xf32>
    %c0_220 = arith.constant 0 : index
    %c0_221 = arith.constant 0 : index
    %509 = vector.load %arg9[%c0_220, %c0_221] : memref<2x32xf32, #tpu.memory_space<vmem>>, vector<2x32xf32>
    %cst_222 = arith.constant dense<0.000000e+00> : vector<2x128xf32>
    %510 = tpu.matmul %509, %4, %cst_222 {dimension_numbers = #tpu.dot_dimension_numbers<[1], [0], [0], [1], [0, 0, 1, 1], [], []>} : vector<2x32xf32>, vector<32x128xf32>, vector<2x128xf32> -> vector<2x128xf32>
    %511 = arith.addf %508, %510 : vector<2x128xf32>
    %c0_223 = arith.constant 0 : index
    %c0_224 = arith.constant 0 : index
    %512 = vector.load %arg10[%c0_223, %c0_224] : memref<2x32xf32, #tpu.memory_space<vmem>>, vector<2x32xf32>
    %513 = vector.extract_strided_slice %511 {offsets = [0, 0], sizes = [2, 32], strides = [1, 1]} : vector<2x128xf32> to vector<2x32xf32>
    %514 = arith.negf %513 : vector<2x32xf32>
    %515 = math.exp %514 : vector<2x32xf32>
    %cst_225 = arith.constant 1.000000e+00 : f32
    %516 = vector.broadcast %cst_225 : f32 to vector<2x32xf32>
    %517 = arith.addf %516, %515 : vector<2x32xf32>
    %518 = arith.divf %516, %517 : vector<2x32xf32>
    %519 = vector.extract_strided_slice %511 {offsets = [0, 32], sizes = [2, 32], strides = [1, 1]} : vector<2x128xf32> to vector<2x32xf32>
    %520 = arith.negf %519 : vector<2x32xf32>
    %521 = math.exp %520 : vector<2x32xf32>
    %cst_226 = arith.constant 1.000000e+00 : f32
    %522 = vector.broadcast %cst_226 : f32 to vector<2x32xf32>
    %523 = arith.addf %522, %521 : vector<2x32xf32>
    %524 = arith.divf %522, %523 : vector<2x32xf32>
    %525 = vector.extract_strided_slice %511 {offsets = [0, 64], sizes = [2, 32], strides = [1, 1]} : vector<2x128xf32> to vector<2x32xf32>
    %526 = math.tanh %525 : vector<2x32xf32>
    %527 = vector.extract_strided_slice %511 {offsets = [0, 96], sizes = [2, 32], strides = [1, 1]} : vector<2x128xf32> to vector<2x32xf32>
    %528 = arith.negf %527 : vector<2x32xf32>
    %529 = math.exp %528 : vector<2x32xf32>
    %cst_227 = arith.constant 1.000000e+00 : f32
    %530 = vector.broadcast %cst_227 : f32 to vector<2x32xf32>
    %531 = arith.addf %530, %529 : vector<2x32xf32>
    %532 = arith.divf %530, %531 : vector<2x32xf32>
    %533 = arith.mulf %524, %512 : vector<2x32xf32>
    %534 = arith.mulf %518, %526 : vector<2x32xf32>
    %535 = arith.addf %533, %534 : vector<2x32xf32>
    %536 = math.tanh %535 : vector<2x32xf32>
    %537 = arith.mulf %532, %536 : vector<2x32xf32>
    %c0_228 = arith.constant 0 : index
    %c0_229 = arith.constant 0 : index
    %538 = vector.load %arg9[%c0_228, %c0_229] : memref<2x32xf32, #tpu.memory_space<vmem>>, vector<2x32xf32>
    tpu.vector_store %arg9[%c0_228, %c0_229], %537 {strides = array<i32>} : memref<2x32xf32, #tpu.memory_space<vmem>>, vector<2x32xf32>,
    %c0_230 = arith.constant 0 : index
    %c0_231 = arith.constant 0 : index
    %539 = vector.load %arg10[%c0_230, %c0_231] : memref<2x32xf32, #tpu.memory_space<vmem>>, vector<2x32xf32>
    tpu.vector_store %arg10[%c0_230, %c0_231], %535 {strides = array<i32>} : memref<2x32xf32, #tpu.memory_space<vmem>>, vector<2x32xf32>,
    %540 = arith.index_cast %505 : i32 to index
    %c0_232 = arith.constant 0 : index
    %c0_233 = arith.constant 0 : index
    %541 = vector.load %arg6[%540, %c0_232, %c0_233] : memref<8x2x32xf32, #tpu.memory_space<vmem>>, vector<1x2x32xf32>
    %542 = vector.shape_cast %541 : vector<1x2x32xf32> to vector<2x32xf32>
    %543 = vector.shape_cast %537 : vector<2x32xf32> to vector<1x2x32xf32>
    tpu.vector_store %arg6[%540, %c0_232, %c0_233], %543 {strides = array<i32>} : memref<8x2x32xf32, #tpu.memory_space<vmem>>, vector<1x2x32xf32>,
    %c7_i32_234 = arith.constant 7 : i32
    %544 = arith.index_cast %c7_i32_234 : i32 to index
    %c0_235 = arith.constant 0 : index
    %c0_236 = arith.constant 0 : index
    %545 = vector.load %arg1[%544, %c0_235, %c0_236] : memref<8x2x128xf32, #tpu.memory_space<vmem>>, vector<1x2x128xf32>
    %546 = vector.shape_cast %545 : vector<1x2x128xf32> to vector<2x128xf32>
    %c0_237 = arith.constant 0 : index
    %c0_238 = arith.constant 0 : index
    %547 = vector.load %arg7[%c0_237, %c0_238] : memref<2x32xf32, #tpu.memory_space<vmem>>, vector<2x32xf32>
    %cst_239 = arith.constant dense<0.000000e+00> : vector<2x128xf32>
    %548 = tpu.matmul %547, %3, %cst_239 {dimension_numbers = #tpu.dot_dimension_numbers<[1], [0], [0], [1], [0, 0, 1, 1], [], []>} : vector<2x32xf32>, vector<32x128xf32>, vector<2x128xf32> -> vector<2x128xf32>
    %549 = arith.addf %546, %548 : vector<2x128xf32>
    %c0_240 = arith.constant 0 : index
    %c0_241 = arith.constant 0 : index
    %550 = vector.load %arg8[%c0_240, %c0_241] : memref<2x32xf32, #tpu.memory_space<vmem>>, vector<2x32xf32>
    %551 = vector.extract_strided_slice %549 {offsets = [0, 0], sizes = [2, 32], strides = [1, 1]} : vector<2x128xf32> to vector<2x32xf32>
    %552 = arith.negf %551 : vector<2x32xf32>
    %553 = math.exp %552 : vector<2x32xf32>
    %cst_242 = arith.constant 1.000000e+00 : f32
    %554 = vector.broadcast %cst_242 : f32 to vector<2x32xf32>
    %555 = arith.addf %554, %553 : vector<2x32xf32>
    %556 = arith.divf %554, %555 : vector<2x32xf32>
    %557 = vector.extract_strided_slice %549 {offsets = [0, 32], sizes = [2, 32], strides = [1, 1]} : vector<2x128xf32> to vector<2x32xf32>
    %558 = arith.negf %557 : vector<2x32xf32>
    %559 = math.exp %558 : vector<2x32xf32>
    %cst_243 = arith.constant 1.000000e+00 : f32
    %560 = vector.broadcast %cst_243 : f32 to vector<2x32xf32>
    %561 = arith.addf %560, %559 : vector<2x32xf32>
    %562 = arith.divf %560, %561 : vector<2x32xf32>
    %563 = vector.extract_strided_slice %549 {offsets = [0, 64], sizes = [2, 32], strides = [1, 1]} : vector<2x128xf32> to vector<2x32xf32>
    %564 = math.tanh %563 : vector<2x32xf32>
    %565 = vector.extract_strided_slice %549 {offsets = [0, 96], sizes = [2, 32], strides = [1, 1]} : vector<2x128xf32> to vector<2x32xf32>
    %566 = arith.negf %565 : vector<2x32xf32>
    %567 = math.exp %566 : vector<2x32xf32>
    %cst_244 = arith.constant 1.000000e+00 : f32
    %568 = vector.broadcast %cst_244 : f32 to vector<2x32xf32>
    %569 = arith.addf %568, %567 : vector<2x32xf32>
    %570 = arith.divf %568, %569 : vector<2x32xf32>
    %571 = arith.mulf %562, %550 : vector<2x32xf32>
    %572 = arith.mulf %556, %564 : vector<2x32xf32>
    %573 = arith.addf %571, %572 : vector<2x32xf32>
    %574 = math.tanh %573 : vector<2x32xf32>
    %575 = arith.mulf %570, %574 : vector<2x32xf32>
    %c0_245 = arith.constant 0 : index
    %c0_246 = arith.constant 0 : index
    %576 = vector.load %arg7[%c0_245, %c0_246] : memref<2x32xf32, #tpu.memory_space<vmem>>, vector<2x32xf32>
    tpu.vector_store %arg7[%c0_245, %c0_246], %575 {strides = array<i32>} : memref<2x32xf32, #tpu.memory_space<vmem>>, vector<2x32xf32>,
    %c0_247 = arith.constant 0 : index
    %c0_248 = arith.constant 0 : index
    %577 = vector.load %arg8[%c0_247, %c0_248] : memref<2x32xf32, #tpu.memory_space<vmem>>, vector<2x32xf32>
    tpu.vector_store %arg8[%c0_247, %c0_248], %573 {strides = array<i32>} : memref<2x32xf32, #tpu.memory_space<vmem>>, vector<2x32xf32>,
    %578 = arith.index_cast %c7_i32_234 : i32 to index
    %c0_249 = arith.constant 0 : index
    %c0_250 = arith.constant 0 : index
    %579 = vector.load %arg5[%578, %c0_249, %c0_250] : memref<8x2x32xf32, #tpu.memory_space<vmem>>, vector<1x2x32xf32>
    %580 = vector.shape_cast %579 : vector<1x2x32xf32> to vector<2x32xf32>
    %581 = vector.shape_cast %575 : vector<2x32xf32> to vector<1x2x32xf32>
    tpu.vector_store %arg5[%578, %c0_249, %c0_250], %581 {strides = array<i32>} : memref<8x2x32xf32, #tpu.memory_space<vmem>>, vector<1x2x32xf32>,
    %c7_i32_251 = arith.constant 7 : i32
    %582 = arith.subi %c7_i32_251, %c7_i32_234 : i32
    %583 = arith.index_cast %582 : i32 to index
    %c0_252 = arith.constant 0 : index
    %c0_253 = arith.constant 0 : index
    %584 = vector.load %arg2[%583, %c0_252, %c0_253] : memref<8x2x128xf32, #tpu.memory_space<vmem>>, vector<1x2x128xf32>
    %585 = vector.shape_cast %584 : vector<1x2x128xf32> to vector<2x128xf32>
    %c0_254 = arith.constant 0 : index
    %c0_255 = arith.constant 0 : index
    %586 = vector.load %arg9[%c0_254, %c0_255] : memref<2x32xf32, #tpu.memory_space<vmem>>, vector<2x32xf32>
    %cst_256 = arith.constant dense<0.000000e+00> : vector<2x128xf32>
    %587 = tpu.matmul %586, %4, %cst_256 {dimension_numbers = #tpu.dot_dimension_numbers<[1], [0], [0], [1], [0, 0, 1, 1], [], []>} : vector<2x32xf32>, vector<32x128xf32>, vector<2x128xf32> -> vector<2x128xf32>
    %588 = arith.addf %585, %587 : vector<2x128xf32>
    %c0_257 = arith.constant 0 : index
    %c0_258 = arith.constant 0 : index
    %589 = vector.load %arg10[%c0_257, %c0_258] : memref<2x32xf32, #tpu.memory_space<vmem>>, vector<2x32xf32>
    %590 = vector.extract_strided_slice %588 {offsets = [0, 0], sizes = [2, 32], strides = [1, 1]} : vector<2x128xf32> to vector<2x32xf32>
    %591 = arith.negf %590 : vector<2x32xf32>
    %592 = math.exp %591 : vector<2x32xf32>
    %cst_259 = arith.constant 1.000000e+00 : f32
    %593 = vector.broadcast %cst_259 : f32 to vector<2x32xf32>
    %594 = arith.addf %593, %592 : vector<2x32xf32>
    %595 = arith.divf %593, %594 : vector<2x32xf32>
    %596 = vector.extract_strided_slice %588 {offsets = [0, 32], sizes = [2, 32], strides = [1, 1]} : vector<2x128xf32> to vector<2x32xf32>
    %597 = arith.negf %596 : vector<2x32xf32>
    %598 = math.exp %597 : vector<2x32xf32>
    %cst_260 = arith.constant 1.000000e+00 : f32
    %599 = vector.broadcast %cst_260 : f32 to vector<2x32xf32>
    %600 = arith.addf %599, %598 : vector<2x32xf32>
    %601 = arith.divf %599, %600 : vector<2x32xf32>
    %602 = vector.extract_strided_slice %588 {offsets = [0, 64], sizes = [2, 32], strides = [1, 1]} : vector<2x128xf32> to vector<2x32xf32>
    %603 = math.tanh %602 : vector<2x32xf32>
    %604 = vector.extract_strided_slice %588 {offsets = [0, 96], sizes = [2, 32], strides = [1, 1]} : vector<2x128xf32> to vector<2x32xf32>
    %605 = arith.negf %604 : vector<2x32xf32>
    %606 = math.exp %605 : vector<2x32xf32>
    %cst_261 = arith.constant 1.000000e+00 : f32
    %607 = vector.broadcast %cst_261 : f32 to vector<2x32xf32>
    %608 = arith.addf %607, %606 : vector<2x32xf32>
    %609 = arith.divf %607, %608 : vector<2x32xf32>
    %610 = arith.mulf %601, %589 : vector<2x32xf32>
    %611 = arith.mulf %595, %603 : vector<2x32xf32>
    %612 = arith.addf %610, %611 : vector<2x32xf32>
    %613 = math.tanh %612 : vector<2x32xf32>
    %614 = arith.mulf %609, %613 : vector<2x32xf32>
    %c0_262 = arith.constant 0 : index
    %c0_263 = arith.constant 0 : index
    %615 = vector.load %arg9[%c0_262, %c0_263] : memref<2x32xf32, #tpu.memory_space<vmem>>, vector<2x32xf32>
    tpu.vector_store %arg9[%c0_262, %c0_263], %614 {strides = array<i32>} : memref<2x32xf32, #tpu.memory_space<vmem>>, vector<2x32xf32>,
    %c0_264 = arith.constant 0 : index
    %c0_265 = arith.constant 0 : index
    %616 = vector.load %arg10[%c0_264, %c0_265] : memref<2x32xf32, #tpu.memory_space<vmem>>, vector<2x32xf32>
    tpu.vector_store %arg10[%c0_264, %c0_265], %612 {strides = array<i32>} : memref<2x32xf32, #tpu.memory_space<vmem>>, vector<2x32xf32>,
    %617 = arith.index_cast %582 : i32 to index
    %c0_266 = arith.constant 0 : index
    %c0_267 = arith.constant 0 : index
    %618 = vector.load %arg6[%617, %c0_266, %c0_267] : memref<8x2x32xf32, #tpu.memory_space<vmem>>, vector<1x2x32xf32>
    %619 = vector.shape_cast %618 : vector<1x2x32xf32> to vector<2x32xf32>
    %620 = vector.shape_cast %614 : vector<2x32xf32> to vector<1x2x32xf32>
    tpu.vector_store %arg6[%617, %c0_266, %c0_267], %620 {strides = array<i32>} : memref<8x2x32xf32, #tpu.memory_space<vmem>>, vector<1x2x32xf32>,
    %c8_i32 = arith.constant 8 : i32
    return
  }
  func.func @transform_0(%arg0: i32) -> (i32, i32, i32) {
    %c0_i32 = arith.constant 0 : i32
    %c0_i32_0 = arith.constant 0 : i32
    %c0_i32_1 = arith.constant 0 : i32
    return %arg0, %c0_i32, %c0_i32_0 : i32, i32, i32
  }
  func.func @transform_1(%arg0: i32) -> (i32, i32, i32) {
    %c0_i32 = arith.constant 0 : i32
    %0 = arith.subi %c0_i32, %arg0 : i32
    %c0_i32_0 = arith.constant 0 : i32
    %c0_i32_1 = arith.constant 0 : i32
    %c0_i32_2 = arith.constant 0 : i32
    return %0, %c0_i32_0, %c0_i32_1 : i32, i32, i32
  }
  func.func @transform_2(%arg0: i32) -> (i32, i32) {
    %c0_i32 = arith.constant 0 : i32
    %c0_i32_0 = arith.constant 0 : i32
    %c0_i32_1 = arith.constant 0 : i32
    return %c0_i32, %c0_i32_0 : i32, i32
  }
  func.func @transform_3(%arg0: i32) -> (i32, i32) {
    %c0_i32 = arith.constant 0 : i32
    %c0_i32_0 = arith.constant 0 : i32
    %c0_i32_1 = arith.constant 0 : i32
    return %c0_i32, %c0_i32_0 : i32, i32
  }
  func.func @transform_4(%arg0: i32) -> (i32, i32, i32) {
    %c0_i32 = arith.constant 0 : i32
    %c0_i32_0 = arith.constant 0 : i32
    %c0_i32_1 = arith.constant 0 : i32
    return %arg0, %c0_i32, %c0_i32_0 : i32, i32, i32
  }
  func.func @transform_5(%arg0: i32) -> (i32, i32, i32) {
    %c0_i32 = arith.constant 0 : i32
    %0 = arith.subi %c0_i32, %arg0 : i32
    %c0_i32_0 = arith.constant 0 : i32
    %c0_i32_1 = arith.constant 0 : i32
    %c0_i32_2 = arith.constant 0 : i32
    return %0, %c0_i32_0, %c0_i32_1 : i32, i32, i32
  }
  func.func @transform_6(%arg0: i32) -> (i32, i32) {
    %c0_i32 = arith.constant 0 : i32
    %c0_i32_0 = arith.constant 0 : i32
    %c0_i32_1 = arith.constant 0 : i32
    return %c0_i32, %c0_i32_0 : i32, i32
  }
  func.func @transform_7(%arg0: i32) -> (i32, i32) {
    %c0_i32 = arith.constant 0 : i32
    %c0_i32_0 = arith.constant 0 : i32
    %c0_i32_1 = arith.constant 0 : i32
    return %c0_i32, %c0_i32_0 : i32, i32
  }
  func.func @transform_8(%arg0: i32) -> (i32, i32) {
    %c0_i32 = arith.constant 0 : i32
    %c0_i32_0 = arith.constant 0 : i32
    %c0_i32_1 = arith.constant 0 : i32
    return %c0_i32, %c0_i32_0 : i32, i32
  }
  func.func @transform_9(%arg0: i32) -> (i32, i32) {
    %c0_i32 = arith.constant 0 : i32
    %c0_i32_0 = arith.constant 0 : i32
    %c0_i32_1 = arith.constant 0 : i32
    return %c0_i32, %c0_i32_0 : i32, i32
  }
}

module attributes {stable_mosaic.version = 11 : i64} {
  func.func @_bilstm_kernel(%arg0: i32, %arg1: memref<8x2x128xf32, #tpu.memory_space<vmem>>, %arg2: memref<8x2x128xf32, #tpu.memory_space<vmem>>, %arg3: memref<32x128xf32, #tpu.memory_space<vmem>>, %arg4: memref<32x128xf32, #tpu.memory_space<vmem>>, %arg5: memref<8x2x32xf32, #tpu.memory_space<vmem>>, %arg6: memref<8x2x32xf32, #tpu.memory_space<vmem>>, %arg7: memref<2x32xf32, #tpu.memory_space<vmem>>, %arg8: memref<2x32xf32, #tpu.memory_space<vmem>>, %arg9: memref<2x32xf32, #tpu.memory_space<vmem>>, %arg10: memref<2x32xf32, #tpu.memory_space<vmem>>) attributes {dimension_semantics = [#tpu.dimension_semantics<arbitrary>], iteration_bounds = array<i64: 1>, scalar_prefetch = 0 : i64, scratch_operands = 0 : i64, tpu.core_type = #tpu.core_type<tc>, window_params = [{transform_indices = @transform_0, window_bounds = array<i64: 8, 2, 128>}, {transform_indices = @transform_1, window_bounds = array<i64: 8, 2, 128>}, {pipeline_mode = #tpu.pipeline_mode<synchronous>, transform_indices = @transform_2, window_bounds = array<i64: 32, 128>}, {pipeline_mode = #tpu.pipeline_mode<synchronous>, transform_indices = @transform_3, window_bounds = array<i64: 32, 128>}, {transform_indices = @transform_4, window_bounds = array<i64: 8, 2, 32>}, {transform_indices = @transform_5, window_bounds = array<i64: 8, 2, 32>}, {pipeline_mode = #tpu.pipeline_mode<synchronous>, transform_indices = @transform_6, window_bounds = array<i64: 2, 32>}, {pipeline_mode = #tpu.pipeline_mode<synchronous>, transform_indices = @transform_7, window_bounds = array<i64: 2, 32>}, {pipeline_mode = #tpu.pipeline_mode<synchronous>, transform_indices = @transform_8, window_bounds = array<i64: 2, 32>}, {pipeline_mode = #tpu.pipeline_mode<synchronous>, transform_indices = @transform_9, window_bounds = array<i64: 2, 32>}]} {
    %c0_i32 = arith.constant 0 : i32
    %0 = arith.cmpi eq, %arg0, %c0_i32 : i32
    %1 = arith.extui %0 : i1 to i32
    %c0_i32_0 = arith.constant 0 : i32
    %2 = arith.cmpi ne, %1, %c0_i32_0 : i32
    scf.if %2 {
      %cst_268 = arith.constant 0.000000e+00 : f32
      %621 = vector.broadcast %cst_268 : f32 to vector<2x32xf32>
      %c0_269 = arith.constant 0 : index
      %c0_270 = arith.constant 0 : index
      %622 = vector.load %arg7[%c0_269, %c0_270] : memref<2x32xf32, #tpu.memory_space<vmem>>, vector<2x32xf32>
      tpu.vector_store %arg7[%c0_269, %c0_270], %621 {strides = array<i32>} : memref<2x32xf32, #tpu.memory_space<vmem>>, vector<2x32xf32>,
      %cst_271 = arith.constant 0.000000e+00 : f32
      %623 = vector.broadcast %cst_271 : f32 to vector<2x32xf32>
      %c0_272 = arith.constant 0 : index
      %c0_273 = arith.constant 0 : index
      %624 = vector.load %arg8[%c0_272, %c0_273] : memref<2x32xf32, #tpu.memory_space<vmem>>, vector<2x32xf32>
      tpu.vector_store %arg8[%c0_272, %c0_273], %623 {strides = array<i32>} : memref<2x32xf32, #tpu.memory_space<vmem>>, vector<2x32xf32>,
      %cst_274 = arith.constant 0.000000e+00 : f32
      %625 = vector.broadcast %cst_274 : f32 to vector<2x32xf32>
      %c0_275 = arith.constant 0 : index
      %c0_276 = arith.constant 0 : index
      %626 = vector.load %arg9[%c0_275, %c0_276] : memref<2x32xf32, #tpu.memory_space<vmem>>, vector<2x32xf32>
      tpu.vector_store %arg9[%c0_275, %c0_276], %625 {strides = array<i32>} : memref<2x32xf32, #tpu.memory_space<vmem>>, vector<2x32xf32>,
      %cst_277 = arith.constant 0.000000e+00 : f32
      %627 = vector.broadcast %cst_277 : f32 to vector<2x32xf32>
      %c0_278 = arith.constant 0 : index
      %c0_279 = arith.constant 0 : index
      %628 = vector.load %arg10[%c0_278, %c0_279] : memref<2x32xf32, #tpu.memory_space<vmem>>, vector<2x32xf32>
      tpu.vector_store %arg10[%c0_278, %c0_279], %627 {strides = array<i32>} : memref<2x32xf32, #tpu.memory_space<vmem>>, vector<2x32xf32>,
    } else {
    }
    %c0 = arith.constant 0 : index
    %c0_1 = arith.constant 0 : index
    %3 = vector.load %arg3[%c0, %c0_1] : memref<32x128xf32, #tpu.memory_space<vmem>>, vector<32x128xf32>
    %c0_2 = arith.constant 0 : index
    %c0_3 = arith.constant 0 : index
    %4 = vector.load %arg4[%c0_2, %c0_3] : memref<32x128xf32, #tpu.memory_space<vmem>>, vector<32x128xf32>
    %c0_i32_4 = arith.constant 0 : i32
    %5 = arith.index_cast %c0_i32_4 : i32 to index
    %c0_5 = arith.constant 0 : index
    %c0_6 = arith.constant 0 : index
    %6 = vector.load %arg1[%5, %c0_5, %c0_6] : memref<8x2x128xf32, #tpu.memory_space<vmem>>, vector<1x2x128xf32>
    %7 = vector.shape_cast %6 : vector<1x2x128xf32> to vector<2x128xf32>
    %c0_7 = arith.constant 0 : index
    %c0_8 = arith.constant 0 : index
    %8 = vector.load %arg7[%c0_7, %c0_8] : memref<2x32xf32, #tpu.memory_space<vmem>>, vector<2x32xf32>
    %cst = arith.constant dense<0.000000e+00> : vector<2x128xf32>
    %9 = tpu.matmul %8, %3, %cst {dimension_numbers = #tpu.dot_dimension_numbers<[1], [0], [0], [1], [0, 0, 1, 1], [], []>} : vector<2x32xf32>, vector<32x128xf32>, vector<2x128xf32> -> vector<2x128xf32>
    %10 = arith.addf %7, %9 : vector<2x128xf32>
    %c0_9 = arith.constant 0 : index
    %c0_10 = arith.constant 0 : index
    %11 = vector.load %arg8[%c0_9, %c0_10] : memref<2x32xf32, #tpu.memory_space<vmem>>, vector<2x32xf32>
    %12 = vector.extract_strided_slice %10 {offsets = [0, 0], sizes = [2, 32], strides = [1, 1]} : vector<2x128xf32> to vector<2x32xf32>
    %13 = arith.negf %12 : vector<2x32xf32>
    %14 = math.exp %13 : vector<2x32xf32>
    %cst_11 = arith.constant 1.000000e+00 : f32
    %15 = vector.broadcast %cst_11 : f32 to vector<2x32xf32>
    %16 = arith.addf %15, %14 : vector<2x32xf32>
    %17 = arith.divf %15, %16 : vector<2x32xf32>
    %18 = vector.extract_strided_slice %10 {offsets = [0, 32], sizes = [2, 32], strides = [1, 1]} : vector<2x128xf32> to vector<2x32xf32>
    %19 = arith.negf %18 : vector<2x32xf32>
    %20 = math.exp %19 : vector<2x32xf32>
    %cst_12 = arith.constant 1.000000e+00 : f32
    %21 = vector.broadcast %cst_12 : f32 to vector<2x32xf32>
    %22 = arith.addf %21, %20 : vector<2x32xf32>
    %23 = arith.divf %21, %22 : vector<2x32xf32>
    %24 = vector.extract_strided_slice %10 {offsets = [0, 64], sizes = [2, 32], strides = [1, 1]} : vector<2x128xf32> to vector<2x32xf32>
    %25 = math.tanh %24 : vector<2x32xf32>
    %26 = vector.extract_strided_slice %10 {offsets = [0, 96], sizes = [2, 32], strides = [1, 1]} : vector<2x128xf32> to vector<2x32xf32>
    %27 = arith.negf %26 : vector<2x32xf32>
    %28 = math.exp %27 : vector<2x32xf32>
    %cst_13 = arith.constant 1.000000e+00 : f32
    %29 = vector.broadcast %cst_13 : f32 to vector<2x32xf32>
    %30 = arith.addf %29, %28 : vector<2x32xf32>
    %31 = arith.divf %29, %30 : vector<2x32xf32>
    %32 = arith.mulf %23, %11 : vector<2x32xf32>
    %33 = arith.mulf %17, %25 : vector<2x32xf32>
    %34 = arith.addf %32, %33 : vector<2x32xf32>
    %35 = math.tanh %34 : vector<2x32xf32>
    %36 = arith.mulf %31, %35 : vector<2x32xf32>
    %c0_14 = arith.constant 0 : index
    %c0_15 = arith.constant 0 : index
    %37 = vector.load %arg7[%c0_14, %c0_15] : memref<2x32xf32, #tpu.memory_space<vmem>>, vector<2x32xf32>
    tpu.vector_store %arg7[%c0_14, %c0_15], %36 {strides = array<i32>} : memref<2x32xf32, #tpu.memory_space<vmem>>, vector<2x32xf32>,
    %c0_16 = arith.constant 0 : index
    %c0_17 = arith.constant 0 : index
    %38 = vector.load %arg8[%c0_16, %c0_17] : memref<2x32xf32, #tpu.memory_space<vmem>>, vector<2x32xf32>
    tpu.vector_store %arg8[%c0_16, %c0_17], %34 {strides = array<i32>} : memref<2x32xf32, #tpu.memory_space<vmem>>, vector<2x32xf32>,
    %39 = arith.index_cast %c0_i32_4 : i32 to index
    %c0_18 = arith.constant 0 : index
    %c0_19 = arith.constant 0 : index
    %40 = vector.load %arg5[%39, %c0_18, %c0_19] : memref<8x2x32xf32, #tpu.memory_space<vmem>>, vector<1x2x32xf32>
    %41 = vector.shape_cast %40 : vector<1x2x32xf32> to vector<2x32xf32>
    %42 = vector.shape_cast %36 : vector<2x32xf32> to vector<1x2x32xf32>
    tpu.vector_store %arg5[%39, %c0_18, %c0_19], %42 {strides = array<i32>} : memref<8x2x32xf32, #tpu.memory_space<vmem>>, vector<1x2x32xf32>,
    %c7_i32 = arith.constant 7 : i32
    %43 = arith.subi %c7_i32, %c0_i32_4 : i32
    %44 = arith.index_cast %43 : i32 to index
    %c0_20 = arith.constant 0 : index
    %c0_21 = arith.constant 0 : index
    %45 = vector.load %arg2[%44, %c0_20, %c0_21] : memref<8x2x128xf32, #tpu.memory_space<vmem>>, vector<1x2x128xf32>
    %46 = vector.shape_cast %45 : vector<1x2x128xf32> to vector<2x128xf32>
    %c0_22 = arith.constant 0 : index
    %c0_23 = arith.constant 0 : index
    %47 = vector.load %arg9[%c0_22, %c0_23] : memref<2x32xf32, #tpu.memory_space<vmem>>, vector<2x32xf32>
    %cst_24 = arith.constant dense<0.000000e+00> : vector<2x128xf32>
    %48 = tpu.matmul %47, %4, %cst_24 {dimension_numbers = #tpu.dot_dimension_numbers<[1], [0], [0], [1], [0, 0, 1, 1], [], []>} : vector<2x32xf32>, vector<32x128xf32>, vector<2x128xf32> -> vector<2x128xf32>
    %49 = arith.addf %46, %48 : vector<2x128xf32>
    %c0_25 = arith.constant 0 : index
    %c0_26 = arith.constant 0 : index
    %50 = vector.load %arg10[%c0_25, %c0_26] : memref<2x32xf32, #tpu.memory_space<vmem>>, vector<2x32xf32>
    %51 = vector.extract_strided_slice %49 {offsets = [0, 0], sizes = [2, 32], strides = [1, 1]} : vector<2x128xf32> to vector<2x32xf32>
    %52 = arith.negf %51 : vector<2x32xf32>
    %53 = math.exp %52 : vector<2x32xf32>
    %cst_27 = arith.constant 1.000000e+00 : f32
    %54 = vector.broadcast %cst_27 : f32 to vector<2x32xf32>
    %55 = arith.addf %54, %53 : vector<2x32xf32>
    %56 = arith.divf %54, %55 : vector<2x32xf32>
    %57 = vector.extract_strided_slice %49 {offsets = [0, 32], sizes = [2, 32], strides = [1, 1]} : vector<2x128xf32> to vector<2x32xf32>
    %58 = arith.negf %57 : vector<2x32xf32>
    %59 = math.exp %58 : vector<2x32xf32>
    %cst_28 = arith.constant 1.000000e+00 : f32
    %60 = vector.broadcast %cst_28 : f32 to vector<2x32xf32>
    %61 = arith.addf %60, %59 : vector<2x32xf32>
    %62 = arith.divf %60, %61 : vector<2x32xf32>
    %63 = vector.extract_strided_slice %49 {offsets = [0, 64], sizes = [2, 32], strides = [1, 1]} : vector<2x128xf32> to vector<2x32xf32>
    %64 = math.tanh %63 : vector<2x32xf32>
    %65 = vector.extract_strided_slice %49 {offsets = [0, 96], sizes = [2, 32], strides = [1, 1]} : vector<2x128xf32> to vector<2x32xf32>
    %66 = arith.negf %65 : vector<2x32xf32>
    %67 = math.exp %66 : vector<2x32xf32>
    %cst_29 = arith.constant 1.000000e+00 : f32
    %68 = vector.broadcast %cst_29 : f32 to vector<2x32xf32>
    %69 = arith.addf %68, %67 : vector<2x32xf32>
    %70 = arith.divf %68, %69 : vector<2x32xf32>
    %71 = arith.mulf %62, %50 : vector<2x32xf32>
    %72 = arith.mulf %56, %64 : vector<2x32xf32>
    %73 = arith.addf %71, %72 : vector<2x32xf32>
    %74 = math.tanh %73 : vector<2x32xf32>
    %75 = arith.mulf %70, %74 : vector<2x32xf32>
    %c0_30 = arith.constant 0 : index
    %c0_31 = arith.constant 0 : index
    %76 = vector.load %arg9[%c0_30, %c0_31] : memref<2x32xf32, #tpu.memory_space<vmem>>, vector<2x32xf32>
    tpu.vector_store %arg9[%c0_30, %c0_31], %75 {strides = array<i32>} : memref<2x32xf32, #tpu.memory_space<vmem>>, vector<2x32xf32>,
    %c0_32 = arith.constant 0 : index
    %c0_33 = arith.constant 0 : index
    %77 = vector.load %arg10[%c0_32, %c0_33] : memref<2x32xf32, #tpu.memory_space<vmem>>, vector<2x32xf32>
    tpu.vector_store %arg10[%c0_32, %c0_33], %73 {strides = array<i32>} : memref<2x32xf32, #tpu.memory_space<vmem>>, vector<2x32xf32>,
    %78 = arith.index_cast %43 : i32 to index
    %c0_34 = arith.constant 0 : index
    %c0_35 = arith.constant 0 : index
    %79 = vector.load %arg6[%78, %c0_34, %c0_35] : memref<8x2x32xf32, #tpu.memory_space<vmem>>, vector<1x2x32xf32>
    %80 = vector.shape_cast %79 : vector<1x2x32xf32> to vector<2x32xf32>
    %81 = vector.shape_cast %75 : vector<2x32xf32> to vector<1x2x32xf32>
    tpu.vector_store %arg6[%78, %c0_34, %c0_35], %81 {strides = array<i32>} : memref<8x2x32xf32, #tpu.memory_space<vmem>>, vector<1x2x32xf32>,
    %c1_i32 = arith.constant 1 : i32
    %82 = arith.index_cast %c1_i32 : i32 to index
    %c0_36 = arith.constant 0 : index
    %c0_37 = arith.constant 0 : index
    %83 = vector.load %arg1[%82, %c0_36, %c0_37] : memref<8x2x128xf32, #tpu.memory_space<vmem>>, vector<1x2x128xf32>
    %84 = vector.shape_cast %83 : vector<1x2x128xf32> to vector<2x128xf32>
    %c0_38 = arith.constant 0 : index
    %c0_39 = arith.constant 0 : index
    %85 = vector.load %arg7[%c0_38, %c0_39] : memref<2x32xf32, #tpu.memory_space<vmem>>, vector<2x32xf32>
    %cst_40 = arith.constant dense<0.000000e+00> : vector<2x128xf32>
    %86 = tpu.matmul %85, %3, %cst_40 {dimension_numbers = #tpu.dot_dimension_numbers<[1], [0], [0], [1], [0, 0, 1, 1], [], []>} : vector<2x32xf32>, vector<32x128xf32>, vector<2x128xf32> -> vector<2x128xf32>
    %87 = arith.addf %84, %86 : vector<2x128xf32>
    %c0_41 = arith.constant 0 : index
    %c0_42 = arith.constant 0 : index
    %88 = vector.load %arg8[%c0_41, %c0_42] : memref<2x32xf32, #tpu.memory_space<vmem>>, vector<2x32xf32>
    %89 = vector.extract_strided_slice %87 {offsets = [0, 0], sizes = [2, 32], strides = [1, 1]} : vector<2x128xf32> to vector<2x32xf32>
    %90 = arith.negf %89 : vector<2x32xf32>
    %91 = math.exp %90 : vector<2x32xf32>
    %cst_43 = arith.constant 1.000000e+00 : f32
    %92 = vector.broadcast %cst_43 : f32 to vector<2x32xf32>
    %93 = arith.addf %92, %91 : vector<2x32xf32>
    %94 = arith.divf %92, %93 : vector<2x32xf32>
    %95 = vector.extract_strided_slice %87 {offsets = [0, 32], sizes = [2, 32], strides = [1, 1]} : vector<2x128xf32> to vector<2x32xf32>
    %96 = arith.negf %95 : vector<2x32xf32>
    %97 = math.exp %96 : vector<2x32xf32>
    %cst_44 = arith.constant 1.000000e+00 : f32
    %98 = vector.broadcast %cst_44 : f32 to vector<2x32xf32>
    %99 = arith.addf %98, %97 : vector<2x32xf32>
    %100 = arith.divf %98, %99 : vector<2x32xf32>
    %101 = vector.extract_strided_slice %87 {offsets = [0, 64], sizes = [2, 32], strides = [1, 1]} : vector<2x128xf32> to vector<2x32xf32>
    %102 = math.tanh %101 : vector<2x32xf32>
    %103 = vector.extract_strided_slice %87 {offsets = [0, 96], sizes = [2, 32], strides = [1, 1]} : vector<2x128xf32> to vector<2x32xf32>
    %104 = arith.negf %103 : vector<2x32xf32>
    %105 = math.exp %104 : vector<2x32xf32>
    %cst_45 = arith.constant 1.000000e+00 : f32
    %106 = vector.broadcast %cst_45 : f32 to vector<2x32xf32>
    %107 = arith.addf %106, %105 : vector<2x32xf32>
    %108 = arith.divf %106, %107 : vector<2x32xf32>
    %109 = arith.mulf %100, %88 : vector<2x32xf32>
    %110 = arith.mulf %94, %102 : vector<2x32xf32>
    %111 = arith.addf %109, %110 : vector<2x32xf32>
    %112 = math.tanh %111 : vector<2x32xf32>
    %113 = arith.mulf %108, %112 : vector<2x32xf32>
    %c0_46 = arith.constant 0 : index
    %c0_47 = arith.constant 0 : index
    %114 = vector.load %arg7[%c0_46, %c0_47] : memref<2x32xf32, #tpu.memory_space<vmem>>, vector<2x32xf32>
    tpu.vector_store %arg7[%c0_46, %c0_47], %113 {strides = array<i32>} : memref<2x32xf32, #tpu.memory_space<vmem>>, vector<2x32xf32>,
    %c0_48 = arith.constant 0 : index
    %c0_49 = arith.constant 0 : index
    %115 = vector.load %arg8[%c0_48, %c0_49] : memref<2x32xf32, #tpu.memory_space<vmem>>, vector<2x32xf32>
    tpu.vector_store %arg8[%c0_48, %c0_49], %111 {strides = array<i32>} : memref<2x32xf32, #tpu.memory_space<vmem>>, vector<2x32xf32>,
    %116 = arith.index_cast %c1_i32 : i32 to index
    %c0_50 = arith.constant 0 : index
    %c0_51 = arith.constant 0 : index
    %117 = vector.load %arg5[%116, %c0_50, %c0_51] : memref<8x2x32xf32, #tpu.memory_space<vmem>>, vector<1x2x32xf32>
    %118 = vector.shape_cast %117 : vector<1x2x32xf32> to vector<2x32xf32>
    %119 = vector.shape_cast %113 : vector<2x32xf32> to vector<1x2x32xf32>
    tpu.vector_store %arg5[%116, %c0_50, %c0_51], %119 {strides = array<i32>} : memref<8x2x32xf32, #tpu.memory_space<vmem>>, vector<1x2x32xf32>,
    %c7_i32_52 = arith.constant 7 : i32
    %120 = arith.subi %c7_i32_52, %c1_i32 : i32
    %121 = arith.index_cast %120 : i32 to index
    %c0_53 = arith.constant 0 : index
    %c0_54 = arith.constant 0 : index
    %122 = vector.load %arg2[%121, %c0_53, %c0_54] : memref<8x2x128xf32, #tpu.memory_space<vmem>>, vector<1x2x128xf32>
    %123 = vector.shape_cast %122 : vector<1x2x128xf32> to vector<2x128xf32>
    %c0_55 = arith.constant 0 : index
    %c0_56 = arith.constant 0 : index
    %124 = vector.load %arg9[%c0_55, %c0_56] : memref<2x32xf32, #tpu.memory_space<vmem>>, vector<2x32xf32>
    %cst_57 = arith.constant dense<0.000000e+00> : vector<2x128xf32>
    %125 = tpu.matmul %124, %4, %cst_57 {dimension_numbers = #tpu.dot_dimension_numbers<[1], [0], [0], [1], [0, 0, 1, 1], [], []>} : vector<2x32xf32>, vector<32x128xf32>, vector<2x128xf32> -> vector<2x128xf32>
    %126 = arith.addf %123, %125 : vector<2x128xf32>
    %c0_58 = arith.constant 0 : index
    %c0_59 = arith.constant 0 : index
    %127 = vector.load %arg10[%c0_58, %c0_59] : memref<2x32xf32, #tpu.memory_space<vmem>>, vector<2x32xf32>
    %128 = vector.extract_strided_slice %126 {offsets = [0, 0], sizes = [2, 32], strides = [1, 1]} : vector<2x128xf32> to vector<2x32xf32>
    %129 = arith.negf %128 : vector<2x32xf32>
    %130 = math.exp %129 : vector<2x32xf32>
    %cst_60 = arith.constant 1.000000e+00 : f32
    %131 = vector.broadcast %cst_60 : f32 to vector<2x32xf32>
    %132 = arith.addf %131, %130 : vector<2x32xf32>
    %133 = arith.divf %131, %132 : vector<2x32xf32>
    %134 = vector.extract_strided_slice %126 {offsets = [0, 32], sizes = [2, 32], strides = [1, 1]} : vector<2x128xf32> to vector<2x32xf32>
    %135 = arith.negf %134 : vector<2x32xf32>
    %136 = math.exp %135 : vector<2x32xf32>
    %cst_61 = arith.constant 1.000000e+00 : f32
    %137 = vector.broadcast %cst_61 : f32 to vector<2x32xf32>
    %138 = arith.addf %137, %136 : vector<2x32xf32>
    %139 = arith.divf %137, %138 : vector<2x32xf32>
    %140 = vector.extract_strided_slice %126 {offsets = [0, 64], sizes = [2, 32], strides = [1, 1]} : vector<2x128xf32> to vector<2x32xf32>
    %141 = math.tanh %140 : vector<2x32xf32>
    %142 = vector.extract_strided_slice %126 {offsets = [0, 96], sizes = [2, 32], strides = [1, 1]} : vector<2x128xf32> to vector<2x32xf32>
    %143 = arith.negf %142 : vector<2x32xf32>
    %144 = math.exp %143 : vector<2x32xf32>
    %cst_62 = arith.constant 1.000000e+00 : f32
    %145 = vector.broadcast %cst_62 : f32 to vector<2x32xf32>
    %146 = arith.addf %145, %144 : vector<2x32xf32>
    %147 = arith.divf %145, %146 : vector<2x32xf32>
    %148 = arith.mulf %139, %127 : vector<2x32xf32>
    %149 = arith.mulf %133, %141 : vector<2x32xf32>
    %150 = arith.addf %148, %149 : vector<2x32xf32>
    %151 = math.tanh %150 : vector<2x32xf32>
    %152 = arith.mulf %147, %151 : vector<2x32xf32>
    %c0_63 = arith.constant 0 : index
    %c0_64 = arith.constant 0 : index
    %153 = vector.load %arg9[%c0_63, %c0_64] : memref<2x32xf32, #tpu.memory_space<vmem>>, vector<2x32xf32>
    tpu.vector_store %arg9[%c0_63, %c0_64], %152 {strides = array<i32>} : memref<2x32xf32, #tpu.memory_space<vmem>>, vector<2x32xf32>,
    %c0_65 = arith.constant 0 : index
    %c0_66 = arith.constant 0 : index
    %154 = vector.load %arg10[%c0_65, %c0_66] : memref<2x32xf32, #tpu.memory_space<vmem>>, vector<2x32xf32>
    tpu.vector_store %arg10[%c0_65, %c0_66], %150 {strides = array<i32>} : memref<2x32xf32, #tpu.memory_space<vmem>>, vector<2x32xf32>,
    %155 = arith.index_cast %120 : i32 to index
    %c0_67 = arith.constant 0 : index
    %c0_68 = arith.constant 0 : index
    %156 = vector.load %arg6[%155, %c0_67, %c0_68] : memref<8x2x32xf32, #tpu.memory_space<vmem>>, vector<1x2x32xf32>
    %157 = vector.shape_cast %156 : vector<1x2x32xf32> to vector<2x32xf32>
    %158 = vector.shape_cast %152 : vector<2x32xf32> to vector<1x2x32xf32>
    tpu.vector_store %arg6[%155, %c0_67, %c0_68], %158 {strides = array<i32>} : memref<8x2x32xf32, #tpu.memory_space<vmem>>, vector<1x2x32xf32>,
    %c2_i32 = arith.constant 2 : i32
    %159 = arith.index_cast %c2_i32 : i32 to index
    %c0_69 = arith.constant 0 : index
    %c0_70 = arith.constant 0 : index
    %160 = vector.load %arg1[%159, %c0_69, %c0_70] : memref<8x2x128xf32, #tpu.memory_space<vmem>>, vector<1x2x128xf32>
    %161 = vector.shape_cast %160 : vector<1x2x128xf32> to vector<2x128xf32>
    %c0_71 = arith.constant 0 : index
    %c0_72 = arith.constant 0 : index
    %162 = vector.load %arg7[%c0_71, %c0_72] : memref<2x32xf32, #tpu.memory_space<vmem>>, vector<2x32xf32>
    %cst_73 = arith.constant dense<0.000000e+00> : vector<2x128xf32>
    %163 = tpu.matmul %162, %3, %cst_73 {dimension_numbers = #tpu.dot_dimension_numbers<[1], [0], [0], [1], [0, 0, 1, 1], [], []>} : vector<2x32xf32>, vector<32x128xf32>, vector<2x128xf32> -> vector<2x128xf32>
    %164 = arith.addf %161, %163 : vector<2x128xf32>
    %c0_74 = arith.constant 0 : index
    %c0_75 = arith.constant 0 : index
    %165 = vector.load %arg8[%c0_74, %c0_75] : memref<2x32xf32, #tpu.memory_space<vmem>>, vector<2x32xf32>
    %166 = vector.extract_strided_slice %164 {offsets = [0, 0], sizes = [2, 32], strides = [1, 1]} : vector<2x128xf32> to vector<2x32xf32>
    %167 = arith.negf %166 : vector<2x32xf32>
    %168 = math.exp %167 : vector<2x32xf32>
    %cst_76 = arith.constant 1.000000e+00 : f32
    %169 = vector.broadcast %cst_76 : f32 to vector<2x32xf32>
    %170 = arith.addf %169, %168 : vector<2x32xf32>
    %171 = arith.divf %169, %170 : vector<2x32xf32>
    %172 = vector.extract_strided_slice %164 {offsets = [0, 32], sizes = [2, 32], strides = [1, 1]} : vector<2x128xf32> to vector<2x32xf32>
    %173 = arith.negf %172 : vector<2x32xf32>
    %174 = math.exp %173 : vector<2x32xf32>
    %cst_77 = arith.constant 1.000000e+00 : f32
    %175 = vector.broadcast %cst_77 : f32 to vector<2x32xf32>
    %176 = arith.addf %175, %174 : vector<2x32xf32>
    %177 = arith.divf %175, %176 : vector<2x32xf32>
    %178 = vector.extract_strided_slice %164 {offsets = [0, 64], sizes = [2, 32], strides = [1, 1]} : vector<2x128xf32> to vector<2x32xf32>
    %179 = math.tanh %178 : vector<2x32xf32>
    %180 = vector.extract_strided_slice %164 {offsets = [0, 96], sizes = [2, 32], strides = [1, 1]} : vector<2x128xf32> to vector<2x32xf32>
    %181 = arith.negf %180 : vector<2x32xf32>
    %182 = math.exp %181 : vector<2x32xf32>
    %cst_78 = arith.constant 1.000000e+00 : f32
    %183 = vector.broadcast %cst_78 : f32 to vector<2x32xf32>
    %184 = arith.addf %183, %182 : vector<2x32xf32>
    %185 = arith.divf %183, %184 : vector<2x32xf32>
    %186 = arith.mulf %177, %165 : vector<2x32xf32>
    %187 = arith.mulf %171, %179 : vector<2x32xf32>
    %188 = arith.addf %186, %187 : vector<2x32xf32>
    %189 = math.tanh %188 : vector<2x32xf32>
    %190 = arith.mulf %185, %189 : vector<2x32xf32>
    %c0_79 = arith.constant 0 : index
    %c0_80 = arith.constant 0 : index
    %191 = vector.load %arg7[%c0_79, %c0_80] : memref<2x32xf32, #tpu.memory_space<vmem>>, vector<2x32xf32>
    tpu.vector_store %arg7[%c0_79, %c0_80], %190 {strides = array<i32>} : memref<2x32xf32, #tpu.memory_space<vmem>>, vector<2x32xf32>,
    %c0_81 = arith.constant 0 : index
    %c0_82 = arith.constant 0 : index
    %192 = vector.load %arg8[%c0_81, %c0_82] : memref<2x32xf32, #tpu.memory_space<vmem>>, vector<2x32xf32>
    tpu.vector_store %arg8[%c0_81, %c0_82], %188 {strides = array<i32>} : memref<2x32xf32, #tpu.memory_space<vmem>>, vector<2x32xf32>,
    %193 = arith.index_cast %c2_i32 : i32 to index
    %c0_83 = arith.constant 0 : index
    %c0_84 = arith.constant 0 : index
    %194 = vector.load %arg5[%193, %c0_83, %c0_84] : memref<8x2x32xf32, #tpu.memory_space<vmem>>, vector<1x2x32xf32>
    %195 = vector.shape_cast %194 : vector<1x2x32xf32> to vector<2x32xf32>
    %196 = vector.shape_cast %190 : vector<2x32xf32> to vector<1x2x32xf32>
    tpu.vector_store %arg5[%193, %c0_83, %c0_84], %196 {strides = array<i32>} : memref<8x2x32xf32, #tpu.memory_space<vmem>>, vector<1x2x32xf32>,
    %c7_i32_85 = arith.constant 7 : i32
    %197 = arith.subi %c7_i32_85, %c2_i32 : i32
    %198 = arith.index_cast %197 : i32 to index
    %c0_86 = arith.constant 0 : index
    %c0_87 = arith.constant 0 : index
    %199 = vector.load %arg2[%198, %c0_86, %c0_87] : memref<8x2x128xf32, #tpu.memory_space<vmem>>, vector<1x2x128xf32>
    %200 = vector.shape_cast %199 : vector<1x2x128xf32> to vector<2x128xf32>
    %c0_88 = arith.constant 0 : index
    %c0_89 = arith.constant 0 : index
    %201 = vector.load %arg9[%c0_88, %c0_89] : memref<2x32xf32, #tpu.memory_space<vmem>>, vector<2x32xf32>
    %cst_90 = arith.constant dense<0.000000e+00> : vector<2x128xf32>
    %202 = tpu.matmul %201, %4, %cst_90 {dimension_numbers = #tpu.dot_dimension_numbers<[1], [0], [0], [1], [0, 0, 1, 1], [], []>} : vector<2x32xf32>, vector<32x128xf32>, vector<2x128xf32> -> vector<2x128xf32>
    %203 = arith.addf %200, %202 : vector<2x128xf32>
    %c0_91 = arith.constant 0 : index
    %c0_92 = arith.constant 0 : index
    %204 = vector.load %arg10[%c0_91, %c0_92] : memref<2x32xf32, #tpu.memory_space<vmem>>, vector<2x32xf32>
    %205 = vector.extract_strided_slice %203 {offsets = [0, 0], sizes = [2, 32], strides = [1, 1]} : vector<2x128xf32> to vector<2x32xf32>
    %206 = arith.negf %205 : vector<2x32xf32>
    %207 = math.exp %206 : vector<2x32xf32>
    %cst_93 = arith.constant 1.000000e+00 : f32
    %208 = vector.broadcast %cst_93 : f32 to vector<2x32xf32>
    %209 = arith.addf %208, %207 : vector<2x32xf32>
    %210 = arith.divf %208, %209 : vector<2x32xf32>
    %211 = vector.extract_strided_slice %203 {offsets = [0, 32], sizes = [2, 32], strides = [1, 1]} : vector<2x128xf32> to vector<2x32xf32>
    %212 = arith.negf %211 : vector<2x32xf32>
    %213 = math.exp %212 : vector<2x32xf32>
    %cst_94 = arith.constant 1.000000e+00 : f32
    %214 = vector.broadcast %cst_94 : f32 to vector<2x32xf32>
    %215 = arith.addf %214, %213 : vector<2x32xf32>
    %216 = arith.divf %214, %215 : vector<2x32xf32>
    %217 = vector.extract_strided_slice %203 {offsets = [0, 64], sizes = [2, 32], strides = [1, 1]} : vector<2x128xf32> to vector<2x32xf32>
    %218 = math.tanh %217 : vector<2x32xf32>
    %219 = vector.extract_strided_slice %203 {offsets = [0, 96], sizes = [2, 32], strides = [1, 1]} : vector<2x128xf32> to vector<2x32xf32>
    %220 = arith.negf %219 : vector<2x32xf32>
    %221 = math.exp %220 : vector<2x32xf32>
    %cst_95 = arith.constant 1.000000e+00 : f32
    %222 = vector.broadcast %cst_95 : f32 to vector<2x32xf32>
    %223 = arith.addf %222, %221 : vector<2x32xf32>
    %224 = arith.divf %222, %223 : vector<2x32xf32>
    %225 = arith.mulf %216, %204 : vector<2x32xf32>
    %226 = arith.mulf %210, %218 : vector<2x32xf32>
    %227 = arith.addf %225, %226 : vector<2x32xf32>
    %228 = math.tanh %227 : vector<2x32xf32>
    %229 = arith.mulf %224, %228 : vector<2x32xf32>
    %c0_96 = arith.constant 0 : index
    %c0_97 = arith.constant 0 : index
    %230 = vector.load %arg9[%c0_96, %c0_97] : memref<2x32xf32, #tpu.memory_space<vmem>>, vector<2x32xf32>
    tpu.vector_store %arg9[%c0_96, %c0_97], %229 {strides = array<i32>} : memref<2x32xf32, #tpu.memory_space<vmem>>, vector<2x32xf32>,
    %c0_98 = arith.constant 0 : index
    %c0_99 = arith.constant 0 : index
    %231 = vector.load %arg10[%c0_98, %c0_99] : memref<2x32xf32, #tpu.memory_space<vmem>>, vector<2x32xf32>
    tpu.vector_store %arg10[%c0_98, %c0_99], %227 {strides = array<i32>} : memref<2x32xf32, #tpu.memory_space<vmem>>, vector<2x32xf32>,
    %232 = arith.index_cast %197 : i32 to index
    %c0_100 = arith.constant 0 : index
    %c0_101 = arith.constant 0 : index
    %233 = vector.load %arg6[%232, %c0_100, %c0_101] : memref<8x2x32xf32, #tpu.memory_space<vmem>>, vector<1x2x32xf32>
    %234 = vector.shape_cast %233 : vector<1x2x32xf32> to vector<2x32xf32>
    %235 = vector.shape_cast %229 : vector<2x32xf32> to vector<1x2x32xf32>
    tpu.vector_store %arg6[%232, %c0_100, %c0_101], %235 {strides = array<i32>} : memref<8x2x32xf32, #tpu.memory_space<vmem>>, vector<1x2x32xf32>,
    %c3_i32 = arith.constant 3 : i32
    %236 = arith.index_cast %c3_i32 : i32 to index
    %c0_102 = arith.constant 0 : index
    %c0_103 = arith.constant 0 : index
    %237 = vector.load %arg1[%236, %c0_102, %c0_103] : memref<8x2x128xf32, #tpu.memory_space<vmem>>, vector<1x2x128xf32>
    %238 = vector.shape_cast %237 : vector<1x2x128xf32> to vector<2x128xf32>
    %c0_104 = arith.constant 0 : index
    %c0_105 = arith.constant 0 : index
    %239 = vector.load %arg7[%c0_104, %c0_105] : memref<2x32xf32, #tpu.memory_space<vmem>>, vector<2x32xf32>
    %cst_106 = arith.constant dense<0.000000e+00> : vector<2x128xf32>
    %240 = tpu.matmul %239, %3, %cst_106 {dimension_numbers = #tpu.dot_dimension_numbers<[1], [0], [0], [1], [0, 0, 1, 1], [], []>} : vector<2x32xf32>, vector<32x128xf32>, vector<2x128xf32> -> vector<2x128xf32>
    %241 = arith.addf %238, %240 : vector<2x128xf32>
    %c0_107 = arith.constant 0 : index
    %c0_108 = arith.constant 0 : index
    %242 = vector.load %arg8[%c0_107, %c0_108] : memref<2x32xf32, #tpu.memory_space<vmem>>, vector<2x32xf32>
    %243 = vector.extract_strided_slice %241 {offsets = [0, 0], sizes = [2, 32], strides = [1, 1]} : vector<2x128xf32> to vector<2x32xf32>
    %244 = arith.negf %243 : vector<2x32xf32>
    %245 = math.exp %244 : vector<2x32xf32>
    %cst_109 = arith.constant 1.000000e+00 : f32
    %246 = vector.broadcast %cst_109 : f32 to vector<2x32xf32>
    %247 = arith.addf %246, %245 : vector<2x32xf32>
    %248 = arith.divf %246, %247 : vector<2x32xf32>
    %249 = vector.extract_strided_slice %241 {offsets = [0, 32], sizes = [2, 32], strides = [1, 1]} : vector<2x128xf32> to vector<2x32xf32>
    %250 = arith.negf %249 : vector<2x32xf32>
    %251 = math.exp %250 : vector<2x32xf32>
    %cst_110 = arith.constant 1.000000e+00 : f32
    %252 = vector.broadcast %cst_110 : f32 to vector<2x32xf32>
    %253 = arith.addf %252, %251 : vector<2x32xf32>
    %254 = arith.divf %252, %253 : vector<2x32xf32>
    %255 = vector.extract_strided_slice %241 {offsets = [0, 64], sizes = [2, 32], strides = [1, 1]} : vector<2x128xf32> to vector<2x32xf32>
    %256 = math.tanh %255 : vector<2x32xf32>
    %257 = vector.extract_strided_slice %241 {offsets = [0, 96], sizes = [2, 32], strides = [1, 1]} : vector<2x128xf32> to vector<2x32xf32>
    %258 = arith.negf %257 : vector<2x32xf32>
    %259 = math.exp %258 : vector<2x32xf32>
    %cst_111 = arith.constant 1.000000e+00 : f32
    %260 = vector.broadcast %cst_111 : f32 to vector<2x32xf32>
    %261 = arith.addf %260, %259 : vector<2x32xf32>
    %262 = arith.divf %260, %261 : vector<2x32xf32>
    %263 = arith.mulf %254, %242 : vector<2x32xf32>
    %264 = arith.mulf %248, %256 : vector<2x32xf32>
    %265 = arith.addf %263, %264 : vector<2x32xf32>
    %266 = math.tanh %265 : vector<2x32xf32>
    %267 = arith.mulf %262, %266 : vector<2x32xf32>
    %c0_112 = arith.constant 0 : index
    %c0_113 = arith.constant 0 : index
    %268 = vector.load %arg7[%c0_112, %c0_113] : memref<2x32xf32, #tpu.memory_space<vmem>>, vector<2x32xf32>
    tpu.vector_store %arg7[%c0_112, %c0_113], %267 {strides = array<i32>} : memref<2x32xf32, #tpu.memory_space<vmem>>, vector<2x32xf32>,
    %c0_114 = arith.constant 0 : index
    %c0_115 = arith.constant 0 : index
    %269 = vector.load %arg8[%c0_114, %c0_115] : memref<2x32xf32, #tpu.memory_space<vmem>>, vector<2x32xf32>
    tpu.vector_store %arg8[%c0_114, %c0_115], %265 {strides = array<i32>} : memref<2x32xf32, #tpu.memory_space<vmem>>, vector<2x32xf32>,
    %270 = arith.index_cast %c3_i32 : i32 to index
    %c0_116 = arith.constant 0 : index
    %c0_117 = arith.constant 0 : index
    %271 = vector.load %arg5[%270, %c0_116, %c0_117] : memref<8x2x32xf32, #tpu.memory_space<vmem>>, vector<1x2x32xf32>
    %272 = vector.shape_cast %271 : vector<1x2x32xf32> to vector<2x32xf32>
    %273 = vector.shape_cast %267 : vector<2x32xf32> to vector<1x2x32xf32>
    tpu.vector_store %arg5[%270, %c0_116, %c0_117], %273 {strides = array<i32>} : memref<8x2x32xf32, #tpu.memory_space<vmem>>, vector<1x2x32xf32>,
    %c7_i32_118 = arith.constant 7 : i32
    %274 = arith.subi %c7_i32_118, %c3_i32 : i32
    %275 = arith.index_cast %274 : i32 to index
    %c0_119 = arith.constant 0 : index
    %c0_120 = arith.constant 0 : index
    %276 = vector.load %arg2[%275, %c0_119, %c0_120] : memref<8x2x128xf32, #tpu.memory_space<vmem>>, vector<1x2x128xf32>
    %277 = vector.shape_cast %276 : vector<1x2x128xf32> to vector<2x128xf32>
    %c0_121 = arith.constant 0 : index
    %c0_122 = arith.constant 0 : index
    %278 = vector.load %arg9[%c0_121, %c0_122] : memref<2x32xf32, #tpu.memory_space<vmem>>, vector<2x32xf32>
    %cst_123 = arith.constant dense<0.000000e+00> : vector<2x128xf32>
    %279 = tpu.matmul %278, %4, %cst_123 {dimension_numbers = #tpu.dot_dimension_numbers<[1], [0], [0], [1], [0, 0, 1, 1], [], []>} : vector<2x32xf32>, vector<32x128xf32>, vector<2x128xf32> -> vector<2x128xf32>
    %280 = arith.addf %277, %279 : vector<2x128xf32>
    %c0_124 = arith.constant 0 : index
    %c0_125 = arith.constant 0 : index
    %281 = vector.load %arg10[%c0_124, %c0_125] : memref<2x32xf32, #tpu.memory_space<vmem>>, vector<2x32xf32>
    %282 = vector.extract_strided_slice %280 {offsets = [0, 0], sizes = [2, 32], strides = [1, 1]} : vector<2x128xf32> to vector<2x32xf32>
    %283 = arith.negf %282 : vector<2x32xf32>
    %284 = math.exp %283 : vector<2x32xf32>
    %cst_126 = arith.constant 1.000000e+00 : f32
    %285 = vector.broadcast %cst_126 : f32 to vector<2x32xf32>
    %286 = arith.addf %285, %284 : vector<2x32xf32>
    %287 = arith.divf %285, %286 : vector<2x32xf32>
    %288 = vector.extract_strided_slice %280 {offsets = [0, 32], sizes = [2, 32], strides = [1, 1]} : vector<2x128xf32> to vector<2x32xf32>
    %289 = arith.negf %288 : vector<2x32xf32>
    %290 = math.exp %289 : vector<2x32xf32>
    %cst_127 = arith.constant 1.000000e+00 : f32
    %291 = vector.broadcast %cst_127 : f32 to vector<2x32xf32>
    %292 = arith.addf %291, %290 : vector<2x32xf32>
    %293 = arith.divf %291, %292 : vector<2x32xf32>
    %294 = vector.extract_strided_slice %280 {offsets = [0, 64], sizes = [2, 32], strides = [1, 1]} : vector<2x128xf32> to vector<2x32xf32>
    %295 = math.tanh %294 : vector<2x32xf32>
    %296 = vector.extract_strided_slice %280 {offsets = [0, 96], sizes = [2, 32], strides = [1, 1]} : vector<2x128xf32> to vector<2x32xf32>
    %297 = arith.negf %296 : vector<2x32xf32>
    %298 = math.exp %297 : vector<2x32xf32>
    %cst_128 = arith.constant 1.000000e+00 : f32
    %299 = vector.broadcast %cst_128 : f32 to vector<2x32xf32>
    %300 = arith.addf %299, %298 : vector<2x32xf32>
    %301 = arith.divf %299, %300 : vector<2x32xf32>
    %302 = arith.mulf %293, %281 : vector<2x32xf32>
    %303 = arith.mulf %287, %295 : vector<2x32xf32>
    %304 = arith.addf %302, %303 : vector<2x32xf32>
    %305 = math.tanh %304 : vector<2x32xf32>
    %306 = arith.mulf %301, %305 : vector<2x32xf32>
    %c0_129 = arith.constant 0 : index
    %c0_130 = arith.constant 0 : index
    %307 = vector.load %arg9[%c0_129, %c0_130] : memref<2x32xf32, #tpu.memory_space<vmem>>, vector<2x32xf32>
    tpu.vector_store %arg9[%c0_129, %c0_130], %306 {strides = array<i32>} : memref<2x32xf32, #tpu.memory_space<vmem>>, vector<2x32xf32>,
    %c0_131 = arith.constant 0 : index
    %c0_132 = arith.constant 0 : index
    %308 = vector.load %arg10[%c0_131, %c0_132] : memref<2x32xf32, #tpu.memory_space<vmem>>, vector<2x32xf32>
    tpu.vector_store %arg10[%c0_131, %c0_132], %304 {strides = array<i32>} : memref<2x32xf32, #tpu.memory_space<vmem>>, vector<2x32xf32>,
    %309 = arith.index_cast %274 : i32 to index
    %c0_133 = arith.constant 0 : index
    %c0_134 = arith.constant 0 : index
    %310 = vector.load %arg6[%309, %c0_133, %c0_134] : memref<8x2x32xf32, #tpu.memory_space<vmem>>, vector<1x2x32xf32>
    %311 = vector.shape_cast %310 : vector<1x2x32xf32> to vector<2x32xf32>
    %312 = vector.shape_cast %306 : vector<2x32xf32> to vector<1x2x32xf32>
    tpu.vector_store %arg6[%309, %c0_133, %c0_134], %312 {strides = array<i32>} : memref<8x2x32xf32, #tpu.memory_space<vmem>>, vector<1x2x32xf32>,
    %c4_i32 = arith.constant 4 : i32
    %313 = arith.index_cast %c4_i32 : i32 to index
    %c0_135 = arith.constant 0 : index
    %c0_136 = arith.constant 0 : index
    %314 = vector.load %arg1[%313, %c0_135, %c0_136] : memref<8x2x128xf32, #tpu.memory_space<vmem>>, vector<1x2x128xf32>
    %315 = vector.shape_cast %314 : vector<1x2x128xf32> to vector<2x128xf32>
    %c0_137 = arith.constant 0 : index
    %c0_138 = arith.constant 0 : index
    %316 = vector.load %arg7[%c0_137, %c0_138] : memref<2x32xf32, #tpu.memory_space<vmem>>, vector<2x32xf32>
    %cst_139 = arith.constant dense<0.000000e+00> : vector<2x128xf32>
    %317 = tpu.matmul %316, %3, %cst_139 {dimension_numbers = #tpu.dot_dimension_numbers<[1], [0], [0], [1], [0, 0, 1, 1], [], []>} : vector<2x32xf32>, vector<32x128xf32>, vector<2x128xf32> -> vector<2x128xf32>
    %318 = arith.addf %315, %317 : vector<2x128xf32>
    %c0_140 = arith.constant 0 : index
    %c0_141 = arith.constant 0 : index
    %319 = vector.load %arg8[%c0_140, %c0_141] : memref<2x32xf32, #tpu.memory_space<vmem>>, vector<2x32xf32>
    %320 = vector.extract_strided_slice %318 {offsets = [0, 0], sizes = [2, 32], strides = [1, 1]} : vector<2x128xf32> to vector<2x32xf32>
    %321 = arith.negf %320 : vector<2x32xf32>
    %322 = math.exp %321 : vector<2x32xf32>
    %cst_142 = arith.constant 1.000000e+00 : f32
    %323 = vector.broadcast %cst_142 : f32 to vector<2x32xf32>
    %324 = arith.addf %323, %322 : vector<2x32xf32>
    %325 = arith.divf %323, %324 : vector<2x32xf32>
    %326 = vector.extract_strided_slice %318 {offsets = [0, 32], sizes = [2, 32], strides = [1, 1]} : vector<2x128xf32> to vector<2x32xf32>
    %327 = arith.negf %326 : vector<2x32xf32>
    %328 = math.exp %327 : vector<2x32xf32>
    %cst_143 = arith.constant 1.000000e+00 : f32
    %329 = vector.broadcast %cst_143 : f32 to vector<2x32xf32>
    %330 = arith.addf %329, %328 : vector<2x32xf32>
    %331 = arith.divf %329, %330 : vector<2x32xf32>
    %332 = vector.extract_strided_slice %318 {offsets = [0, 64], sizes = [2, 32], strides = [1, 1]} : vector<2x128xf32> to vector<2x32xf32>
    %333 = math.tanh %332 : vector<2x32xf32>
    %334 = vector.extract_strided_slice %318 {offsets = [0, 96], sizes = [2, 32], strides = [1, 1]} : vector<2x128xf32> to vector<2x32xf32>
    %335 = arith.negf %334 : vector<2x32xf32>
    %336 = math.exp %335 : vector<2x32xf32>
    %cst_144 = arith.constant 1.000000e+00 : f32
    %337 = vector.broadcast %cst_144 : f32 to vector<2x32xf32>
    %338 = arith.addf %337, %336 : vector<2x32xf32>
    %339 = arith.divf %337, %338 : vector<2x32xf32>
    %340 = arith.mulf %331, %319 : vector<2x32xf32>
    %341 = arith.mulf %325, %333 : vector<2x32xf32>
    %342 = arith.addf %340, %341 : vector<2x32xf32>
    %343 = math.tanh %342 : vector<2x32xf32>
    %344 = arith.mulf %339, %343 : vector<2x32xf32>
    %c0_145 = arith.constant 0 : index
    %c0_146 = arith.constant 0 : index
    %345 = vector.load %arg7[%c0_145, %c0_146] : memref<2x32xf32, #tpu.memory_space<vmem>>, vector<2x32xf32>
    tpu.vector_store %arg7[%c0_145, %c0_146], %344 {strides = array<i32>} : memref<2x32xf32, #tpu.memory_space<vmem>>, vector<2x32xf32>,
    %c0_147 = arith.constant 0 : index
    %c0_148 = arith.constant 0 : index
    %346 = vector.load %arg8[%c0_147, %c0_148] : memref<2x32xf32, #tpu.memory_space<vmem>>, vector<2x32xf32>
    tpu.vector_store %arg8[%c0_147, %c0_148], %342 {strides = array<i32>} : memref<2x32xf32, #tpu.memory_space<vmem>>, vector<2x32xf32>,
    %347 = arith.index_cast %c4_i32 : i32 to index
    %c0_149 = arith.constant 0 : index
    %c0_150 = arith.constant 0 : index
    %348 = vector.load %arg5[%347, %c0_149, %c0_150] : memref<8x2x32xf32, #tpu.memory_space<vmem>>, vector<1x2x32xf32>
    %349 = vector.shape_cast %348 : vector<1x2x32xf32> to vector<2x32xf32>
    %350 = vector.shape_cast %344 : vector<2x32xf32> to vector<1x2x32xf32>
    tpu.vector_store %arg5[%347, %c0_149, %c0_150], %350 {strides = array<i32>} : memref<8x2x32xf32, #tpu.memory_space<vmem>>, vector<1x2x32xf32>,
    %c7_i32_151 = arith.constant 7 : i32
    %351 = arith.subi %c7_i32_151, %c4_i32 : i32
    %352 = arith.index_cast %351 : i32 to index
    %c0_152 = arith.constant 0 : index
    %c0_153 = arith.constant 0 : index
    %353 = vector.load %arg2[%352, %c0_152, %c0_153] : memref<8x2x128xf32, #tpu.memory_space<vmem>>, vector<1x2x128xf32>
    %354 = vector.shape_cast %353 : vector<1x2x128xf32> to vector<2x128xf32>
    %c0_154 = arith.constant 0 : index
    %c0_155 = arith.constant 0 : index
    %355 = vector.load %arg9[%c0_154, %c0_155] : memref<2x32xf32, #tpu.memory_space<vmem>>, vector<2x32xf32>
    %cst_156 = arith.constant dense<0.000000e+00> : vector<2x128xf32>
    %356 = tpu.matmul %355, %4, %cst_156 {dimension_numbers = #tpu.dot_dimension_numbers<[1], [0], [0], [1], [0, 0, 1, 1], [], []>} : vector<2x32xf32>, vector<32x128xf32>, vector<2x128xf32> -> vector<2x128xf32>
    %357 = arith.addf %354, %356 : vector<2x128xf32>
    %c0_157 = arith.constant 0 : index
    %c0_158 = arith.constant 0 : index
    %358 = vector.load %arg10[%c0_157, %c0_158] : memref<2x32xf32, #tpu.memory_space<vmem>>, vector<2x32xf32>
    %359 = vector.extract_strided_slice %357 {offsets = [0, 0], sizes = [2, 32], strides = [1, 1]} : vector<2x128xf32> to vector<2x32xf32>
    %360 = arith.negf %359 : vector<2x32xf32>
    %361 = math.exp %360 : vector<2x32xf32>
    %cst_159 = arith.constant 1.000000e+00 : f32
    %362 = vector.broadcast %cst_159 : f32 to vector<2x32xf32>
    %363 = arith.addf %362, %361 : vector<2x32xf32>
    %364 = arith.divf %362, %363 : vector<2x32xf32>
    %365 = vector.extract_strided_slice %357 {offsets = [0, 32], sizes = [2, 32], strides = [1, 1]} : vector<2x128xf32> to vector<2x32xf32>
    %366 = arith.negf %365 : vector<2x32xf32>
    %367 = math.exp %366 : vector<2x32xf32>
    %cst_160 = arith.constant 1.000000e+00 : f32
    %368 = vector.broadcast %cst_160 : f32 to vector<2x32xf32>
    %369 = arith.addf %368, %367 : vector<2x32xf32>
    %370 = arith.divf %368, %369 : vector<2x32xf32>
    %371 = vector.extract_strided_slice %357 {offsets = [0, 64], sizes = [2, 32], strides = [1, 1]} : vector<2x128xf32> to vector<2x32xf32>
    %372 = math.tanh %371 : vector<2x32xf32>
    %373 = vector.extract_strided_slice %357 {offsets = [0, 96], sizes = [2, 32], strides = [1, 1]} : vector<2x128xf32> to vector<2x32xf32>
    %374 = arith.negf %373 : vector<2x32xf32>
    %375 = math.exp %374 : vector<2x32xf32>
    %cst_161 = arith.constant 1.000000e+00 : f32
    %376 = vector.broadcast %cst_161 : f32 to vector<2x32xf32>
    %377 = arith.addf %376, %375 : vector<2x32xf32>
    %378 = arith.divf %376, %377 : vector<2x32xf32>
    %379 = arith.mulf %370, %358 : vector<2x32xf32>
    %380 = arith.mulf %364, %372 : vector<2x32xf32>
    %381 = arith.addf %379, %380 : vector<2x32xf32>
    %382 = math.tanh %381 : vector<2x32xf32>
    %383 = arith.mulf %378, %382 : vector<2x32xf32>
    %c0_162 = arith.constant 0 : index
    %c0_163 = arith.constant 0 : index
    %384 = vector.load %arg9[%c0_162, %c0_163] : memref<2x32xf32, #tpu.memory_space<vmem>>, vector<2x32xf32>
    tpu.vector_store %arg9[%c0_162, %c0_163], %383 {strides = array<i32>} : memref<2x32xf32, #tpu.memory_space<vmem>>, vector<2x32xf32>,
    %c0_164 = arith.constant 0 : index
    %c0_165 = arith.constant 0 : index
    %385 = vector.load %arg10[%c0_164, %c0_165] : memref<2x32xf32, #tpu.memory_space<vmem>>, vector<2x32xf32>
    tpu.vector_store %arg10[%c0_164, %c0_165], %381 {strides = array<i32>} : memref<2x32xf32, #tpu.memory_space<vmem>>, vector<2x32xf32>,
    %386 = arith.index_cast %351 : i32 to index
    %c0_166 = arith.constant 0 : index
    %c0_167 = arith.constant 0 : index
    %387 = vector.load %arg6[%386, %c0_166, %c0_167] : memref<8x2x32xf32, #tpu.memory_space<vmem>>, vector<1x2x32xf32>
    %388 = vector.shape_cast %387 : vector<1x2x32xf32> to vector<2x32xf32>
    %389 = vector.shape_cast %383 : vector<2x32xf32> to vector<1x2x32xf32>
    tpu.vector_store %arg6[%386, %c0_166, %c0_167], %389 {strides = array<i32>} : memref<8x2x32xf32, #tpu.memory_space<vmem>>, vector<1x2x32xf32>,
    %c5_i32 = arith.constant 5 : i32
    %390 = arith.index_cast %c5_i32 : i32 to index
    %c0_168 = arith.constant 0 : index
    %c0_169 = arith.constant 0 : index
    %391 = vector.load %arg1[%390, %c0_168, %c0_169] : memref<8x2x128xf32, #tpu.memory_space<vmem>>, vector<1x2x128xf32>
    %392 = vector.shape_cast %391 : vector<1x2x128xf32> to vector<2x128xf32>
    %c0_170 = arith.constant 0 : index
    %c0_171 = arith.constant 0 : index
    %393 = vector.load %arg7[%c0_170, %c0_171] : memref<2x32xf32, #tpu.memory_space<vmem>>, vector<2x32xf32>
    %cst_172 = arith.constant dense<0.000000e+00> : vector<2x128xf32>
    %394 = tpu.matmul %393, %3, %cst_172 {dimension_numbers = #tpu.dot_dimension_numbers<[1], [0], [0], [1], [0, 0, 1, 1], [], []>} : vector<2x32xf32>, vector<32x128xf32>, vector<2x128xf32> -> vector<2x128xf32>
    %395 = arith.addf %392, %394 : vector<2x128xf32>
    %c0_173 = arith.constant 0 : index
    %c0_174 = arith.constant 0 : index
    %396 = vector.load %arg8[%c0_173, %c0_174] : memref<2x32xf32, #tpu.memory_space<vmem>>, vector<2x32xf32>
    %397 = vector.extract_strided_slice %395 {offsets = [0, 0], sizes = [2, 32], strides = [1, 1]} : vector<2x128xf32> to vector<2x32xf32>
    %398 = arith.negf %397 : vector<2x32xf32>
    %399 = math.exp %398 : vector<2x32xf32>
    %cst_175 = arith.constant 1.000000e+00 : f32
    %400 = vector.broadcast %cst_175 : f32 to vector<2x32xf32>
    %401 = arith.addf %400, %399 : vector<2x32xf32>
    %402 = arith.divf %400, %401 : vector<2x32xf32>
    %403 = vector.extract_strided_slice %395 {offsets = [0, 32], sizes = [2, 32], strides = [1, 1]} : vector<2x128xf32> to vector<2x32xf32>
    %404 = arith.negf %403 : vector<2x32xf32>
    %405 = math.exp %404 : vector<2x32xf32>
    %cst_176 = arith.constant 1.000000e+00 : f32
    %406 = vector.broadcast %cst_176 : f32 to vector<2x32xf32>
    %407 = arith.addf %406, %405 : vector<2x32xf32>
    %408 = arith.divf %406, %407 : vector<2x32xf32>
    %409 = vector.extract_strided_slice %395 {offsets = [0, 64], sizes = [2, 32], strides = [1, 1]} : vector<2x128xf32> to vector<2x32xf32>
    %410 = math.tanh %409 : vector<2x32xf32>
    %411 = vector.extract_strided_slice %395 {offsets = [0, 96], sizes = [2, 32], strides = [1, 1]} : vector<2x128xf32> to vector<2x32xf32>
    %412 = arith.negf %411 : vector<2x32xf32>
    %413 = math.exp %412 : vector<2x32xf32>
    %cst_177 = arith.constant 1.000000e+00 : f32
    %414 = vector.broadcast %cst_177 : f32 to vector<2x32xf32>
    %415 = arith.addf %414, %413 : vector<2x32xf32>
    %416 = arith.divf %414, %415 : vector<2x32xf32>
    %417 = arith.mulf %408, %396 : vector<2x32xf32>
    %418 = arith.mulf %402, %410 : vector<2x32xf32>
    %419 = arith.addf %417, %418 : vector<2x32xf32>
    %420 = math.tanh %419 : vector<2x32xf32>
    %421 = arith.mulf %416, %420 : vector<2x32xf32>
    %c0_178 = arith.constant 0 : index
    %c0_179 = arith.constant 0 : index
    %422 = vector.load %arg7[%c0_178, %c0_179] : memref<2x32xf32, #tpu.memory_space<vmem>>, vector<2x32xf32>
    tpu.vector_store %arg7[%c0_178, %c0_179], %421 {strides = array<i32>} : memref<2x32xf32, #tpu.memory_space<vmem>>, vector<2x32xf32>,
    %c0_180 = arith.constant 0 : index
    %c0_181 = arith.constant 0 : index
    %423 = vector.load %arg8[%c0_180, %c0_181] : memref<2x32xf32, #tpu.memory_space<vmem>>, vector<2x32xf32>
    tpu.vector_store %arg8[%c0_180, %c0_181], %419 {strides = array<i32>} : memref<2x32xf32, #tpu.memory_space<vmem>>, vector<2x32xf32>,
    %424 = arith.index_cast %c5_i32 : i32 to index
    %c0_182 = arith.constant 0 : index
    %c0_183 = arith.constant 0 : index
    %425 = vector.load %arg5[%424, %c0_182, %c0_183] : memref<8x2x32xf32, #tpu.memory_space<vmem>>, vector<1x2x32xf32>
    %426 = vector.shape_cast %425 : vector<1x2x32xf32> to vector<2x32xf32>
    %427 = vector.shape_cast %421 : vector<2x32xf32> to vector<1x2x32xf32>
    tpu.vector_store %arg5[%424, %c0_182, %c0_183], %427 {strides = array<i32>} : memref<8x2x32xf32, #tpu.memory_space<vmem>>, vector<1x2x32xf32>,
    %c7_i32_184 = arith.constant 7 : i32
    %428 = arith.subi %c7_i32_184, %c5_i32 : i32
    %429 = arith.index_cast %428 : i32 to index
    %c0_185 = arith.constant 0 : index
    %c0_186 = arith.constant 0 : index
    %430 = vector.load %arg2[%429, %c0_185, %c0_186] : memref<8x2x128xf32, #tpu.memory_space<vmem>>, vector<1x2x128xf32>
    %431 = vector.shape_cast %430 : vector<1x2x128xf32> to vector<2x128xf32>
    %c0_187 = arith.constant 0 : index
    %c0_188 = arith.constant 0 : index
    %432 = vector.load %arg9[%c0_187, %c0_188] : memref<2x32xf32, #tpu.memory_space<vmem>>, vector<2x32xf32>
    %cst_189 = arith.constant dense<0.000000e+00> : vector<2x128xf32>
    %433 = tpu.matmul %432, %4, %cst_189 {dimension_numbers = #tpu.dot_dimension_numbers<[1], [0], [0], [1], [0, 0, 1, 1], [], []>} : vector<2x32xf32>, vector<32x128xf32>, vector<2x128xf32> -> vector<2x128xf32>
    %434 = arith.addf %431, %433 : vector<2x128xf32>
    %c0_190 = arith.constant 0 : index
    %c0_191 = arith.constant 0 : index
    %435 = vector.load %arg10[%c0_190, %c0_191] : memref<2x32xf32, #tpu.memory_space<vmem>>, vector<2x32xf32>
    %436 = vector.extract_strided_slice %434 {offsets = [0, 0], sizes = [2, 32], strides = [1, 1]} : vector<2x128xf32> to vector<2x32xf32>
    %437 = arith.negf %436 : vector<2x32xf32>
    %438 = math.exp %437 : vector<2x32xf32>
    %cst_192 = arith.constant 1.000000e+00 : f32
    %439 = vector.broadcast %cst_192 : f32 to vector<2x32xf32>
    %440 = arith.addf %439, %438 : vector<2x32xf32>
    %441 = arith.divf %439, %440 : vector<2x32xf32>
    %442 = vector.extract_strided_slice %434 {offsets = [0, 32], sizes = [2, 32], strides = [1, 1]} : vector<2x128xf32> to vector<2x32xf32>
    %443 = arith.negf %442 : vector<2x32xf32>
    %444 = math.exp %443 : vector<2x32xf32>
    %cst_193 = arith.constant 1.000000e+00 : f32
    %445 = vector.broadcast %cst_193 : f32 to vector<2x32xf32>
    %446 = arith.addf %445, %444 : vector<2x32xf32>
    %447 = arith.divf %445, %446 : vector<2x32xf32>
    %448 = vector.extract_strided_slice %434 {offsets = [0, 64], sizes = [2, 32], strides = [1, 1]} : vector<2x128xf32> to vector<2x32xf32>
    %449 = math.tanh %448 : vector<2x32xf32>
    %450 = vector.extract_strided_slice %434 {offsets = [0, 96], sizes = [2, 32], strides = [1, 1]} : vector<2x128xf32> to vector<2x32xf32>
    %451 = arith.negf %450 : vector<2x32xf32>
    %452 = math.exp %451 : vector<2x32xf32>
    %cst_194 = arith.constant 1.000000e+00 : f32
    %453 = vector.broadcast %cst_194 : f32 to vector<2x32xf32>
    %454 = arith.addf %453, %452 : vector<2x32xf32>
    %455 = arith.divf %453, %454 : vector<2x32xf32>
    %456 = arith.mulf %447, %435 : vector<2x32xf32>
    %457 = arith.mulf %441, %449 : vector<2x32xf32>
    %458 = arith.addf %456, %457 : vector<2x32xf32>
    %459 = math.tanh %458 : vector<2x32xf32>
    %460 = arith.mulf %455, %459 : vector<2x32xf32>
    %c0_195 = arith.constant 0 : index
    %c0_196 = arith.constant 0 : index
    %461 = vector.load %arg9[%c0_195, %c0_196] : memref<2x32xf32, #tpu.memory_space<vmem>>, vector<2x32xf32>
    tpu.vector_store %arg9[%c0_195, %c0_196], %460 {strides = array<i32>} : memref<2x32xf32, #tpu.memory_space<vmem>>, vector<2x32xf32>,
    %c0_197 = arith.constant 0 : index
    %c0_198 = arith.constant 0 : index
    %462 = vector.load %arg10[%c0_197, %c0_198] : memref<2x32xf32, #tpu.memory_space<vmem>>, vector<2x32xf32>
    tpu.vector_store %arg10[%c0_197, %c0_198], %458 {strides = array<i32>} : memref<2x32xf32, #tpu.memory_space<vmem>>, vector<2x32xf32>,
    %463 = arith.index_cast %428 : i32 to index
    %c0_199 = arith.constant 0 : index
    %c0_200 = arith.constant 0 : index
    %464 = vector.load %arg6[%463, %c0_199, %c0_200] : memref<8x2x32xf32, #tpu.memory_space<vmem>>, vector<1x2x32xf32>
    %465 = vector.shape_cast %464 : vector<1x2x32xf32> to vector<2x32xf32>
    %466 = vector.shape_cast %460 : vector<2x32xf32> to vector<1x2x32xf32>
    tpu.vector_store %arg6[%463, %c0_199, %c0_200], %466 {strides = array<i32>} : memref<8x2x32xf32, #tpu.memory_space<vmem>>, vector<1x2x32xf32>,
    %c6_i32 = arith.constant 6 : i32
    %467 = arith.index_cast %c6_i32 : i32 to index
    %c0_201 = arith.constant 0 : index
    %c0_202 = arith.constant 0 : index
    %468 = vector.load %arg1[%467, %c0_201, %c0_202] : memref<8x2x128xf32, #tpu.memory_space<vmem>>, vector<1x2x128xf32>
    %469 = vector.shape_cast %468 : vector<1x2x128xf32> to vector<2x128xf32>
    %c0_203 = arith.constant 0 : index
    %c0_204 = arith.constant 0 : index
    %470 = vector.load %arg7[%c0_203, %c0_204] : memref<2x32xf32, #tpu.memory_space<vmem>>, vector<2x32xf32>
    %cst_205 = arith.constant dense<0.000000e+00> : vector<2x128xf32>
    %471 = tpu.matmul %470, %3, %cst_205 {dimension_numbers = #tpu.dot_dimension_numbers<[1], [0], [0], [1], [0, 0, 1, 1], [], []>} : vector<2x32xf32>, vector<32x128xf32>, vector<2x128xf32> -> vector<2x128xf32>
    %472 = arith.addf %469, %471 : vector<2x128xf32>
    %c0_206 = arith.constant 0 : index
    %c0_207 = arith.constant 0 : index
    %473 = vector.load %arg8[%c0_206, %c0_207] : memref<2x32xf32, #tpu.memory_space<vmem>>, vector<2x32xf32>
    %474 = vector.extract_strided_slice %472 {offsets = [0, 0], sizes = [2, 32], strides = [1, 1]} : vector<2x128xf32> to vector<2x32xf32>
    %475 = arith.negf %474 : vector<2x32xf32>
    %476 = math.exp %475 : vector<2x32xf32>
    %cst_208 = arith.constant 1.000000e+00 : f32
    %477 = vector.broadcast %cst_208 : f32 to vector<2x32xf32>
    %478 = arith.addf %477, %476 : vector<2x32xf32>
    %479 = arith.divf %477, %478 : vector<2x32xf32>
    %480 = vector.extract_strided_slice %472 {offsets = [0, 32], sizes = [2, 32], strides = [1, 1]} : vector<2x128xf32> to vector<2x32xf32>
    %481 = arith.negf %480 : vector<2x32xf32>
    %482 = math.exp %481 : vector<2x32xf32>
    %cst_209 = arith.constant 1.000000e+00 : f32
    %483 = vector.broadcast %cst_209 : f32 to vector<2x32xf32>
    %484 = arith.addf %483, %482 : vector<2x32xf32>
    %485 = arith.divf %483, %484 : vector<2x32xf32>
    %486 = vector.extract_strided_slice %472 {offsets = [0, 64], sizes = [2, 32], strides = [1, 1]} : vector<2x128xf32> to vector<2x32xf32>
    %487 = math.tanh %486 : vector<2x32xf32>
    %488 = vector.extract_strided_slice %472 {offsets = [0, 96], sizes = [2, 32], strides = [1, 1]} : vector<2x128xf32> to vector<2x32xf32>
    %489 = arith.negf %488 : vector<2x32xf32>
    %490 = math.exp %489 : vector<2x32xf32>
    %cst_210 = arith.constant 1.000000e+00 : f32
    %491 = vector.broadcast %cst_210 : f32 to vector<2x32xf32>
    %492 = arith.addf %491, %490 : vector<2x32xf32>
    %493 = arith.divf %491, %492 : vector<2x32xf32>
    %494 = arith.mulf %485, %473 : vector<2x32xf32>
    %495 = arith.mulf %479, %487 : vector<2x32xf32>
    %496 = arith.addf %494, %495 : vector<2x32xf32>
    %497 = math.tanh %496 : vector<2x32xf32>
    %498 = arith.mulf %493, %497 : vector<2x32xf32>
    %c0_211 = arith.constant 0 : index
    %c0_212 = arith.constant 0 : index
    %499 = vector.load %arg7[%c0_211, %c0_212] : memref<2x32xf32, #tpu.memory_space<vmem>>, vector<2x32xf32>
    tpu.vector_store %arg7[%c0_211, %c0_212], %498 {strides = array<i32>} : memref<2x32xf32, #tpu.memory_space<vmem>>, vector<2x32xf32>,
    %c0_213 = arith.constant 0 : index
    %c0_214 = arith.constant 0 : index
    %500 = vector.load %arg8[%c0_213, %c0_214] : memref<2x32xf32, #tpu.memory_space<vmem>>, vector<2x32xf32>
    tpu.vector_store %arg8[%c0_213, %c0_214], %496 {strides = array<i32>} : memref<2x32xf32, #tpu.memory_space<vmem>>, vector<2x32xf32>,
    %501 = arith.index_cast %c6_i32 : i32 to index
    %c0_215 = arith.constant 0 : index
    %c0_216 = arith.constant 0 : index
    %502 = vector.load %arg5[%501, %c0_215, %c0_216] : memref<8x2x32xf32, #tpu.memory_space<vmem>>, vector<1x2x32xf32>
    %503 = vector.shape_cast %502 : vector<1x2x32xf32> to vector<2x32xf32>
    %504 = vector.shape_cast %498 : vector<2x32xf32> to vector<1x2x32xf32>
    tpu.vector_store %arg5[%501, %c0_215, %c0_216], %504 {strides = array<i32>} : memref<8x2x32xf32, #tpu.memory_space<vmem>>, vector<1x2x32xf32>,
    %c7_i32_217 = arith.constant 7 : i32
    %505 = arith.subi %c7_i32_217, %c6_i32 : i32
    %506 = arith.index_cast %505 : i32 to index
    %c0_218 = arith.constant 0 : index
    %c0_219 = arith.constant 0 : index
    %507 = vector.load %arg2[%506, %c0_218, %c0_219] : memref<8x2x128xf32, #tpu.memory_space<vmem>>, vector<1x2x128xf32>
    %508 = vector.shape_cast %507 : vector<1x2x128xf32> to vector<2x128xf32>
    %c0_220 = arith.constant 0 : index
    %c0_221 = arith.constant 0 : index
    %509 = vector.load %arg9[%c0_220, %c0_221] : memref<2x32xf32, #tpu.memory_space<vmem>>, vector<2x32xf32>
    %cst_222 = arith.constant dense<0.000000e+00> : vector<2x128xf32>
    %510 = tpu.matmul %509, %4, %cst_222 {dimension_numbers = #tpu.dot_dimension_numbers<[1], [0], [0], [1], [0, 0, 1, 1], [], []>} : vector<2x32xf32>, vector<32x128xf32>, vector<2x128xf32> -> vector<2x128xf32>
    %511 = arith.addf %508, %510 : vector<2x128xf32>
    %c0_223 = arith.constant 0 : index
    %c0_224 = arith.constant 0 : index
    %512 = vector.load %arg10[%c0_223, %c0_224] : memref<2x32xf32, #tpu.memory_space<vmem>>, vector<2x32xf32>
    %513 = vector.extract_strided_slice %511 {offsets = [0, 0], sizes = [2, 32], strides = [1, 1]} : vector<2x128xf32> to vector<2x32xf32>
    %514 = arith.negf %513 : vector<2x32xf32>
    %515 = math.exp %514 : vector<2x32xf32>
    %cst_225 = arith.constant 1.000000e+00 : f32
    %516 = vector.broadcast %cst_225 : f32 to vector<2x32xf32>
    %517 = arith.addf %516, %515 : vector<2x32xf32>
    %518 = arith.divf %516, %517 : vector<2x32xf32>
    %519 = vector.extract_strided_slice %511 {offsets = [0, 32], sizes = [2, 32], strides = [1, 1]} : vector<2x128xf32> to vector<2x32xf32>
    %520 = arith.negf %519 : vector<2x32xf32>
    %521 = math.exp %520 : vector<2x32xf32>
    %cst_226 = arith.constant 1.000000e+00 : f32
    %522 = vector.broadcast %cst_226 : f32 to vector<2x32xf32>
    %523 = arith.addf %522, %521 : vector<2x32xf32>
    %524 = arith.divf %522, %523 : vector<2x32xf32>
    %525 = vector.extract_strided_slice %511 {offsets = [0, 64], sizes = [2, 32], strides = [1, 1]} : vector<2x128xf32> to vector<2x32xf32>
    %526 = math.tanh %525 : vector<2x32xf32>
    %527 = vector.extract_strided_slice %511 {offsets = [0, 96], sizes = [2, 32], strides = [1, 1]} : vector<2x128xf32> to vector<2x32xf32>
    %528 = arith.negf %527 : vector<2x32xf32>
    %529 = math.exp %528 : vector<2x32xf32>
    %cst_227 = arith.constant 1.000000e+00 : f32
    %530 = vector.broadcast %cst_227 : f32 to vector<2x32xf32>
    %531 = arith.addf %530, %529 : vector<2x32xf32>
    %532 = arith.divf %530, %531 : vector<2x32xf32>
    %533 = arith.mulf %524, %512 : vector<2x32xf32>
    %534 = arith.mulf %518, %526 : vector<2x32xf32>
    %535 = arith.addf %533, %534 : vector<2x32xf32>
    %536 = math.tanh %535 : vector<2x32xf32>
    %537 = arith.mulf %532, %536 : vector<2x32xf32>
    %c0_228 = arith.constant 0 : index
    %c0_229 = arith.constant 0 : index
    %538 = vector.load %arg9[%c0_228, %c0_229] : memref<2x32xf32, #tpu.memory_space<vmem>>, vector<2x32xf32>
    tpu.vector_store %arg9[%c0_228, %c0_229], %537 {strides = array<i32>} : memref<2x32xf32, #tpu.memory_space<vmem>>, vector<2x32xf32>,
    %c0_230 = arith.constant 0 : index
    %c0_231 = arith.constant 0 : index
    %539 = vector.load %arg10[%c0_230, %c0_231] : memref<2x32xf32, #tpu.memory_space<vmem>>, vector<2x32xf32>
    tpu.vector_store %arg10[%c0_230, %c0_231], %535 {strides = array<i32>} : memref<2x32xf32, #tpu.memory_space<vmem>>, vector<2x32xf32>,
    %540 = arith.index_cast %505 : i32 to index
    %c0_232 = arith.constant 0 : index
    %c0_233 = arith.constant 0 : index
    %541 = vector.load %arg6[%540, %c0_232, %c0_233] : memref<8x2x32xf32, #tpu.memory_space<vmem>>, vector<1x2x32xf32>
    %542 = vector.shape_cast %541 : vector<1x2x32xf32> to vector<2x32xf32>
    %543 = vector.shape_cast %537 : vector<2x32xf32> to vector<1x2x32xf32>
    tpu.vector_store %arg6[%540, %c0_232, %c0_233], %543 {strides = array<i32>} : memref<8x2x32xf32, #tpu.memory_space<vmem>>, vector<1x2x32xf32>,
    %c7_i32_234 = arith.constant 7 : i32
    %544 = arith.index_cast %c7_i32_234 : i32 to index
    %c0_235 = arith.constant 0 : index
    %c0_236 = arith.constant 0 : index
    %545 = vector.load %arg1[%544, %c0_235, %c0_236] : memref<8x2x128xf32, #tpu.memory_space<vmem>>, vector<1x2x128xf32>
    %546 = vector.shape_cast %545 : vector<1x2x128xf32> to vector<2x128xf32>
    %c0_237 = arith.constant 0 : index
    %c0_238 = arith.constant 0 : index
    %547 = vector.load %arg7[%c0_237, %c0_238] : memref<2x32xf32, #tpu.memory_space<vmem>>, vector<2x32xf32>
    %cst_239 = arith.constant dense<0.000000e+00> : vector<2x128xf32>
    %548 = tpu.matmul %547, %3, %cst_239 {dimension_numbers = #tpu.dot_dimension_numbers<[1], [0], [0], [1], [0, 0, 1, 1], [], []>} : vector<2x32xf32>, vector<32x128xf32>, vector<2x128xf32> -> vector<2x128xf32>
    %549 = arith.addf %546, %548 : vector<2x128xf32>
    %c0_240 = arith.constant 0 : index
    %c0_241 = arith.constant 0 : index
    %550 = vector.load %arg8[%c0_240, %c0_241] : memref<2x32xf32, #tpu.memory_space<vmem>>, vector<2x32xf32>
    %551 = vector.extract_strided_slice %549 {offsets = [0, 0], sizes = [2, 32], strides = [1, 1]} : vector<2x128xf32> to vector<2x32xf32>
    %552 = arith.negf %551 : vector<2x32xf32>
    %553 = math.exp %552 : vector<2x32xf32>
    %cst_242 = arith.constant 1.000000e+00 : f32
    %554 = vector.broadcast %cst_242 : f32 to vector<2x32xf32>
    %555 = arith.addf %554, %553 : vector<2x32xf32>
    %556 = arith.divf %554, %555 : vector<2x32xf32>
    %557 = vector.extract_strided_slice %549 {offsets = [0, 32], sizes = [2, 32], strides = [1, 1]} : vector<2x128xf32> to vector<2x32xf32>
    %558 = arith.negf %557 : vector<2x32xf32>
    %559 = math.exp %558 : vector<2x32xf32>
    %cst_243 = arith.constant 1.000000e+00 : f32
    %560 = vector.broadcast %cst_243 : f32 to vector<2x32xf32>
    %561 = arith.addf %560, %559 : vector<2x32xf32>
    %562 = arith.divf %560, %561 : vector<2x32xf32>
    %563 = vector.extract_strided_slice %549 {offsets = [0, 64], sizes = [2, 32], strides = [1, 1]} : vector<2x128xf32> to vector<2x32xf32>
    %564 = math.tanh %563 : vector<2x32xf32>
    %565 = vector.extract_strided_slice %549 {offsets = [0, 96], sizes = [2, 32], strides = [1, 1]} : vector<2x128xf32> to vector<2x32xf32>
    %566 = arith.negf %565 : vector<2x32xf32>
    %567 = math.exp %566 : vector<2x32xf32>
    %cst_244 = arith.constant 1.000000e+00 : f32
    %568 = vector.broadcast %cst_244 : f32 to vector<2x32xf32>
    %569 = arith.addf %568, %567 : vector<2x32xf32>
    %570 = arith.divf %568, %569 : vector<2x32xf32>
    %571 = arith.mulf %562, %550 : vector<2x32xf32>
    %572 = arith.mulf %556, %564 : vector<2x32xf32>
    %573 = arith.addf %571, %572 : vector<2x32xf32>
    %574 = math.tanh %573 : vector<2x32xf32>
    %575 = arith.mulf %570, %574 : vector<2x32xf32>
    %c0_245 = arith.constant 0 : index
    %c0_246 = arith.constant 0 : index
    %576 = vector.load %arg7[%c0_245, %c0_246] : memref<2x32xf32, #tpu.memory_space<vmem>>, vector<2x32xf32>
    tpu.vector_store %arg7[%c0_245, %c0_246], %575 {strides = array<i32>} : memref<2x32xf32, #tpu.memory_space<vmem>>, vector<2x32xf32>,
    %c0_247 = arith.constant 0 : index
    %c0_248 = arith.constant 0 : index
    %577 = vector.load %arg8[%c0_247, %c0_248] : memref<2x32xf32, #tpu.memory_space<vmem>>, vector<2x32xf32>
    tpu.vector_store %arg8[%c0_247, %c0_248], %573 {strides = array<i32>} : memref<2x32xf32, #tpu.memory_space<vmem>>, vector<2x32xf32>,
    %578 = arith.index_cast %c7_i32_234 : i32 to index
    %c0_249 = arith.constant 0 : index
    %c0_250 = arith.constant 0 : index
    %579 = vector.load %arg5[%578, %c0_249, %c0_250] : memref<8x2x32xf32, #tpu.memory_space<vmem>>, vector<1x2x32xf32>
    %580 = vector.shape_cast %579 : vector<1x2x32xf32> to vector<2x32xf32>
    %581 = vector.shape_cast %575 : vector<2x32xf32> to vector<1x2x32xf32>
    tpu.vector_store %arg5[%578, %c0_249, %c0_250], %581 {strides = array<i32>} : memref<8x2x32xf32, #tpu.memory_space<vmem>>, vector<1x2x32xf32>,
    %c7_i32_251 = arith.constant 7 : i32
    %582 = arith.subi %c7_i32_251, %c7_i32_234 : i32
    %583 = arith.index_cast %582 : i32 to index
    %c0_252 = arith.constant 0 : index
    %c0_253 = arith.constant 0 : index
    %584 = vector.load %arg2[%583, %c0_252, %c0_253] : memref<8x2x128xf32, #tpu.memory_space<vmem>>, vector<1x2x128xf32>
    %585 = vector.shape_cast %584 : vector<1x2x128xf32> to vector<2x128xf32>
    %c0_254 = arith.constant 0 : index
    %c0_255 = arith.constant 0 : index
    %586 = vector.load %arg9[%c0_254, %c0_255] : memref<2x32xf32, #tpu.memory_space<vmem>>, vector<2x32xf32>
    %cst_256 = arith.constant dense<0.000000e+00> : vector<2x128xf32>
    %587 = tpu.matmul %586, %4, %cst_256 {dimension_numbers = #tpu.dot_dimension_numbers<[1], [0], [0], [1], [0, 0, 1, 1], [], []>} : vector<2x32xf32>, vector<32x128xf32>, vector<2x128xf32> -> vector<2x128xf32>
    %588 = arith.addf %585, %587 : vector<2x128xf32>
    %c0_257 = arith.constant 0 : index
    %c0_258 = arith.constant 0 : index
    %589 = vector.load %arg10[%c0_257, %c0_258] : memref<2x32xf32, #tpu.memory_space<vmem>>, vector<2x32xf32>
    %590 = vector.extract_strided_slice %588 {offsets = [0, 0], sizes = [2, 32], strides = [1, 1]} : vector<2x128xf32> to vector<2x32xf32>
    %591 = arith.negf %590 : vector<2x32xf32>
    %592 = math.exp %591 : vector<2x32xf32>
    %cst_259 = arith.constant 1.000000e+00 : f32
    %593 = vector.broadcast %cst_259 : f32 to vector<2x32xf32>
    %594 = arith.addf %593, %592 : vector<2x32xf32>
    %595 = arith.divf %593, %594 : vector<2x32xf32>
    %596 = vector.extract_strided_slice %588 {offsets = [0, 32], sizes = [2, 32], strides = [1, 1]} : vector<2x128xf32> to vector<2x32xf32>
    %597 = arith.negf %596 : vector<2x32xf32>
    %598 = math.exp %597 : vector<2x32xf32>
    %cst_260 = arith.constant 1.000000e+00 : f32
    %599 = vector.broadcast %cst_260 : f32 to vector<2x32xf32>
    %600 = arith.addf %599, %598 : vector<2x32xf32>
    %601 = arith.divf %599, %600 : vector<2x32xf32>
    %602 = vector.extract_strided_slice %588 {offsets = [0, 64], sizes = [2, 32], strides = [1, 1]} : vector<2x128xf32> to vector<2x32xf32>
    %603 = math.tanh %602 : vector<2x32xf32>
    %604 = vector.extract_strided_slice %588 {offsets = [0, 96], sizes = [2, 32], strides = [1, 1]} : vector<2x128xf32> to vector<2x32xf32>
    %605 = arith.negf %604 : vector<2x32xf32>
    %606 = math.exp %605 : vector<2x32xf32>
    %cst_261 = arith.constant 1.000000e+00 : f32
    %607 = vector.broadcast %cst_261 : f32 to vector<2x32xf32>
    %608 = arith.addf %607, %606 : vector<2x32xf32>
    %609 = arith.divf %607, %608 : vector<2x32xf32>
    %610 = arith.mulf %601, %589 : vector<2x32xf32>
    %611 = arith.mulf %595, %603 : vector<2x32xf32>
    %612 = arith.addf %610, %611 : vector<2x32xf32>
    %613 = math.tanh %612 : vector<2x32xf32>
    %614 = arith.mulf %609, %613 : vector<2x32xf32>
    %c0_262 = arith.constant 0 : index
    %c0_263 = arith.constant 0 : index
    %615 = vector.load %arg9[%c0_262, %c0_263] : memref<2x32xf32, #tpu.memory_space<vmem>>, vector<2x32xf32>
    tpu.vector_store %arg9[%c0_262, %c0_263], %614 {strides = array<i32>} : memref<2x32xf32, #tpu.memory_space<vmem>>, vector<2x32xf32>,
    %c0_264 = arith.constant 0 : index
    %c0_265 = arith.constant 0 : index
    %616 = vector.load %arg10[%c0_264, %c0_265] : memref<2x32xf32, #tpu.memory_space<vmem>>, vector<2x32xf32>
    tpu.vector_store %arg10[%c0_264, %c0_265], %612 {strides = array<i32>} : memref<2x32xf32, #tpu.memory_space<vmem>>, vector<2x32xf32>,
    %617 = arith.index_cast %582 : i32 to index
    %c0_266 = arith.constant 0 : index
    %c0_267 = arith.constant 0 : index
    %618 = vector.load %arg6[%617, %c0_266, %c0_267] : memref<8x2x32xf32, #tpu.memory_space<vmem>>, vector<1x2x32xf32>
    %619 = vector.shape_cast %618 : vector<1x2x32xf32> to vector<2x32xf32>
    %620 = vector.shape_cast %614 : vector<2x32xf32> to vector<1x2x32xf32>
    tpu.vector_store %arg6[%617, %c0_266, %c0_267], %620 {strides = array<i32>} : memref<8x2x32xf32, #tpu.memory_space<vmem>>, vector<1x2x32xf32>,
    %c8_i32 = arith.constant 8 : i32
    return
  }
  func.func @transform_0(%arg0: i32) -> (i32, i32, i32) {
    %c0_i32 = arith.constant 0 : i32
    %c0_i32_0 = arith.constant 0 : i32
    %c0_i32_1 = arith.constant 0 : i32
    return %arg0, %c0_i32, %c0_i32_0 : i32, i32, i32
  }
  func.func @transform_1(%arg0: i32) -> (i32, i32, i32) {
    %c0_i32 = arith.constant 0 : i32
    %0 = arith.subi %c0_i32, %arg0 : i32
    %c0_i32_0 = arith.constant 0 : i32
    %c0_i32_1 = arith.constant 0 : i32
    %c0_i32_2 = arith.constant 0 : i32
    return %0, %c0_i32_0, %c0_i32_1 : i32, i32, i32
  }
  func.func @transform_2(%arg0: i32) -> (i32, i32) {
    %c0_i32 = arith.constant 0 : i32
    %c0_i32_0 = arith.constant 0 : i32
    %c0_i32_1 = arith.constant 0 : i32
    return %c0_i32, %c0_i32_0 : i32, i32
  }
  func.func @transform_3(%arg0: i32) -> (i32, i32) {
    %c0_i32 = arith.constant 0 : i32
    %c0_i32_0 = arith.constant 0 : i32
    %c0_i32_1 = arith.constant 0 : i32
    return %c0_i32, %c0_i32_0 : i32, i32
  }
  func.func @transform_4(%arg0: i32) -> (i32, i32, i32) {
    %c0_i32 = arith.constant 0 : i32
    %c0_i32_0 = arith.constant 0 : i32
    %c0_i32_1 = arith.constant 0 : i32
    return %arg0, %c0_i32, %c0_i32_0 : i32, i32, i32
  }
  func.func @transform_5(%arg0: i32) -> (i32, i32, i32) {
    %c0_i32 = arith.constant 0 : i32
    %0 = arith.subi %c0_i32, %arg0 : i32
    %c0_i32_0 = arith.constant 0 : i32
    %c0_i32_1 = arith.constant 0 : i32
    %c0_i32_2 = arith.constant 0 : i32
    return %0, %c0_i32_0, %c0_i32_1 : i32, i32, i32
  }
  func.func @transform_6(%arg0: i32) -> (i32, i32) {
    %c0_i32 = arith.constant 0 : i32
    %c0_i32_0 = arith.constant 0 : i32
    %c0_i32_1 = arith.constant 0 : i32
    return %c0_i32, %c0_i32_0 : i32, i32
  }
  func.func @transform_7(%arg0: i32) -> (i32, i32) {
    %c0_i32 = arith.constant 0 : i32
    %c0_i32_0 = arith.constant 0 : i32
    %c0_i32_1 = arith.constant 0 : i32
    return %c0_i32, %c0_i32_0 : i32, i32
  }
  func.func @transform_8(%arg0: i32) -> (i32, i32) {
    %c0_i32 = arith.constant 0 : i32
    %c0_i32_0 = arith.constant 0 : i32
    %c0_i32_1 = arith.constant 0 : i32
    return %c0_i32, %c0_i32_0 : i32, i32
  }
  func.func @transform_9(%arg0: i32) -> (i32, i32) {
    %c0_i32 = arith.constant 0 : i32
    %c0_i32_0 = arith.constant 0 : i32
    %c0_i32_1 = arith.constant 0 : i32
    return %c0_i32, %c0_i32_0 : i32, i32
  }
}

</mosaic_0001>

<bundles_post_ra>
// kernel: encoder_forward.2
= control target key start
LH: loop header
LB: loop body
LE: loop exit
PB: predicated region body
PF: predicated region fallthrough
CT: control target
= control target key end

     0   :  { %15 = vsyncpa [#allocation3], 0  ;;  %s1660_s12 = smov [#allocation2]   ;;  %s1661_s14 = smov 128   ;;  %s2276_s0 = inlined_call_operand.vmem [shape: f32[8,2,128], index: 0, kind: input, shape index: {}]   ;;  %s2277_s1 = inlined_call_operand.vmem [shape: f32[8,2,128], index: 1, kind: input, shape index: {}]   ;;  %s2278_s2 = inlined_call_operand.vmem [shape: f32[32,128], index: 2, kind: input, shape index: {}]   ;;  %s2279_s3 = inlined_call_operand.hbm [shape: f32[32,128], index: 3, kind: input, shape index: {}]   ;;  %s2280_s4 = inlined_call_operand.vmem [shape: f32[8,2,32], index: 4, kind: output, shape index: {0}]   ;;  %s2281_s5 = inlined_call_operand.vmem [shape: f32[8,2,32], index: 5, kind: output, shape index: {1}]   ;;  %s2282_s6 = inlined_call_operand.vmem [shape: f32[2,32], index: 6, kind: output, shape index: {2}]   ;;  %s2283_s7 = inlined_call_operand.vmem [shape: f32[2,32], index: 7, kind: output, shape index: {3}]   ;;  %s2284_s8 = inlined_call_operand.vmem [shape: f32[2,32], index: 8, kind: output, shape index: {4}]   ;;  %s2285_s9 = inlined_call_operand.vmem [shape: f32[2,32], index: 9, kind: output, shape index: {5}]  }
   0x1   :  { %s34_s11 = sshll.u32 %s2279_s3, 4  ;;  %s36_s13 = sshll.u32 %s1660_s12, 4  ;;  %s35_s11 = int_to_ptr.hbm [resolvable:$true] %s34_s11  ;;  %s37_s13 = int_to_ptr.vmem [resolvable:$true] %s36_s13 }
   0x2   :  { %s1662_s15 = smov 8  }
   0x3   :  { %42 = dma.hbm_to_vmem [thread:$0]  %s35_s11, 512, %s37_s13, [#allocation3], %s1661_s14, %s1661_s14, %s1662_s15  }
   0x4   :  { %1658 = dma.done.wait [#allocation3], 512  }
   0x5   :  { %1659 = vsyncadd [#allocation3], 4294966784  ;;  %vm79_vm0 = vcmask 254976   ;;  %v1663_v0 = vmov 0.0   ;;  %v1739_v1 = vld [vmem:[%s2278_s2 + $0x18] sm:$0xff]  ;;  %v1746_v3 = vld [vmem:[%s2278_s2 + $0x10] sm:$0xff] }
   0x6   :  { %80 = vst.msk [vmem:[%s2282_s6] sm:$0x3] %vm79_vm0, %v1663_v0  ;;  %v1741_v2 = vld [vmem:[#allocation2 + $0x18] sm:$0xff]  ;;  %110 = vmatpush.msra.mxu0 %v1739_v1  ;;  %v1750_v4 = vld [vmem:[#allocation2 + $0x10] sm:$0xff]  ;;  %v1755_v5 = vld [vmem:[%s2278_s2 + $0x8] sm:$0xff]  ;;  %272 = vmatpush.msra.mxu2 %v1739_v1  ;;  %s1664_s12 = smov 32  }
   0x7   :  { %81 = vst.msk [vmem:[%s2283_s7] sm:$0x3] %vm79_vm0, %v1663_v0  ;;  %191 = vmatpush.msra.mxu1 %v1741_v2  ;;  %v1757_v6 = vld [vmem:[#allocation2 + $0x8] sm:$0xff]  ;;  %353 = vmatpush.msra.mxu3 %v1741_v2  ;;  %v1769_v8 = vld [vmem:[%s2278_s2] sm:$0xff]  ;;  %vm94_vm1 = vcmask 261120   ;;  %s1665_s21 = smov 64  }
   0x8   :  { %82 = vst.msk [vmem:[%s2284_s8] sm:$0x3] %vm79_vm0, %v1663_v0  ;;  %111 = vmatpush.msra.mxu0 %v1746_v3  ;;  %v1771_v9 = vld [vmem:[#allocation2] sm:$0xff]  ;;  %273 = vmatpush.msra.mxu2 %v1746_v3  ;;  %v1441_v16 = vld [vmem:[%s2277_s1 + $0xe] sm:$0x3]  ;;  %s1666_s22 = smov 96  }
   0x9   :  { %83 = vst.msk [vmem:[%s2285_s9] sm:$0x3] %vm79_vm0, %v1663_v0  ;;  %192 = vmatpush.msra.mxu1 %v1750_v4  ;;  %354 = vmatpush.msra.mxu3 %v1750_v4  ;;  %v92_v13 = vld [vmem:[%s2276_s0] sm:$0x3] }
   0xa   :  { %112 = vmatpush.msra.mxu0 %v1755_v5  ;;  %274 = vmatpush.msra.mxu2 %v1755_v5 }
   0xb   :  { %193 = vmatpush.msra.mxu1 %v1757_v6  ;;  %355 = vmatpush.msra.mxu3 %v1757_v6 }
   0xc   :  { %113 = vmatpush.msra.mxu0 %v1769_v8  ;;  %275 = vmatpush.msra.mxu2 %v1769_v8 }
   0xd   :  { %v93_v10 = vld [vmem:[%s2282_s6] sm:$0x3]  ;;  %194 = vmatpush.msra.mxu1 %v1771_v9  ;;  %356 = vmatpush.msra.mxu3 %v1771_v9 }
   0xe   :  { %v119_v7 = vld [vmem:[%s2283_s7] sm:$0x3]  ;;  %1439 = vmatmul.msk.f32.vlgmr.msra.gmra.mxu0 %vm94_vm1, %v93_v10  ;;  %596 = vmatpush.msrb.mxu2 %v1739_v1 }
   0xf   :  { %141 = vrot.lane.b32.xlu1 %v119_v7, %s1664_s12  ;;  %v175_v11 = vld [vmem:[%s2284_s8] sm:$0x3]  ;;  %434 = vmatpush.msrb.mxu0 %v1739_v1 }
  0x10   :  { %1442 = vmatmul.msk.f32.vlgmr.msra.gmra.mxu1 %vm94_vm1, %v175_v11  ;;  %v200_v12 = vld [vmem:[%s2285_s9] sm:$0x3]  ;;  %597 = vmatpush.msrb.mxu2 %v1746_v3 }
  0x11   :  { %515 = vmatpush.msrb.mxu1 %v1741_v2  ;;  %435 = vmatpush.msrb.mxu0 %v1746_v3 }
  0x12   :  { %677 = vmatpush.msrb.mxu3 %v1741_v2  ;;  %598 = vmatpush.msrb.mxu2 %v1755_v5 }
  0x13   :  { %516 = vmatpush.msrb.mxu1 %v1750_v4  ;;  %436 = vmatpush.msrb.mxu0 %v1755_v5 }
  0x14   :  { %678 = vmatpush.msrb.mxu3 %v1750_v4  ;;  %599 = vmatpush.msrb.mxu2 %v1769_v8 }
  0x15   :  { %517 = vmatpush.msrb.mxu1 %v1757_v6  ;;  %437 = vmatpush.msrb.mxu0 %v1769_v8 }
  0x16   :  { %679 = vmatpush.msrb.mxu3 %v1757_v6 }
  0x17   :  { %222 = vrot.lane.b32.xlu1 %v200_v12, %s1664_s12  ;;  %518 = vmatpush.msrb.mxu1 %v1771_v9 }
  0x18   :  { %758 = vmatpush.msra.mxu0 %v1739_v1  ;;  %680 = vmatpush.msrb.mxu3 %v1771_v9 }
  0x19   :  { %839 = vmatpush.msra.mxu1 %v1741_v2 }
  0x1a   :  { %759 = vmatpush.msra.mxu0 %v1746_v3 }
  0x1b   :  { %840 = vmatpush.msra.mxu1 %v1750_v4 }
  0x1c   :  { %760 = vmatpush.msra.mxu0 %v1755_v5 }
  0x1d   :  { %841 = vmatpush.msra.mxu1 %v1757_v6 }
  0x1e   :  { %761 = vmatpush.msra.mxu0 %v1769_v8 }
  0x1f   :  { %842 = vmatpush.msra.mxu1 %v1771_v9 }
  0x81   :  { %v142_v51 = vpop.permute.xlu1 %141 }
  0x89   :  { %v223_v55 = vpop.permute.xlu1 %222 }
  0x8b   :  { %v115_v14 = vpop.f32.mrf.mxu0 }
  0x8c   :  { %v118_v15 = vadd.f32 %v115_v14, %v92_v13 }
  0x8d   :  { %v196_v17 = vpop.f32.mrf.mxu1 }
  0x8e   :  { %1506 = vtanh.f32 %v118_v15  ;;  %v199_v18 = vadd.f32 %v1441_v16, %v196_v17  ;;  %v1440_v21 = vmul.f32 -1.442695, %v118_v15  ;;  %v1445_v16 = vld [vmem:[%s2276_s0 + $0x2] sm:$0x3] }
  0x90   :  { %1508 = vtanh.f32 %v199_v18  ;;  %v1443_v22 = vmul.f32 -1.442695, %v199_v18 }
  0x91   :  { %1510 = vpow2.f32 %v1440_v21  ;;  %v1449_v21 = vld [vmem:[%s2277_s1 + $0xc] sm:$0x3] }
  0x92   :  { %1512 = vpow2.f32 %v1443_v22 }
  0x94   :  { %v1507_v19 = vpop.eup %1506 }
  0x95   :  { %146 = vrot.lane.b32.xlu0 %v1507_v19, %s1665_s21 }
  0x96   :  { %v1509_v20 = vpop.eup %1508 }
  0x97   :  { %v1511_v23 = vpop.eup %1510 }
  0x98   :  { %v123_v24 = vadd.f32 1.0, %v1511_v23  ;;  %v1513_v25 = vpop.eup %1512 }
  0x99   :  { %v204_v26 = vadd.f32 1.0, %v1513_v25 }
  0x9a   :  { %1514 = vrcp.f32 %v123_v24  ;;  %v135_v35 = vand.u32 2147483648, %v123_v24  ;;  %vm129_vm3 = vweird.f32 %v123_v24  ;;  %v133_v36 = vand.u32 2147483647, %v123_v24 }
  0x9b   :  { %1516 = vrcp.f32 %v204_v26  ;;  %vm210_vm6 = vweird.f32 %v204_v26  ;;  %v216_v44 = vand.u32 2147483648, %v204_v26  ;;  %v214_v45 = vand.u32 2147483647, %v204_v26 }
  0x9c   :  { %v136_v39 = vor.u32 1.1754944e-38, %v135_v35  ;;  %vm134_vm5 = vcmp.eq.f32.partialorder %v133_v36, 8.507059e+37 }
  0x9d   :  { %227 = vrot.lane.b32.xlu0 %v1509_v20, %s1665_s21  ;;  %v217_v47 = vor.u32 1.1754944e-38, %v216_v44  ;;  %vm215_vm9 = vcmp.eq.f32.partialorder %v214_v45, 8.507059e+37 }
  0xa0   :  { %v1515_v27 = vpop.eup %1514 }
  0xa1   :  { %v125_v28 = vmul.f32 %v1515_v27, %v123_v24  ;;  %v1517_v30 = vpop.eup %1516  ;;  %vm130_vm2 = vweird.f32 %v1515_v27 }
  0xa2   :  { %v206_v32 = vmul.f32 %v1517_v30, %v204_v26  ;;  %vm131_vm4 = vmor %vm129_vm3, %vm130_vm2  ;;  %vm211_vm7 = vweird.f32 %v1517_v30 }
  0xa3   :  { %v126_v29 = vsub.f32 1.0, %v125_v28  ;;  %vm212_vm8 = vmor %vm210_vm6, %vm211_vm7 }
  0xa4   :  { %v207_v34 = vsub.f32 1.0, %v206_v32 }
  0xa5   :  { %v127_v31 = vmul.f32 %v1515_v27, %v126_v29 }
  0xa6   :  { %v208_v38 = vmul.f32 %v1517_v30, %v207_v34 }
  0xa7   :  { %v128_v33 = vadd.f32 %v1515_v27, %v127_v31 }
  0xa8   :  { %v209_v42 = vadd.f32 %v1517_v30, %v208_v38 }
  0xa9   :  { %v132_v37 = vsel %vm131_vm4, %v1515_v27, %v128_v33 }
  0xaa   :  { %v137_v40 = vsel %vm134_vm5, %v136_v39, %v132_v37  ;;  %v213_v46 = vsel %vm212_vm8, %v1517_v30, %v209_v42 }
  0xab   :  { %v218_v48 = vsel %vm215_vm9, %v217_v47, %v213_v46  ;;  %v144_v52 = vmul.f32 %v142_v51, %v137_v40 }
  0xac   :  { %v225_v56 = vmul.f32 %v223_v55, %v218_v48 }
 0x107   :  { %v147_v41 = vpop.permute.xlu0 %146 }
 0x108   :  { %v149_v43 = vmul.f32 %v147_v41, %v137_v40 }
 0x10a   :  { %151 = vrot.lane.b32.xlu2 %v149_v43, %s1664_s12 }
 0x10f   :  { %v228_v49 = vpop.permute.xlu0 %227 }
 0x110   :  { %v230_v50 = vmul.f32 %v228_v49, %v218_v48 }
 0x112   :  { %232 = vrot.lane.b32.xlu2 %v230_v50, %s1664_s12 }
 0x164   :  { %v152_v53 = vpop.permute.xlu2 %151 }
 0x165   :  { %v154_v54 = vadd.f32 %v152_v53, %v144_v52 }
 0x167   :  { %1518 = vtanh.f32 %v154_v54 }
 0x16c   :  { %v233_v57 = vpop.permute.xlu2 %232 }
 0x16d   :  { %v1519_v58 = vpop.eup %1518  ;;  %v235_v59 = vadd.f32 %v233_v57, %v225_v56 }
 0x16e   :  { %157 = vrot.lane.b32.xlu0 %v1519_v58, %s1665_s21 }
 0x16f   :  { %1520 = vtanh.f32 %v235_v59 }
 0x175   :  { %v1521_v60 = vpop.eup %1520 }
 0x176   :  { %238 = vrot.lane.b32.xlu1 %v1521_v60, %s1665_s21 }
 0x17e   :  { %168 = vrot.lane.b32.xlu1 %v154_v54, %s1666_s22 }
 0x1e0   :  { %v158_v61 = vpop.permute.xlu0 %157 }
 0x1e1   :  { %v160_v62 = vmul.f32 %v158_v61, %v137_v40 }
 0x1e3   :  { %162 = vrot.lane.b32.xlu2 %v160_v62, %s1664_s12 }
 0x1e8   :  { %v239_v63 = vpop.permute.xlu1 %238 }
 0x1e9   :  { %v241_v0 = vmul.f32 %v239_v63, %v218_v48 }
 0x1eb   :  { %243 = vrot.lane.b32.xlu0 %v241_v0, %s1664_s12  ;;  %248 = vrot.lane.b32.xlu2 %v235_v59, %s1666_s22 }
 0x1f0   :  { %v169_v7 = vpop.permute.xlu1 %168 }
 0x1f1   :  { %171 = vst.msk [vmem:[%s2283_s7] sm:$0x3] %vm79_vm0, %v169_v7 }
 0x1f8   :  { %v281_v10 = vld [vmem:[%s2283_s7] sm:$0x3] }
 0x1f9   :  { %303 = vrot.lane.b32.xlu2 %v281_v10, %s1664_s12 }
 0x23d   :  { %v163_v11 = vpop.permute.xlu2 %162 }
 0x23e   :  { %166 = vst.msk [vmem:[%s2282_s6] sm:$0x3] %vm79_vm0, %v163_v11 }
 0x23f   :  { %172 = vst.msk [vmem:[%s2280_s4] sm:$0x3] %vm79_vm0, %v163_v11 }
 0x245   :  { %v249_v12 = vpop.permute.xlu2 %248  ;;  %v256_v13 = vld [vmem:[%s2282_s6] sm:$0x3] }
 0x246   :  { %251 = vst.msk [vmem:[%s2285_s9] sm:$0x3] %vm79_vm0, %v249_v12  ;;  %1446 = vmatmul.msk.f32.vlgmr.msra.gmra.mxu2 %vm94_vm1, %v256_v13 }
 0x247   :  { %920 = vmatpush.msra.mxu2 %v1739_v1 }
 0x249   :  { %921 = vmatpush.msra.mxu2 %v1746_v3 }
 0x24b   :  { %922 = vmatpush.msra.mxu2 %v1755_v5 }
 0x24d   :  { %923 = vmatpush.msra.mxu2 %v1769_v8  ;;  %v362_v20 = vld [vmem:[%s2285_s9] sm:$0x3] }
 0x253   :  { %v304_v55 = vpop.permute.xlu2 %303 }
 0x25d   :  { %v244_v14 = vpop.permute.xlu0 %243 }
 0x25e   :  { %246 = vst.msk [vmem:[%s2284_s8] sm:$0x3] %vm79_vm0, %v244_v14 }
 0x25f   :  { %1444 = vst.msk [vmem:[%s2281_s5 + $0xe] sm:$0x3] %vm79_vm0, %v244_v14 }
 0x265   :  { %v337_v15 = vld [vmem:[%s2284_s8] sm:$0x3] }
 0x266   :  { %1450 = vmatmul.msk.f32.vlgmr.msra.gmra.mxu3 %vm94_vm1, %v337_v15 }
 0x267   :  { %1001 = vmatpush.msra.mxu3 %v1741_v2 }
 0x269   :  { %1002 = vmatpush.msra.mxu3 %v1750_v4 }
 0x26b   :  { %1003 = vmatpush.msra.mxu3 %v1757_v6 }
 0x26d   :  { %1004 = vmatpush.msra.mxu3 %v1771_v9 }
 0x2c9   :  { %v277_v17 = vpop.f32.mrf.mxu2 }
 0x2ca   :  { %v280_v18 = vadd.f32 %v1445_v16, %v277_v17 }
 0x2cc   :  { %1522 = vtanh.f32 %v280_v18  ;;  %v1447_v25 = vmul.f32 -1.442695, %v280_v18 }
 0x2d2   :  { %v1523_v19 = vpop.eup %1522 }
 0x2d3   :  { %308 = vrot.lane.b32.xlu0 %v1523_v19, %s1665_s21 }
 0x2db   :  { %384 = vrot.lane.b32.xlu0 %v362_v20, %s1664_s12  ;;  %v1453_v20 = vld [vmem:[%s2276_s0 + $0x4] sm:$0x3] }
 0x2e9   :  { %v358_v22 = vpop.f32.mrf.mxu3 }
 0x2ea   :  { %v361_v23 = vadd.f32 %v1449_v21, %v358_v22 }
 0x2ec   :  { %1524 = vtanh.f32 %v361_v23  ;;  %v1451_v31 = vmul.f32 -1.442695, %v361_v23 }
 0x2ed   :  { %1526 = vpow2.f32 %v1447_v25  ;;  %v1457_v25 = vld [vmem:[%s2277_s1 + $0xa] sm:$0x3] }
 0x2f2   :  { %v1525_v24 = vpop.eup %1524 }
 0x2f3   :  { %389 = vrot.lane.b32.xlu1 %v1525_v24, %s1665_s21  ;;  %v1527_v26 = vpop.eup %1526 }
 0x2f4   :  { %v285_v27 = vadd.f32 1.0, %v1527_v26 }
 0x2f6   :  { %1528 = vrcp.f32 %v285_v27  ;;  %v297_v34 = vand.u32 2147483648, %v285_v27  ;;  %vm291_vm11 = vweird.f32 %v285_v27  ;;  %v295_v35 = vand.u32 2147483647, %v285_v27 }
 0x2f7   :  { %1530 = vpow2.f32 %v1451_v31 }
 0x2f8   :  { %v298_v38 = vor.u32 1.1754944e-38, %v297_v34  ;;  %vm296_vm13 = vcmp.eq.f32.partialorder %v295_v35, 8.507059e+37 }
 0x2fc   :  { %v1529_v28 = vpop.eup %1528 }
 0x2fd   :  { %v287_v29 = vmul.f32 %v1529_v28, %v285_v27  ;;  %vm292_vm10 = vweird.f32 %v1529_v28  ;;  %v1531_v36 = vpop.eup %1530 }
 0x2fe   :  { %vm293_vm12 = vmor %vm291_vm11, %vm292_vm10  ;;  %v366_v39 = vadd.f32 1.0, %v1531_v36 }
 0x2ff   :  { %v288_v30 = vsub.f32 1.0, %v287_v29 }
 0x300   :  { %1532 = vrcp.f32 %v366_v39  ;;  %v378_v48 = vand.u32 2147483648, %v366_v39  ;;  %vm372_vm15 = vweird.f32 %v366_v39  ;;  %v376_v49 = vand.u32 2147483647, %v366_v39 }
 0x301   :  { %v289_v32 = vmul.f32 %v1529_v28, %v288_v30 }
 0x302   :  { %v379_v51 = vor.u32 1.1754944e-38, %v378_v48  ;;  %vm377_vm3 = vcmp.eq.f32.partialorder %v376_v49, 8.507059e+37 }
 0x303   :  { %v290_v33 = vadd.f32 %v1529_v28, %v289_v32 }
 0x305   :  { %v294_v37 = vsel %vm293_vm12, %v1529_v28, %v290_v33 }
 0x306   :  { %v299_v40 = vsel %vm296_vm13, %v298_v38, %v294_v37  ;;  %v1533_v43 = vpop.eup %1532 }
 0x307   :  { %v368_v44 = vmul.f32 %v1533_v43, %v366_v39  ;;  %vm373_vm14 = vweird.f32 %v1533_v43  ;;  %v306_v56 = vmul.f32 %v304_v55, %v299_v40 }
 0x308   :  { %vm374_vm2 = vmor %vm372_vm15, %vm373_vm14 }
 0x309   :  { %v369_v45 = vsub.f32 1.0, %v368_v44 }
 0x30b   :  { %v370_v46 = vmul.f32 %v1533_v43, %v369_v45 }
 0x30d   :  { %v371_v47 = vadd.f32 %v1533_v43, %v370_v46 }
 0x30f   :  { %v375_v50 = vsel %vm374_vm2, %v1533_v43, %v371_v47 }
 0x310   :  { %v380_v52 = vsel %vm377_vm3, %v379_v51, %v375_v50 }
 0x345   :  { %v309_v41 = vpop.permute.xlu0 %308 }
 0x346   :  { %v311_v42 = vmul.f32 %v309_v41, %v299_v40 }
 0x348   :  { %313 = vrot.lane.b32.xlu1 %v311_v42, %s1664_s12 }
 0x34d   :  { %v385_v59 = vpop.permute.xlu0 %384 }
 0x34e   :  { %v387_v60 = vmul.f32 %v385_v59, %v380_v52 }
 0x365   :  { %v390_v53 = vpop.permute.xlu1 %389 }
 0x366   :  { %v392_v54 = vmul.f32 %v390_v53, %v380_v52 }
 0x368   :  { %394 = vrot.lane.b32.xlu2 %v392_v54, %s1664_s12 }
 0x3ba   :  { %v314_v57 = vpop.permute.xlu1 %313 }
 0x3bb   :  { %v316_v58 = vadd.f32 %v314_v57, %v306_v56 }
 0x3bd   :  { %1534 = vtanh.f32 %v316_v58 }
 0x3c2   :  { %v395_v61 = vpop.permute.xlu2 %394 }
 0x3c3   :  { %v1535_v62 = vpop.eup %1534  ;;  %v397_v63 = vadd.f32 %v395_v61, %v387_v60 }
 0x3c4   :  { %319 = vrot.lane.b32.xlu0 %v1535_v62, %s1665_s21 }
 0x3c5   :  { %1536 = vtanh.f32 %v397_v63 }
 0x3cb   :  { %v1537_v0 = vpop.eup %1536 }
 0x3cc   :  { %400 = vrot.lane.b32.xlu1 %v1537_v0, %s1665_s21 }
 0x3d4   :  { %329 = vrot.lane.b32.xlu1 %v316_v58, %s1666_s22 }
 0x436   :  { %v320_v7 = vpop.permute.xlu0 %319 }
 0x437   :  { %v322_v10 = vmul.f32 %v320_v7, %v299_v40 }
 0x439   :  { %324 = vrot.lane.b32.xlu2 %v322_v10, %s1664_s12 }
 0x43e   :  { %v401_v11 = vpop.permute.xlu1 %400 }
 0x43f   :  { %v403_v12 = vmul.f32 %v401_v11, %v380_v52 }
 0x441   :  { %405 = vrot.lane.b32.xlu0 %v403_v12, %s1664_s12  ;;  %410 = vrot.lane.b32.xlu2 %v397_v63, %s1666_s22 }
 0x446   :  { %v330_v13 = vpop.permute.xlu1 %329 }
 0x447   :  { %332 = vst.msk [vmem:[%s2283_s7] sm:$0x3] %vm79_vm0, %v330_v13 }
 0x44e   :  { %v443_v14 = vld [vmem:[%s2283_s7] sm:$0x3] }
 0x44f   :  { %465 = vrot.lane.b32.xlu2 %v443_v14, %s1664_s12 }
 0x493   :  { %v325_v15 = vpop.permute.xlu2 %324 }
 0x494   :  { %327 = vst.msk [vmem:[%s2282_s6] sm:$0x3] %vm79_vm0, %v325_v15 }
 0x495   :  { %1448 = vst.msk [vmem:[%s2280_s4 + $0x2] sm:$0x3] %vm79_vm0, %v325_v15 }
 0x49b   :  { %v411_v16 = vpop.permute.xlu2 %410  ;;  %v418_v17 = vld [vmem:[%s2282_s6] sm:$0x3] }
 0x49c   :  { %413 = vst.msk [vmem:[%s2285_s9] sm:$0x3] %vm79_vm0, %v411_v16  ;;  %1454 = vmatmul.msk.f32.vlgmr.msrb.gmra.mxu0 %vm94_vm1, %v418_v17 }
 0x49d   :  { %1082 = vmatpush.msrb.mxu0 %v1739_v1 }
 0x49f   :  { %1083 = vmatpush.msrb.mxu0 %v1746_v3 }
 0x4a1   :  { %1084 = vmatpush.msrb.mxu0 %v1755_v5 }
 0x4a3   :  { %1085 = vmatpush.msrb.mxu0 %v1769_v8  ;;  %v524_v24 = vld [vmem:[%s2285_s9] sm:$0x3] }
 0x4a9   :  { %v466_v59 = vpop.permute.xlu2 %465 }
 0x4b3   :  { %v406_v18 = vpop.permute.xlu0 %405 }
 0x4b4   :  { %408 = vst.msk [vmem:[%s2284_s8] sm:$0x3] %vm79_vm0, %v406_v18 }
 0x4b5   :  { %1452 = vst.msk [vmem:[%s2281_s5 + $0xc] sm:$0x3] %vm79_vm0, %v406_v18 }
 0x4bb   :  { %v499_v19 = vld [vmem:[%s2284_s8] sm:$0x3] }
 0x4bc   :  { %1458 = vmatmul.msk.f32.vlgmr.msrb.gmra.mxu1 %vm94_vm1, %v499_v19 }
 0x4bd   :  { %1163 = vmatpush.msrb.mxu1 %v1741_v2 }
 0x4bf   :  { %1164 = vmatpush.msrb.mxu1 %v1750_v4 }
 0x4c1   :  { %1165 = vmatpush.msrb.mxu1 %v1757_v6 }
 0x4c3   :  { %1166 = vmatpush.msrb.mxu1 %v1771_v9 }
 0x519   :  { %v439_v21 = vpop.f32.mrf.mxu0 }
 0x51a   :  { %v442_v22 = vadd.f32 %v1453_v20, %v439_v21 }
 0x51c   :  { %1538 = vtanh.f32 %v442_v22  ;;  %v1455_v29 = vmul.f32 -1.442695, %v442_v22 }
 0x522   :  { %v1539_v23 = vpop.eup %1538 }
 0x523   :  { %470 = vrot.lane.b32.xlu0 %v1539_v23, %s1665_s21 }
 0x52b   :  { %546 = vrot.lane.b32.xlu0 %v524_v24, %s1664_s12 }
 0x539   :  { %v520_v26 = vpop.f32.mrf.mxu1 }
 0x53a   :  { %v523_v27 = vadd.f32 %v1457_v25, %v520_v26 }
 0x53c   :  { %1540 = vtanh.f32 %v523_v27  ;;  %v1459_v35 = vmul.f32 -1.442695, %v523_v27 }
 0x53d   :  { %1542 = vpow2.f32 %v1455_v29 }
 0x542   :  { %v1541_v28 = vpop.eup %1540 }
 0x543   :  { %551 = vrot.lane.b32.xlu1 %v1541_v28, %s1665_s21  ;;  %v1543_v30 = vpop.eup %1542 }
 0x544   :  { %v447_v31 = vadd.f32 1.0, %v1543_v30 }
 0x546   :  { %1544 = vrcp.f32 %v447_v31  ;;  %v459_v38 = vand.u32 2147483648, %v447_v31  ;;  %vm453_vm5 = vweird.f32 %v447_v31  ;;  %v457_v39 = vand.u32 2147483647, %v447_v31 }
 0x547   :  { %1546 = vpow2.f32 %v1459_v35 }
 0x548   :  { %v460_v42 = vor.u32 1.1754944e-38, %v459_v38  ;;  %vm458_vm7 = vcmp.eq.f32.partialorder %v457_v39, 8.507059e+37 }
 0x54c   :  { %v1545_v32 = vpop.eup %1544 }
 0x54d   :  { %v449_v33 = vmul.f32 %v1545_v32, %v447_v31  ;;  %vm454_vm4 = vweird.f32 %v1545_v32  ;;  %v1547_v40 = vpop.eup %1546 }
 0x54e   :  { %vm455_vm6 = vmor %vm453_vm5, %vm454_vm4  ;;  %v528_v43 = vadd.f32 1.0, %v1547_v40 }
 0x54f   :  { %v450_v34 = vsub.f32 1.0, %v449_v33 }
 0x550   :  { %1548 = vrcp.f32 %v528_v43  ;;  %v540_v52 = vand.u32 2147483648, %v528_v43  ;;  %vm534_vm9 = vweird.f32 %v528_v43  ;;  %v538_v53 = vand.u32 2147483647, %v528_v43 }
 0x551   :  { %v451_v36 = vmul.f32 %v1545_v32, %v450_v34 }
 0x552   :  { %v541_v55 = vor.u32 1.1754944e-38, %v540_v52  ;;  %vm539_vm11 = vcmp.eq.f32.partialorder %v538_v53, 8.507059e+37 }
 0x553   :  { %v452_v37 = vadd.f32 %v1545_v32, %v451_v36 }
 0x555   :  { %v456_v41 = vsel %vm455_vm6, %v1545_v32, %v452_v37 }
 0x556   :  { %v461_v44 = vsel %vm458_vm7, %v460_v42, %v456_v41  ;;  %v1549_v47 = vpop.eup %1548 }
 0x557   :  { %v530_v48 = vmul.f32 %v1549_v47, %v528_v43  ;;  %vm535_vm8 = vweird.f32 %v1549_v47  ;;  %v468_v60 = vmul.f32 %v466_v59, %v461_v44 }
 0x558   :  { %vm536_vm10 = vmor %vm534_vm9, %vm535_vm8 }
 0x559   :  { %v531_v49 = vsub.f32 1.0, %v530_v48 }
 0x55b   :  { %v532_v50 = vmul.f32 %v1549_v47, %v531_v49 }
 0x55d   :  { %v533_v51 = vadd.f32 %v1549_v47, %v532_v50 }
 0x55f   :  { %v537_v54 = vsel %vm536_vm10, %v1549_v47, %v533_v51 }
 0x560   :  { %v542_v56 = vsel %vm539_vm11, %v541_v55, %v537_v54 }
 0x595   :  { %v471_v45 = vpop.permute.xlu0 %470 }
 0x596   :  { %v473_v46 = vmul.f32 %v471_v45, %v461_v44 }
 0x598   :  { %475 = vrot.lane.b32.xlu1 %v473_v46, %s1664_s12 }
 0x59d   :  { %v547_v63 = vpop.permute.xlu0 %546 }
 0x59e   :  { %v549_v0 = vmul.f32 %v547_v63, %v542_v56 }
 0x5b5   :  { %v552_v57 = vpop.permute.xlu1 %551 }
 0x5b6   :  { %v554_v58 = vmul.f32 %v552_v57, %v542_v56 }
 0x5b8   :  { %556 = vrot.lane.b32.xlu2 %v554_v58, %s1664_s12 }
 0x60a   :  { %v476_v61 = vpop.permute.xlu1 %475 }
 0x60b   :  { %v478_v62 = vadd.f32 %v476_v61, %v468_v60 }
 0x60d   :  { %1550 = vtanh.f32 %v478_v62 }
 0x612   :  { %v557_v7 = vpop.permute.xlu2 %556 }
 0x613   :  { %v1551_v10 = vpop.eup %1550  ;;  %v559_v11 = vadd.f32 %v557_v7, %v549_v0 }
 0x614   :  { %481 = vrot.lane.b32.xlu0 %v1551_v10, %s1665_s21 }
 0x615   :  { %1552 = vtanh.f32 %v559_v11 }
 0x61b   :  { %v1553_v12 = vpop.eup %1552 }
 0x61c   :  { %562 = vrot.lane.b32.xlu1 %v1553_v12, %s1665_s21 }
 0x624   :  { %491 = vrot.lane.b32.xlu1 %v478_v62, %s1666_s22 }
 0x686   :  { %v482_v13 = vpop.permute.xlu0 %481 }
 0x687   :  { %v484_v14 = vmul.f32 %v482_v13, %v461_v44 }
 0x689   :  { %486 = vrot.lane.b32.xlu2 %v484_v14, %s1664_s12 }
 0x68e   :  { %v563_v15 = vpop.permute.xlu1 %562 }
 0x68f   :  { %v565_v16 = vmul.f32 %v563_v15, %v542_v56 }
 0x691   :  { %567 = vrot.lane.b32.xlu0 %v565_v16, %s1664_s12  ;;  %572 = vrot.lane.b32.xlu2 %v559_v11, %s1666_s22 }
 0x696   :  { %v492_v17 = vpop.permute.xlu1 %491 }
 0x697   :  { %494 = vst.msk [vmem:[%s2283_s7] sm:$0x3] %vm79_vm0, %v492_v17 }
 0x69e   :  { %v605_v18 = vld [vmem:[%s2283_s7] sm:$0x3] }
 0x69f   :  { %627 = vrot.lane.b32.xlu2 %v605_v18, %s1664_s12 }
 0x6e3   :  { %v487_v19 = vpop.permute.xlu2 %486 }
 0x6e4   :  { %489 = vst.msk [vmem:[%s2282_s6] sm:$0x3] %vm79_vm0, %v487_v19 }
 0x6e5   :  { %1456 = vst.msk [vmem:[%s2280_s4 + $0x4] sm:$0x3] %vm79_vm0, %v487_v19 }
 0x6eb   :  { %v573_v20 = vpop.permute.xlu2 %572  ;;  %v580_v21 = vld [vmem:[%s2282_s6] sm:$0x3] }
 0x6ec   :  { %575 = vst.msk [vmem:[%s2285_s9] sm:$0x3] %vm79_vm0, %v573_v20  ;;  %1462 = vmatmul.msk.f32.vlgmr.msrb.gmra.mxu2 %vm94_vm1, %v580_v21  ;;  %v1469_v20 = vld [vmem:[%s2276_s0 + $0x8] sm:$0x3] }
 0x6ed   :  { %1244 = vmatpush.msrb.mxu2 %v1739_v1 }
 0x6ef   :  { %1245 = vmatpush.msrb.mxu2 %v1746_v3  ;;  %v1461_v3 = vld [vmem:[%s2276_s0 + $0x6] sm:$0x3] }
 0x6f1   :  { %1246 = vmatpush.msrb.mxu2 %v1755_v5 }
 0x6f3   :  { %1247 = vmatpush.msrb.mxu2 %v1769_v8 }
 0x6f9   :  { %v628_v55 = vpop.permute.xlu2 %627 }
 0x703   :  { %v568_v22 = vpop.permute.xlu0 %567 }
 0x704   :  { %570 = vst.msk [vmem:[%s2284_s8] sm:$0x3] %vm79_vm0, %v568_v22 }
 0x705   :  { %1460 = vst.msk [vmem:[%s2281_s5 + $0xa] sm:$0x3] %vm79_vm0, %v568_v22 }
 0x70b   :  { %v661_v1 = vld [vmem:[%s2284_s8] sm:$0x3] }
 0x70c   :  { %1466 = vmatmul.msk.f32.vlgmr.msrb.gmra.mxu3 %vm94_vm1, %v661_v1 }
 0x70d   :  { %1324 = vmatpush.msrb.mxu3 %v1741_v2  ;;  %v686_v2 = vld [vmem:[%s2285_s9] sm:$0x3] }
 0x70f   :  { %1325 = vmatpush.msrb.mxu3 %v1750_v4  ;;  %v1465_v4 = vld [vmem:[%s2277_s1 + $0x8] sm:$0x3] }
 0x711   :  { %1326 = vmatpush.msrb.mxu3 %v1757_v6 }
 0x713   :  { %1327 = vmatpush.msrb.mxu3 %v1771_v9 }
 0x76f   :  { %v601_v5 = vpop.f32.mrf.mxu2 }
 0x770   :  { %v604_v8 = vadd.f32 %v1461_v3, %v601_v5  ;;  %v1473_v5 = vld [vmem:[%s2277_s1 + $0x6] sm:$0x3] }
 0x772   :  { %1554 = vtanh.f32 %v604_v8  ;;  %v1463_v25 = vmul.f32 -1.442695, %v604_v8 }
 0x778   :  { %v1555_v23 = vpop.eup %1554 }
 0x779   :  { %632 = vrot.lane.b32.xlu0 %v1555_v23, %s1665_s21 }
 0x781   :  { %708 = vrot.lane.b32.xlu0 %v686_v2, %s1664_s12 }
 0x78f   :  { %v682_v6 = vpop.f32.mrf.mxu3 }
 0x790   :  { %v685_v9 = vadd.f32 %v1465_v4, %v682_v6 }
 0x792   :  { %1556 = vtanh.f32 %v685_v9  ;;  %v1467_v31 = vmul.f32 -1.442695, %v685_v9 }
 0x793   :  { %1558 = vpow2.f32 %v1463_v25 }
 0x798   :  { %v1557_v24 = vpop.eup %1556 }
 0x799   :  { %713 = vrot.lane.b32.xlu1 %v1557_v24, %s1665_s21  ;;  %v1559_v26 = vpop.eup %1558 }
 0x79a   :  { %v609_v27 = vadd.f32 1.0, %v1559_v26 }
 0x79c   :  { %1560 = vrcp.f32 %v609_v27  ;;  %v621_v34 = vand.u32 2147483648, %v609_v27  ;;  %vm615_vm13 = vweird.f32 %v609_v27  ;;  %v619_v35 = vand.u32 2147483647, %v609_v27 }
 0x79d   :  { %1562 = vpow2.f32 %v1467_v31 }
 0x79e   :  { %v622_v38 = vor.u32 1.1754944e-38, %v621_v34  ;;  %vm620_vm15 = vcmp.eq.f32.partialorder %v619_v35, 8.507059e+37 }
 0x7a2   :  { %v1561_v28 = vpop.eup %1560 }
 0x7a3   :  { %v611_v29 = vmul.f32 %v1561_v28, %v609_v27  ;;  %vm616_vm12 = vweird.f32 %v1561_v28  ;;  %v1563_v36 = vpop.eup %1562 }
 0x7a4   :  { %vm617_vm14 = vmor %vm615_vm13, %vm616_vm12  ;;  %v690_v39 = vadd.f32 1.0, %v1563_v36 }
 0x7a5   :  { %v612_v30 = vsub.f32 1.0, %v611_v29 }
 0x7a6   :  { %1564 = vrcp.f32 %v690_v39  ;;  %v702_v48 = vand.u32 2147483648, %v690_v39  ;;  %vm696_vm3 = vweird.f32 %v690_v39  ;;  %v700_v49 = vand.u32 2147483647, %v690_v39 }
 0x7a7   :  { %v613_v32 = vmul.f32 %v1561_v28, %v612_v30 }
 0x7a8   :  { %v703_v51 = vor.u32 1.1754944e-38, %v702_v48  ;;  %vm701_vm5 = vcmp.eq.f32.partialorder %v700_v49, 8.507059e+37 }
 0x7a9   :  { %v614_v33 = vadd.f32 %v1561_v28, %v613_v32 }
 0x7ab   :  { %v618_v37 = vsel %vm617_vm14, %v1561_v28, %v614_v33 }
 0x7ac   :  { %v623_v40 = vsel %vm620_vm15, %v622_v38, %v618_v37  ;;  %v1565_v43 = vpop.eup %1564 }
 0x7ad   :  { %v692_v44 = vmul.f32 %v1565_v43, %v690_v39  ;;  %vm697_vm2 = vweird.f32 %v1565_v43  ;;  %v630_v56 = vmul.f32 %v628_v55, %v623_v40 }
 0x7ae   :  { %vm698_vm4 = vmor %vm696_vm3, %vm697_vm2 }
 0x7af   :  { %v693_v45 = vsub.f32 1.0, %v692_v44 }
 0x7b1   :  { %v694_v46 = vmul.f32 %v1565_v43, %v693_v45 }
 0x7b3   :  { %v695_v47 = vadd.f32 %v1565_v43, %v694_v46 }
 0x7b5   :  { %v699_v50 = vsel %vm698_vm4, %v1565_v43, %v695_v47 }
 0x7b6   :  { %v704_v52 = vsel %vm701_vm5, %v703_v51, %v699_v50 }
 0x7eb   :  { %v633_v41 = vpop.permute.xlu0 %632 }
 0x7ec   :  { %v635_v42 = vmul.f32 %v633_v41, %v623_v40 }
 0x7ee   :  { %637 = vrot.lane.b32.xlu1 %v635_v42, %s1664_s12 }
 0x7f3   :  { %v709_v59 = vpop.permute.xlu0 %708 }
 0x7f4   :  { %v711_v60 = vmul.f32 %v709_v59, %v704_v52 }
 0x80b   :  { %v714_v53 = vpop.permute.xlu1 %713 }
 0x80c   :  { %v716_v54 = vmul.f32 %v714_v53, %v704_v52 }
 0x80e   :  { %718 = vrot.lane.b32.xlu2 %v716_v54, %s1664_s12 }
 0x860   :  { %v638_v57 = vpop.permute.xlu1 %637 }
 0x861   :  { %v640_v58 = vadd.f32 %v638_v57, %v630_v56 }
 0x863   :  { %1566 = vtanh.f32 %v640_v58 }
 0x868   :  { %v719_v61 = vpop.permute.xlu2 %718 }
 0x869   :  { %v1567_v62 = vpop.eup %1566  ;;  %v721_v63 = vadd.f32 %v719_v61, %v711_v60 }
 0x86a   :  { %643 = vrot.lane.b32.xlu0 %v1567_v62, %s1665_s21 }
 0x86b   :  { %1568 = vtanh.f32 %v721_v63 }
 0x871   :  { %v1569_v0 = vpop.eup %1568 }
 0x872   :  { %724 = vrot.lane.b32.xlu1 %v1569_v0, %s1665_s21 }
 0x87a   :  { %653 = vrot.lane.b32.xlu1 %v640_v58, %s1666_s22 }
 0x8dc   :  { %v644_v7 = vpop.permute.xlu0 %643 }
 0x8dd   :  { %v646_v10 = vmul.f32 %v644_v7, %v623_v40 }
 0x8df   :  { %648 = vrot.lane.b32.xlu2 %v646_v10, %s1664_s12 }
 0x8e4   :  { %v725_v11 = vpop.permute.xlu1 %724 }
 0x8e5   :  { %v727_v12 = vmul.f32 %v725_v11, %v704_v52 }
 0x8e7   :  { %729 = vrot.lane.b32.xlu0 %v727_v12, %s1664_s12  ;;  %734 = vrot.lane.b32.xlu2 %v721_v63, %s1666_s22 }
 0x8ec   :  { %v654_v13 = vpop.permute.xlu1 %653 }
 0x8ed   :  { %656 = vst.msk [vmem:[%s2283_s7] sm:$0x3] %vm79_vm0, %v654_v13 }
 0x8f4   :  { %v767_v14 = vld [vmem:[%s2283_s7] sm:$0x3] }
 0x8f5   :  { %789 = vrot.lane.b32.xlu2 %v767_v14, %s1664_s12 }
 0x939   :  { %v649_v15 = vpop.permute.xlu2 %648 }
 0x93a   :  { %651 = vst.msk [vmem:[%s2282_s6] sm:$0x3] %vm79_vm0, %v649_v15 }
 0x93b   :  { %1464 = vst.msk [vmem:[%s2280_s4 + $0x6] sm:$0x3] %vm79_vm0, %v649_v15 }
 0x941   :  { %v735_v16 = vpop.permute.xlu2 %734  ;;  %v742_v17 = vld [vmem:[%s2282_s6] sm:$0x3] }
 0x942   :  { %737 = vst.msk [vmem:[%s2285_s9] sm:$0x3] %vm79_vm0, %v735_v16  ;;  %1470 = vmatmul.msk.f32.vlgmr.msra.gmra.mxu0 %vm94_vm1, %v742_v17  ;;  %v1477_v16 = vld [vmem:[%s2276_s0 + $0xa] sm:$0x3] }
 0x949   :  { %v848_v3 = vld [vmem:[%s2285_s9] sm:$0x3] }
 0x94f   :  { %v790_v51 = vpop.permute.xlu2 %789 }
 0x959   :  { %v730_v18 = vpop.permute.xlu0 %729 }
 0x95a   :  { %732 = vst.msk [vmem:[%s2284_s8] sm:$0x3] %vm79_vm0, %v730_v18 }
 0x95b   :  { %1468 = vst.msk [vmem:[%s2281_s5 + $0x8] sm:$0x3] %vm79_vm0, %v730_v18 }
 0x961   :  { %v823_v19 = vld [vmem:[%s2284_s8] sm:$0x3] }
 0x962   :  { %1474 = vmatmul.msk.f32.vlgmr.msra.gmra.mxu1 %vm94_vm1, %v823_v19 }
 0x9bf   :  { %v763_v21 = vpop.f32.mrf.mxu0 }
 0x9c0   :  { %v766_v22 = vadd.f32 %v1469_v20, %v763_v21  ;;  %v1481_v21 = vld [vmem:[%s2277_s1 + $0x4] sm:$0x3] }
 0x9c2   :  { %1570 = vtanh.f32 %v766_v22  ;;  %v1471_v4 = vmul.f32 -1.442695, %v766_v22 }
 0x9c8   :  { %v1571_v1 = vpop.eup %1570 }
 0x9c9   :  { %794 = vrot.lane.b32.xlu0 %v1571_v1, %s1665_s21 }
 0x9d1   :  { %870 = vrot.lane.b32.xlu0 %v848_v3, %s1664_s12 }
 0x9df   :  { %v844_v8 = vpop.f32.mrf.mxu1 }
 0x9e0   :  { %v847_v23 = vadd.f32 %v1473_v5, %v844_v8 }
 0x9e2   :  { %1572 = vtanh.f32 %v847_v23  ;;  %v1475_v27 = vmul.f32 -1.442695, %v847_v23 }
 0x9e3   :  { %1574 = vpow2.f32 %v1471_v4 }
 0x9e8   :  { %v1573_v2 = vpop.eup %1572 }
 0x9e9   :  { %875 = vrot.lane.b32.xlu1 %v1573_v2, %s1665_s21  ;;  %v1575_v6 = vpop.eup %1574 }
 0x9ea   :  { %v771_v9 = vadd.f32 1.0, %v1575_v6 }
 0x9ec   :  { %1576 = vrcp.f32 %v771_v9  ;;  %v783_v30 = vand.u32 2147483648, %v771_v9  ;;  %vm777_vm7 = vweird.f32 %v771_v9  ;;  %v781_v31 = vand.u32 2147483647, %v771_v9 }
 0x9ed   :  { %1578 = vpow2.f32 %v1475_v27 }
 0x9ee   :  { %v784_v34 = vor.u32 1.1754944e-38, %v783_v30  ;;  %vm782_vm9 = vcmp.eq.f32.partialorder %v781_v31, 8.507059e+37 }
 0x9f2   :  { %v1577_v24 = vpop.eup %1576 }
 0x9f3   :  { %v773_v25 = vmul.f32 %v1577_v24, %v771_v9  ;;  %vm778_vm6 = vweird.f32 %v1577_v24  ;;  %v1579_v32 = vpop.eup %1578 }
 0x9f4   :  { %vm779_vm8 = vmor %vm777_vm7, %vm778_vm6  ;;  %v852_v35 = vadd.f32 1.0, %v1579_v32 }
 0x9f5   :  { %v774_v26 = vsub.f32 1.0, %v773_v25 }
 0x9f6   :  { %1580 = vrcp.f32 %v852_v35  ;;  %v864_v44 = vand.u32 2147483648, %v852_v35  ;;  %vm858_vm11 = vweird.f32 %v852_v35  ;;  %v862_v45 = vand.u32 2147483647, %v852_v35 }
 0x9f7   :  { %v775_v28 = vmul.f32 %v1577_v24, %v774_v26 }
 0x9f8   :  { %v865_v47 = vor.u32 1.1754944e-38, %v864_v44  ;;  %vm863_vm13 = vcmp.eq.f32.partialorder %v862_v45, 8.507059e+37 }
 0x9f9   :  { %v776_v29 = vadd.f32 %v1577_v24, %v775_v28 }
 0x9fb   :  { %v780_v33 = vsel %vm779_vm8, %v1577_v24, %v776_v29 }
 0x9fc   :  { %v785_v36 = vsel %vm782_vm9, %v784_v34, %v780_v33  ;;  %v1581_v39 = vpop.eup %1580 }
 0x9fd   :  { %v854_v40 = vmul.f32 %v1581_v39, %v852_v35  ;;  %vm859_vm10 = vweird.f32 %v1581_v39  ;;  %v792_v52 = vmul.f32 %v790_v51, %v785_v36 }
 0x9fe   :  { %vm860_vm12 = vmor %vm858_vm11, %vm859_vm10 }
 0x9ff   :  { %v855_v41 = vsub.f32 1.0, %v854_v40 }
 0xa01   :  { %v856_v42 = vmul.f32 %v1581_v39, %v855_v41 }
 0xa03   :  { %v857_v43 = vadd.f32 %v1581_v39, %v856_v42 }
 0xa05   :  { %v861_v46 = vsel %vm860_vm12, %v1581_v39, %v857_v43 }
 0xa06   :  { %v866_v48 = vsel %vm863_vm13, %v865_v47, %v861_v46 }
 0xa3b   :  { %v795_v37 = vpop.permute.xlu0 %794 }
 0xa3c   :  { %v797_v38 = vmul.f32 %v795_v37, %v785_v36 }
 0xa3e   :  { %799 = vrot.lane.b32.xlu1 %v797_v38, %s1664_s12 }
 0xa43   :  { %v871_v55 = vpop.permute.xlu0 %870 }
 0xa44   :  { %v873_v56 = vmul.f32 %v871_v55, %v866_v48 }
 0xa5b   :  { %v876_v49 = vpop.permute.xlu1 %875 }
 0xa5c   :  { %v878_v50 = vmul.f32 %v876_v49, %v866_v48 }
 0xa5e   :  { %880 = vrot.lane.b32.xlu2 %v878_v50, %s1664_s12 }
 0xab0   :  { %v800_v53 = vpop.permute.xlu1 %799 }
 0xab1   :  { %v802_v54 = vadd.f32 %v800_v53, %v792_v52 }
 0xab3   :  { %1582 = vtanh.f32 %v802_v54 }
 0xab8   :  { %v881_v57 = vpop.permute.xlu2 %880 }
 0xab9   :  { %v1583_v58 = vpop.eup %1582  ;;  %v883_v59 = vadd.f32 %v881_v57, %v873_v56 }
 0xaba   :  { %805 = vrot.lane.b32.xlu0 %v1583_v58, %s1665_s21 }
 0xabb   :  { %1584 = vtanh.f32 %v883_v59 }
 0xac1   :  { %v1585_v60 = vpop.eup %1584 }
 0xac2   :  { %886 = vrot.lane.b32.xlu1 %v1585_v60, %s1665_s21 }
 0xaca   :  { %815 = vrot.lane.b32.xlu1 %v802_v54, %s1666_s22 }
 0xb2c   :  { %v806_v61 = vpop.permute.xlu0 %805 }
 0xb2d   :  { %v808_v62 = vmul.f32 %v806_v61, %v785_v36 }
 0xb2f   :  { %810 = vrot.lane.b32.xlu2 %v808_v62, %s1664_s12 }
 0xb34   :  { %v887_v63 = vpop.permute.xlu1 %886 }
 0xb35   :  { %v889_v0 = vmul.f32 %v887_v63, %v866_v48 }
 0xb37   :  { %891 = vrot.lane.b32.xlu0 %v889_v0, %s1664_s12  ;;  %896 = vrot.lane.b32.xlu2 %v883_v59, %s1666_s22 }
 0xb3c   :  { %v816_v7 = vpop.permute.xlu1 %815 }
 0xb3d   :  { %818 = vst.msk [vmem:[%s2283_s7] sm:$0x3] %vm79_vm0, %v816_v7 }
 0xb44   :  { %v929_v10 = vld [vmem:[%s2283_s7] sm:$0x3] }
 0xb45   :  { %951 = vrot.lane.b32.xlu2 %v929_v10, %s1664_s12 }
 0xb89   :  { %v811_v11 = vpop.permute.xlu2 %810 }
 0xb8a   :  { %813 = vst.msk [vmem:[%s2282_s6] sm:$0x3] %vm79_vm0, %v811_v11 }
 0xb8b   :  { %1472 = vst.msk [vmem:[%s2280_s4 + $0x8] sm:$0x3] %vm79_vm0, %v811_v11 }
 0xb91   :  { %v897_v12 = vpop.permute.xlu2 %896  ;;  %v904_v13 = vld [vmem:[%s2282_s6] sm:$0x3] }
 0xb92   :  { %899 = vst.msk [vmem:[%s2285_s9] sm:$0x3] %vm79_vm0, %v897_v12  ;;  %1478 = vmatmul.msk.f32.vlgmr.msra.gmra.mxu2 %vm94_vm1, %v904_v13  ;;  %v1485_v12 = vld [vmem:[%s2276_s0 + $0xc] sm:$0x3] }
 0xb99   :  { %v1010_v20 = vld [vmem:[%s2285_s9] sm:$0x3] }
 0xb9f   :  { %v952_v47 = vpop.permute.xlu2 %951 }
 0xba9   :  { %v892_v14 = vpop.permute.xlu0 %891 }
 0xbaa   :  { %894 = vst.msk [vmem:[%s2284_s8] sm:$0x3] %vm79_vm0, %v892_v14 }
 0xbab   :  { %1476 = vst.msk [vmem:[%s2281_s5 + $0x6] sm:$0x3] %vm79_vm0, %v892_v14 }
 0xbb1   :  { %v985_v15 = vld [vmem:[%s2284_s8] sm:$0x3] }
 0xbb2   :  { %1482 = vmatmul.msk.f32.vlgmr.msra.gmra.mxu3 %vm94_vm1, %v985_v15 }
 0xc15   :  { %v925_v17 = vpop.f32.mrf.mxu2 }
 0xc16   :  { %v928_v18 = vadd.f32 %v1477_v16, %v925_v17  ;;  %v1489_v17 = vld [vmem:[%s2277_s1 + $0x2] sm:$0x3] }
 0xc18   :  { %1586 = vtanh.f32 %v928_v18  ;;  %v1479_v5 = vmul.f32 -1.442695, %v928_v18 }
 0xc1e   :  { %v1587_v19 = vpop.eup %1586 }
 0xc1f   :  { %956 = vrot.lane.b32.xlu0 %v1587_v19, %s1665_s21 }
 0xc27   :  { %1032 = vrot.lane.b32.xlu0 %v1010_v20, %s1664_s12 }
 0xc35   :  { %v1006_v22 = vpop.f32.mrf.mxu3 }
 0xc36   :  { %v1009_v1 = vadd.f32 %v1481_v21, %v1006_v22 }
 0xc38   :  { %1588 = vtanh.f32 %v1009_v1  ;;  %v1483_v9 = vmul.f32 -1.442695, %v1009_v1 }
 0xc39   :  { %1590 = vpow2.f32 %v1479_v5 }
 0xc3e   :  { %v1589_v3 = vpop.eup %1588 }
 0xc3f   :  { %1037 = vrot.lane.b32.xlu1 %v1589_v3, %s1665_s21  ;;  %v1591_v8 = vpop.eup %1590 }
 0xc40   :  { %v933_v23 = vadd.f32 1.0, %v1591_v8 }
 0xc42   :  { %1592 = vrcp.f32 %v933_v23  ;;  %v945_v26 = vand.u32 2147483648, %v933_v23  ;;  %vm939_vm15 = vweird.f32 %v933_v23  ;;  %v943_v27 = vand.u32 2147483647, %v933_v23 }
 0xc43   :  { %1594 = vpow2.f32 %v1483_v9 }
 0xc44   :  { %v946_v30 = vor.u32 1.1754944e-38, %v945_v26  ;;  %vm944_vm3 = vcmp.eq.f32.partialorder %v943_v27, 8.507059e+37 }
 0xc48   :  { %v1593_v2 = vpop.eup %1592 }
 0xc49   :  { %v935_v4 = vmul.f32 %v1593_v2, %v933_v23  ;;  %vm940_vm14 = vweird.f32 %v1593_v2  ;;  %v1595_v28 = vpop.eup %1594 }
 0xc4a   :  { %vm941_vm2 = vmor %vm939_vm15, %vm940_vm14  ;;  %v1014_v31 = vadd.f32 1.0, %v1595_v28 }
 0xc4b   :  { %v936_v6 = vsub.f32 1.0, %v935_v4 }
 0xc4c   :  { %1596 = vrcp.f32 %v1014_v31  ;;  %v1026_v40 = vand.u32 2147483648, %v1014_v31  ;;  %vm1020_vm5 = vweird.f32 %v1014_v31  ;;  %v1024_v41 = vand.u32 2147483647, %v1014_v31 }
 0xc4d   :  { %v937_v24 = vmul.f32 %v1593_v2, %v936_v6 }
 0xc4e   :  { %v1027_v43 = vor.u32 1.1754944e-38, %v1026_v40  ;;  %vm1025_vm7 = vcmp.eq.f32.partialorder %v1024_v41, 8.507059e+37 }
 0xc4f   :  { %v938_v25 = vadd.f32 %v1593_v2, %v937_v24 }
 0xc51   :  { %v942_v29 = vsel %vm941_vm2, %v1593_v2, %v938_v25 }
 0xc52   :  { %v947_v32 = vsel %vm944_vm3, %v946_v30, %v942_v29  ;;  %v1597_v35 = vpop.eup %1596 }
 0xc53   :  { %v1016_v36 = vmul.f32 %v1597_v35, %v1014_v31  ;;  %vm1021_vm4 = vweird.f32 %v1597_v35  ;;  %v954_v48 = vmul.f32 %v952_v47, %v947_v32 }
 0xc54   :  { %vm1022_vm6 = vmor %vm1020_vm5, %vm1021_vm4 }
 0xc55   :  { %v1017_v37 = vsub.f32 1.0, %v1016_v36 }
 0xc57   :  { %v1018_v38 = vmul.f32 %v1597_v35, %v1017_v37 }
 0xc59   :  { %v1019_v39 = vadd.f32 %v1597_v35, %v1018_v38 }
 0xc5b   :  { %v1023_v42 = vsel %vm1022_vm6, %v1597_v35, %v1019_v39 }
 0xc5c   :  { %v1028_v44 = vsel %vm1025_vm7, %v1027_v43, %v1023_v42 }
 0xc91   :  { %v957_v33 = vpop.permute.xlu0 %956 }
 0xc92   :  { %v959_v34 = vmul.f32 %v957_v33, %v947_v32 }
 0xc94   :  { %961 = vrot.lane.b32.xlu1 %v959_v34, %s1664_s12 }
 0xc99   :  { %v1033_v51 = vpop.permute.xlu0 %1032 }
 0xc9a   :  { %v1035_v52 = vmul.f32 %v1033_v51, %v1028_v44 }
 0xcb1   :  { %v1038_v45 = vpop.permute.xlu1 %1037 }
 0xcb2   :  { %v1040_v46 = vmul.f32 %v1038_v45, %v1028_v44 }
 0xcb4   :  { %1042 = vrot.lane.b32.xlu2 %v1040_v46, %s1664_s12 }
 0xd06   :  { %v962_v49 = vpop.permute.xlu1 %961 }
 0xd07   :  { %v964_v50 = vadd.f32 %v962_v49, %v954_v48 }
 0xd09   :  { %1598 = vtanh.f32 %v964_v50 }
 0xd0e   :  { %v1043_v53 = vpop.permute.xlu2 %1042 }
 0xd0f   :  { %v1599_v54 = vpop.eup %1598  ;;  %v1045_v55 = vadd.f32 %v1043_v53, %v1035_v52 }
 0xd10   :  { %967 = vrot.lane.b32.xlu0 %v1599_v54, %s1665_s21 }
 0xd11   :  { %1600 = vtanh.f32 %v1045_v55 }
 0xd17   :  { %v1601_v56 = vpop.eup %1600 }
 0xd18   :  { %1048 = vrot.lane.b32.xlu1 %v1601_v56, %s1665_s21 }
 0xd20   :  { %977 = vrot.lane.b32.xlu1 %v964_v50, %s1666_s22 }
 0xd82   :  { %v968_v57 = vpop.permute.xlu0 %967 }
 0xd83   :  { %v970_v58 = vmul.f32 %v968_v57, %v947_v32 }
 0xd85   :  { %972 = vrot.lane.b32.xlu2 %v970_v58, %s1664_s12 }
 0xd8a   :  { %v1049_v59 = vpop.permute.xlu1 %1048 }
 0xd8b   :  { %v1051_v60 = vmul.f32 %v1049_v59, %v1028_v44 }
 0xd8d   :  { %1053 = vrot.lane.b32.xlu0 %v1051_v60, %s1664_s12  ;;  %1058 = vrot.lane.b32.xlu2 %v1045_v55, %s1666_s22 }
 0xd92   :  { %v978_v61 = vpop.permute.xlu1 %977 }
 0xd93   :  { %980 = vst.msk [vmem:[%s2283_s7] sm:$0x3] %vm79_vm0, %v978_v61 }
 0xd9a   :  { %v1091_v62 = vld [vmem:[%s2283_s7] sm:$0x3] }
 0xd9b   :  { %1113 = vrot.lane.b32.xlu2 %v1091_v62, %s1664_s12 }
 0xddf   :  { %v973_v63 = vpop.permute.xlu2 %972 }
 0xde0   :  { %975 = vst.msk [vmem:[%s2282_s6] sm:$0x3] %vm79_vm0, %v973_v63 }
 0xde1   :  { %1480 = vst.msk [vmem:[%s2280_s4 + $0xa] sm:$0x3] %vm79_vm0, %v973_v63 }
 0xde7   :  { %v1059_v0 = vpop.permute.xlu2 %1058  ;;  %v1066_v7 = vld [vmem:[%s2282_s6] sm:$0x3] }
 0xde8   :  { %1061 = vst.msk [vmem:[%s2285_s9] sm:$0x3] %vm79_vm0, %v1059_v0  ;;  %1486 = vmatmul.msk.f32.vlgmr.msrb.gmra.mxu0 %vm94_vm1, %v1066_v7  ;;  %v1493_v0 = vld [vmem:[%s2276_s0 + $0xe] sm:$0x3] }
 0xdef   :  { %v1172_v16 = vld [vmem:[%s2285_s9] sm:$0x3] }
 0xdf5   :  { %v1114_v43 = vpop.permute.xlu2 %1113 }
 0xdff   :  { %v1054_v10 = vpop.permute.xlu0 %1053 }
 0xe00   :  { %1056 = vst.msk [vmem:[%s2284_s8] sm:$0x3] %vm79_vm0, %v1054_v10 }
 0xe01   :  { %1484 = vst.msk [vmem:[%s2281_s5 + $0x4] sm:$0x3] %vm79_vm0, %v1054_v10 }
 0xe07   :  { %v1147_v11 = vld [vmem:[%s2284_s8] sm:$0x3] }
 0xe08   :  { %1490 = vmatmul.msk.f32.vlgmr.msrb.gmra.mxu1 %vm94_vm1, %v1147_v11 }
 0xe65   :  { %v1087_v13 = vpop.f32.mrf.mxu0 }
 0xe66   :  { %v1090_v14 = vadd.f32 %v1485_v12, %v1087_v13  ;;  %v1307_v13 = vld [vmem:[%s2277_s1] sm:$0x3] }
 0xe68   :  { %1602 = vtanh.f32 %v1090_v14  ;;  %v1487_v21 = vmul.f32 -1.442695, %v1090_v14 }
 0xe6e   :  { %v1603_v15 = vpop.eup %1602 }
 0xe6f   :  { %1118 = vrot.lane.b32.xlu0 %v1603_v15, %s1665_s21 }
 0xe77   :  { %1194 = vrot.lane.b32.xlu0 %v1172_v16, %s1664_s12 }
 0xe85   :  { %v1168_v18 = vpop.f32.mrf.mxu1 }
 0xe86   :  { %v1171_v19 = vadd.f32 %v1489_v17, %v1168_v18 }
 0xe88   :  { %1604 = vtanh.f32 %v1171_v19  ;;  %v1491_v23 = vmul.f32 -1.442695, %v1171_v19 }
 0xe89   :  { %1606 = vpow2.f32 %v1487_v21 }
 0xe8e   :  { %v1605_v20 = vpop.eup %1604 }
 0xe8f   :  { %1199 = vrot.lane.b32.xlu1 %v1605_v20, %s1665_s21  ;;  %v1607_v22 = vpop.eup %1606 }
 0xe90   :  { %v1095_v1 = vadd.f32 1.0, %v1607_v22 }
 0xe92   :  { %1608 = vrcp.f32 %v1095_v1  ;;  %v1107_v6 = vand.u32 2147483648, %v1095_v1  ;;  %vm1101_vm9 = vweird.f32 %v1095_v1  ;;  %v1105_v9 = vand.u32 2147483647, %v1095_v1 }
 0xe93   :  { %1610 = vpow2.f32 %v1491_v23 }
 0xe94   :  { %v1108_v26 = vor.u32 1.1754944e-38, %v1107_v6  ;;  %vm1106_vm11 = vcmp.eq.f32.partialorder %v1105_v9, 8.507059e+37 }
 0xe98   :  { %v1609_v3 = vpop.eup %1608 }
 0xe99   :  { %v1097_v5 = vmul.f32 %v1609_v3, %v1095_v1  ;;  %vm1102_vm8 = vweird.f32 %v1609_v3  ;;  %v1611_v24 = vpop.eup %1610 }
 0xe9a   :  { %vm1103_vm10 = vmor %vm1101_vm9, %vm1102_vm8  ;;  %v1176_v27 = vadd.f32 1.0, %v1611_v24 }
 0xe9b   :  { %v1098_v8 = vsub.f32 1.0, %v1097_v5 }
 0xe9c   :  { %1612 = vrcp.f32 %v1176_v27  ;;  %v1188_v36 = vand.u32 2147483648, %v1176_v27  ;;  %vm1182_vm13 = vweird.f32 %v1176_v27  ;;  %v1186_v37 = vand.u32 2147483647, %v1176_v27 }
 0xe9d   :  { %v1099_v2 = vmul.f32 %v1609_v3, %v1098_v8 }
 0xe9e   :  { %v1189_v39 = vor.u32 1.1754944e-38, %v1188_v36  ;;  %vm1187_vm15 = vcmp.eq.f32.partialorder %v1186_v37, 8.507059e+37 }
 0xe9f   :  { %v1100_v4 = vadd.f32 %v1609_v3, %v1099_v2 }
 0xea1   :  { %v1104_v25 = vsel %vm1103_vm10, %v1609_v3, %v1100_v4 }
 0xea2   :  { %v1109_v28 = vsel %vm1106_vm11, %v1108_v26, %v1104_v25  ;;  %v1613_v31 = vpop.eup %1612 }
 0xea3   :  { %v1178_v32 = vmul.f32 %v1613_v31, %v1176_v27  ;;  %vm1183_vm12 = vweird.f32 %v1613_v31  ;;  %v1116_v44 = vmul.f32 %v1114_v43, %v1109_v28 }
 0xea4   :  { %vm1184_vm14 = vmor %vm1182_vm13, %vm1183_vm12 }
 0xea5   :  { %v1179_v33 = vsub.f32 1.0, %v1178_v32 }
 0xea7   :  { %v1180_v34 = vmul.f32 %v1613_v31, %v1179_v33 }
 0xea9   :  { %v1181_v35 = vadd.f32 %v1613_v31, %v1180_v34 }
 0xeab   :  { %v1185_v38 = vsel %vm1184_vm14, %v1613_v31, %v1181_v35 }
 0xeac   :  { %v1190_v40 = vsel %vm1187_vm15, %v1189_v39, %v1185_v38 }
 0xee1   :  { %v1119_v29 = vpop.permute.xlu0 %1118 }
 0xee2   :  { %v1121_v30 = vmul.f32 %v1119_v29, %v1109_v28 }
 0xee4   :  { %1123 = vrot.lane.b32.xlu1 %v1121_v30, %s1664_s12 }
 0xee9   :  { %v1195_v47 = vpop.permute.xlu0 %1194 }
 0xeea   :  { %v1197_v48 = vmul.f32 %v1195_v47, %v1190_v40 }
 0xf01   :  { %v1200_v41 = vpop.permute.xlu1 %1199 }
 0xf02   :  { %v1202_v42 = vmul.f32 %v1200_v41, %v1190_v40 }
 0xf04   :  { %1204 = vrot.lane.b32.xlu2 %v1202_v42, %s1664_s12 }
 0xf56   :  { %v1124_v45 = vpop.permute.xlu1 %1123 }
 0xf57   :  { %v1126_v46 = vadd.f32 %v1124_v45, %v1116_v44 }
 0xf59   :  { %1614 = vtanh.f32 %v1126_v46 }
 0xf5e   :  { %v1205_v49 = vpop.permute.xlu2 %1204 }
 0xf5f   :  { %v1615_v50 = vpop.eup %1614  ;;  %v1207_v51 = vadd.f32 %v1205_v49, %v1197_v48 }
 0xf60   :  { %1129 = vrot.lane.b32.xlu0 %v1615_v50, %s1665_s21 }
 0xf61   :  { %1616 = vtanh.f32 %v1207_v51 }
 0xf67   :  { %v1617_v52 = vpop.eup %1616 }
 0xf68   :  { %1210 = vrot.lane.b32.xlu1 %v1617_v52, %s1665_s21 }
 0xf70   :  { %1139 = vrot.lane.b32.xlu1 %v1126_v46, %s1666_s22 }
 0xfd2   :  { %v1130_v53 = vpop.permute.xlu0 %1129 }
 0xfd3   :  { %v1132_v54 = vmul.f32 %v1130_v53, %v1109_v28 }
 0xfd5   :  { %1134 = vrot.lane.b32.xlu2 %v1132_v54, %s1664_s12 }
 0xfda   :  { %v1211_v55 = vpop.permute.xlu1 %1210 }
 0xfdb   :  { %v1213_v56 = vmul.f32 %v1211_v55, %v1190_v40 }
 0xfdd   :  { %1215 = vrot.lane.b32.xlu0 %v1213_v56, %s1664_s12  ;;  %1220 = vrot.lane.b32.xlu2 %v1207_v51, %s1666_s22 }
 0xfe2   :  { %v1140_v57 = vpop.permute.xlu1 %1139 }
 0xfe3   :  { %1142 = vst.msk [vmem:[%s2283_s7] sm:$0x3] %vm79_vm0, %v1140_v57 }
 0xfea   :  { %v1253_v58 = vld [vmem:[%s2283_s7] sm:$0x3] }
 0xfeb   :  { %1275 = vrot.lane.b32.xlu2 %v1253_v58, %s1664_s12 }
0x102f   :  { %v1135_v59 = vpop.permute.xlu2 %1134 }
0x1030   :  { %1137 = vst.msk [vmem:[%s2282_s6] sm:$0x3] %vm79_vm0, %v1135_v59 }
0x1031   :  { %1488 = vst.msk [vmem:[%s2280_s4 + $0xc] sm:$0x3] %vm79_vm0, %v1135_v59 }
0x1037   :  { %v1221_v60 = vpop.permute.xlu2 %1220  ;;  %v1228_v61 = vld [vmem:[%s2282_s6] sm:$0x3] }
0x1038   :  { %1223 = vst.msk [vmem:[%s2285_s9] sm:$0x3] %vm79_vm0, %v1221_v60  ;;  %1494 = vmatmul.msk.f32.vlgmr.msrb.gmra.mxu2 %vm94_vm1, %v1228_v61 }
0x103f   :  { %v1333_v12 = vld [vmem:[%s2285_s9] sm:$0x3] }
0x1045   :  { %v1276_v39 = vpop.permute.xlu2 %1275 }
0x104f   :  { %v1216_v62 = vpop.permute.xlu0 %1215 }
0x1050   :  { %1218 = vst.msk [vmem:[%s2284_s8] sm:$0x3] %vm79_vm0, %v1216_v62 }
0x1051   :  { %1492 = vst.msk [vmem:[%s2281_s5 + $0x2] sm:$0x3] %vm79_vm0, %v1216_v62 }
0x1057   :  { %v1308_v63 = vld [vmem:[%s2284_s8] sm:$0x3] }
0x1058   :  { %1497 = vmatmul.msk.f32.vlgmr.msrb.gmra.mxu3 %vm94_vm1, %v1308_v63 }
0x10bb   :  { %v1249_v7 = vpop.f32.mrf.mxu2 }
0x10bc   :  { %v1252_v10 = vadd.f32 %v1493_v0, %v1249_v7 }
0x10be   :  { %1618 = vtanh.f32 %v1252_v10  ;;  %v1495_v17 = vmul.f32 -1.442695, %v1252_v10 }
0x10c4   :  { %v1619_v11 = vpop.eup %1618 }
0x10c5   :  { %1280 = vrot.lane.b32.xlu0 %v1619_v11, %s1665_s21 }
0x10cd   :  { %1355 = vrot.lane.b32.xlu0 %v1333_v12, %s1664_s12 }
0x10db   :  { %v1329_v14 = vpop.f32.mrf.mxu3 }
0x10dc   :  { %v1332_v15 = vadd.f32 %v1329_v14, %v1307_v13 }
0x10de   :  { %1620 = vtanh.f32 %v1332_v15  ;;  %v1498_v1 = vmul.f32 -1.442695, %v1332_v15 }
0x10df   :  { %1622 = vpow2.f32 %v1495_v17 }
0x10e4   :  { %v1621_v16 = vpop.eup %1620 }
0x10e5   :  { %1360 = vrot.lane.b32.xlu1 %v1621_v16, %s1665_s21  ;;  %v1623_v18 = vpop.eup %1622 }
0x10e6   :  { %v1257_v19 = vadd.f32 1.0, %v1623_v18 }
0x10e8   :  { %1624 = vrcp.f32 %v1257_v19  ;;  %v1269_v8 = vand.u32 2147483648, %v1257_v19  ;;  %vm1263_vm2 = vweird.f32 %v1257_v19  ;;  %v1267_v23 = vand.u32 2147483647, %v1257_v19 }
0x10e9   :  { %1626 = vpow2.f32 %v1498_v1 }
0x10ea   :  { %v1270_v6 = vor.u32 1.1754944e-38, %v1269_v8  ;;  %vm1268_vm4 = vcmp.eq.f32.partialorder %v1267_v23, 8.507059e+37 }
0x10ee   :  { %v1625_v20 = vpop.eup %1624 }
0x10ef   :  { %v1259_v21 = vmul.f32 %v1625_v20, %v1257_v19  ;;  %vm1264_vm1 = vweird.f32 %v1625_v20  ;;  %v1627_v2 = vpop.eup %1626 }
0x10f0   :  { %vm1265_vm3 = vmor %vm1263_vm2, %vm1264_vm1  ;;  %v1337_v9 = vadd.f32 1.0, %v1627_v2 }
0x10f1   :  { %v1260_v22 = vsub.f32 1.0, %v1259_v21 }
0x10f2   :  { %1628 = vrcp.f32 %v1337_v9  ;;  %v1349_v32 = vand.u32 2147483648, %v1337_v9  ;;  %vm1343_vm6 = vweird.f32 %v1337_v9  ;;  %v1347_v33 = vand.u32 2147483647, %v1337_v9 }
0x10f3   :  { %v1261_v3 = vmul.f32 %v1625_v20, %v1260_v22 }
0x10f4   :  { %v1350_v35 = vor.u32 1.1754944e-38, %v1349_v32  ;;  %vm1348_vm8 = vcmp.eq.f32.partialorder %v1347_v33, 8.507059e+37 }
0x10f5   :  { %v1262_v5 = vadd.f32 %v1625_v20, %v1261_v3 }
0x10f7   :  { %v1266_v4 = vsel %vm1265_vm3, %v1625_v20, %v1262_v5 }
0x10f8   :  { %v1271_v24 = vsel %vm1268_vm4, %v1270_v6, %v1266_v4  ;;  %v1629_v27 = vpop.eup %1628 }
0x10f9   :  { %v1339_v28 = vmul.f32 %v1629_v27, %v1337_v9  ;;  %vm1344_vm5 = vweird.f32 %v1629_v27  ;;  %v1278_v40 = vmul.f32 %v1276_v39, %v1271_v24 }
0x10fa   :  { %vm1345_vm7 = vmor %vm1343_vm6, %vm1344_vm5 }
0x10fb   :  { %v1340_v29 = vsub.f32 1.0, %v1339_v28 }
0x10fd   :  { %v1341_v30 = vmul.f32 %v1629_v27, %v1340_v29 }
0x10ff   :  { %v1342_v31 = vadd.f32 %v1629_v27, %v1341_v30 }
0x1101   :  { %v1346_v34 = vsel %vm1345_vm7, %v1629_v27, %v1342_v31 }
0x1102   :  { %v1351_v36 = vsel %vm1348_vm8, %v1350_v35, %v1346_v34 }
0x1137   :  { %v1281_v25 = vpop.permute.xlu0 %1280 }
0x1138   :  { %v1283_v26 = vmul.f32 %v1281_v25, %v1271_v24 }
0x113a   :  { %1285 = vrot.lane.b32.xlu1 %v1283_v26, %s1664_s12 }
0x113f   :  { %v1356_v43 = vpop.permute.xlu0 %1355 }
0x1140   :  { %v1358_v44 = vmul.f32 %v1356_v43, %v1351_v36 }
0x1157   :  { %v1361_v37 = vpop.permute.xlu1 %1360 }
0x1158   :  { %v1363_v38 = vmul.f32 %v1361_v37, %v1351_v36 }
0x115a   :  { %1365 = vrot.lane.b32.xlu2 %v1363_v38, %s1664_s12 }
0x11ac   :  { %v1286_v41 = vpop.permute.xlu1 %1285 }
0x11ad   :  { %v1288_v42 = vadd.f32 %v1286_v41, %v1278_v40 }
0x11af   :  { %1630 = vtanh.f32 %v1288_v42 }
0x11b4   :  { %v1366_v45 = vpop.permute.xlu2 %1365 }
0x11b5   :  { %v1631_v46 = vpop.eup %1630  ;;  %v1368_v47 = vadd.f32 %v1366_v45, %v1358_v44 }
0x11b6   :  { %1291 = vrot.lane.b32.xlu0 %v1631_v46, %s1665_s21 }
0x11b7   :  { %1632 = vtanh.f32 %v1368_v47 }
0x11bd   :  { %v1633_v48 = vpop.eup %1632 }
0x11be   :  { %1301 = vrot.lane.b32.xlu0 %v1288_v42, %s1666_s22  ;;  %1371 = vrot.lane.b32.xlu1 %v1633_v48, %s1665_s21 }
0x1228   :  { %v1292_v49 = vpop.permute.xlu0 %1291 }
0x1229   :  { %v1294_v50 = vmul.f32 %v1292_v49, %v1271_v24 }
0x122b   :  { %1296 = vrot.lane.b32.xlu2 %v1294_v50, %s1664_s12 }
0x1230   :  { %v1372_v51 = vpop.permute.xlu1 %1371  ;;  %v1302_v52 = vpop.permute.xlu0 %1301 }
0x1231   :  { %v1374_v53 = vmul.f32 %v1372_v51, %v1351_v36  ;;  %1304 = vst.msk [vmem:[%s2283_s7] sm:$0x3] %vm79_vm0, %v1302_v52 }
0x1233   :  { %1376 = vrot.lane.b32.xlu1 %v1374_v53, %s1664_s12  ;;  %1381 = vrot.lane.b32.xlu2 %v1368_v47, %s1666_s22 }
0x1285   :  { %v1297_v54 = vpop.permute.xlu2 %1296 }
0x1286   :  { %1299 = vst.msk [vmem:[%s2282_s6] sm:$0x3] %vm79_vm0, %v1297_v54 }
0x1287   :  { %1496 = vst.msk [vmem:[%s2280_s4 + $0xe] sm:$0x3] %vm79_vm0, %v1297_v54 }
0x128d   :  { %v1382_v55 = vpop.permute.xlu2 %1381 }
0x128e   :  { %1384 = vst.msk [vmem:[%s2285_s9] sm:$0x3] %vm79_vm0, %v1382_v55 }
0x12a5   :  { %v1377_v56 = vpop.permute.xlu1 %1376 }
0x12a6   :  { %1379 = vst.msk [vmem:[%s2284_s8] sm:$0x3] %vm79_vm0, %v1377_v56 }
0x12a7   :  { %1385 = vst.msk [vmem:[%s2281_s5] sm:$0x3] %vm79_vm0, %v1377_v56 }
0x12a8   :  { %1424 = vsyncpa [#allocation3], 1 }

// kernel: encoder_forward.3
= control target key start
LH: loop header
LB: loop body
LE: loop exit
PB: predicated region body
PF: predicated region fallthrough
CT: control target
= control target key end

     0   :  { %15 = vsyncpa [#allocation3], 0  ;;  %vm53_vm0 = vcmask 254976   ;;  %v1657_v4 = vmov 0.0   ;;  %s2244_s0 = inlined_call_operand.vmem [shape: f32[8,2,128], index: 0, kind: input, shape index: {}]   ;;  %s2245_s1 = inlined_call_operand.vmem [shape: f32[8,2,128], index: 1, kind: input, shape index: {}]   ;;  %s2246_s2 = inlined_call_operand.vmem [shape: f32[32,128], index: 2, kind: input, shape index: {}]   ;;  %s2247_s3 = inlined_call_operand.vmem [shape: f32[32,128], index: 3, kind: input, shape index: {}]   ;;  %s2248_s4 = inlined_call_operand.hbm [shape: f32[8,2,32], index: 4, kind: output, shape index: {0}]   ;;  %s2249_s5 = inlined_call_operand.hbm [shape: f32[8,2,32], index: 5, kind: output, shape index: {1}]   ;;  %s2250_s6 = inlined_call_operand.vmem [shape: f32[2,32], index: 6, kind: output, shape index: {2}]   ;;  %s2251_s7 = inlined_call_operand.vmem [shape: f32[2,32], index: 7, kind: output, shape index: {3}]   ;;  %s2252_s8 = inlined_call_operand.vmem [shape: f32[2,32], index: 8, kind: output, shape index: {4}]   ;;  %s2253_s9 = inlined_call_operand.vmem [shape: f32[2,32], index: 9, kind: output, shape index: {5}]  }
   0x1   :  { %v1717_v0 = vld [vmem:[%s2246_s2 + $0x18] sm:$0xff]  ;;  %v1727_v2 = vld [vmem:[%s2246_s2 + $0x10] sm:$0xff]  ;;  %54 = vst.msk [vmem:[%s2250_s6] sm:$0x3] %vm53_vm0, %v1657_v4  ;;  %v1743_v5 = vld [vmem:[%s2246_s2 + $0x8] sm:$0xff] }
   0x2   :  { %v1722_v1 = vld [vmem:[%s2247_s3 + $0x18] sm:$0xff]  ;;  %84 = vmatpush.msra.mxu0 %v1717_v0  ;;  %v1734_v3 = vld [vmem:[%s2247_s3 + $0x10] sm:$0xff]  ;;  %v1748_v6 = vld [vmem:[%s2247_s3 + $0x8] sm:$0xff]  ;;  %55 = vst.msk [vmem:[%s2251_s7] sm:$0x3] %vm53_vm0, %v1657_v4  ;;  %246 = vmatpush.msra.mxu2 %v1717_v0 }
   0x3   :  { %165 = vmatpush.msra.mxu1 %v1722_v1  ;;  %327 = vmatpush.msra.mxu3 %v1722_v1  ;;  %56 = vst.msk [vmem:[%s2252_s8] sm:$0x3] %vm53_vm0, %v1657_v4 }
   0x4   :  { %85 = vmatpush.msra.mxu0 %v1727_v2 }
   0x5   :  { %166 = vmatpush.msra.mxu1 %v1734_v3 }
   0x6   :  { %16 = vsyncpa [#allocation5], 0  ;;  %v1765_v7 = vld [vmem:[%s2246_s2] sm:$0xff]  ;;  %57 = vst.msk [vmem:[%s2253_s9] sm:$0x3] %vm53_vm0, %v1657_v4  ;;  %247 = vmatpush.msra.mxu2 %v1727_v2  ;;  %328 = vmatpush.msra.mxu3 %v1734_v3  ;;  %vm68_vm1 = vcmask 261120  }
   0x7   :  { %v1770_v8 = vld [vmem:[%s2247_s3] sm:$0xff]  ;;  %86 = vmatpush.msra.mxu0 %v1743_v5  ;;  %167 = vmatpush.msra.mxu1 %v1748_v6  ;;  %s1658_s16 = smov 32   ;;  %v1426_v16 = vld [vmem:[%s2245_s1 + $0xe] sm:$0x3]  ;;  %s1659_s23 = smov 64  }
   0x8   :  { %248 = vmatpush.msra.mxu2 %v1743_v5  ;;  %329 = vmatpush.msra.mxu3 %v1748_v6  ;;  %v67_v9 = vld [vmem:[%s2250_s6] sm:$0x3]  ;;  %s1660_s24 = smov 96   ;;  %s1661_s25 = smov [#allocation2]  }
   0x9   :  { %87 = vmatpush.msra.mxu0 %v1765_v7  ;;  %168 = vmatpush.msra.mxu1 %v1770_v8  ;;  %v93_v10 = vld [vmem:[%s2251_s7] sm:$0x3]  ;;  %s1366_s28 = sshll.u32 %s2248_s4, 4  ;;  %s1663_s4 = smov [#allocation4]   ;;  %s1367_s28 = int_to_ptr.hbm [resolvable:$true] %s1366_s28 }
   0xa   :  { %249 = vmatpush.msra.mxu2 %v1765_v7  ;;  %330 = vmatpush.msra.mxu3 %v1770_v8  ;;  %v149_v11 = vld [vmem:[%s2252_s8] sm:$0x3]  ;;  %s1381_s11 = sshll.u32 %s1663_s4, 4  ;;  %s1383_s12 = sshll.u32 %s2249_s5, 4  ;;  %s1382_s11 = int_to_ptr.vmem [resolvable:$true] %s1381_s11  ;;  %s1384_s12 = int_to_ptr.hbm [resolvable:$true] %s1383_s12 }
   0xb   :  { %1424 = vmatmul.msk.f32.vlgmr.msra.gmra.mxu0 %vm68_vm1, %v67_v9  ;;  %489 = vmatpush.msrb.mxu1 %v1722_v1  ;;  %v66_v13 = vld [vmem:[%s2244_s0] sm:$0x3] }
   0xc   :  { %115 = vrot.lane.b32.xlu1 %v93_v10, %s1658_s16  ;;  %408 = vmatpush.msrb.mxu0 %v1717_v0 }
   0xd   :  { %1427 = vmatmul.msk.f32.vlgmr.msra.gmra.mxu1 %vm68_vm1, %v149_v11  ;;  %570 = vmatpush.msrb.mxu2 %v1717_v0  ;;  %v174_v12 = vld [vmem:[%s2253_s9] sm:$0x3] }
   0xe   :  { %409 = vmatpush.msrb.mxu0 %v1727_v2  ;;  %490 = vmatpush.msrb.mxu1 %v1734_v3 }
   0xf   :  { %571 = vmatpush.msrb.mxu2 %v1727_v2  ;;  %651 = vmatpush.msrb.mxu3 %v1722_v1 }
  0x10   :  { %410 = vmatpush.msrb.mxu0 %v1743_v5  ;;  %491 = vmatpush.msrb.mxu1 %v1748_v6 }
  0x11   :  { %572 = vmatpush.msrb.mxu2 %v1743_v5  ;;  %652 = vmatpush.msrb.mxu3 %v1734_v3 }
  0x12   :  { %411 = vmatpush.msrb.mxu0 %v1765_v7  ;;  %492 = vmatpush.msrb.mxu1 %v1770_v8 }
  0x13   :  { %573 = vmatpush.msrb.mxu2 %v1765_v7  ;;  %653 = vmatpush.msrb.mxu3 %v1748_v6 }
  0x14   :  { %196 = vrot.lane.b32.xlu1 %v174_v12, %s1658_s16  ;;  %732 = vmatpush.msra.mxu0 %v1717_v0 }
  0x15   :  { %654 = vmatpush.msrb.mxu3 %v1770_v8  ;;  %813 = vmatpush.msra.mxu1 %v1722_v1 }
  0x16   :  { %733 = vmatpush.msra.mxu0 %v1727_v2 }
  0x17   :  { %814 = vmatpush.msra.mxu1 %v1734_v3 }
  0x18   :  { %734 = vmatpush.msra.mxu0 %v1743_v5 }
  0x19   :  { %815 = vmatpush.msra.mxu1 %v1748_v6 }
  0x1a   :  { %735 = vmatpush.msra.mxu0 %v1765_v7 }
  0x1b   :  { %816 = vmatpush.msra.mxu1 %v1770_v8 }
  0x7e   :  { %v116_v51 = vpop.permute.xlu1 %115 }
  0x86   :  { %v197_v55 = vpop.permute.xlu1 %196 }
  0x88   :  { %v89_v14 = vpop.f32.mrf.mxu0 }
  0x89   :  { %v92_v15 = vadd.f32 %v89_v14, %v66_v13 }
  0x8a   :  { %v170_v17 = vpop.f32.mrf.mxu1 }
  0x8b   :  { %1477 = vtanh.f32 %v92_v15  ;;  %v173_v18 = vadd.f32 %v1426_v16, %v170_v17  ;;  %v1425_v21 = vmul.f32 -1.442695, %v92_v15  ;;  %v1429_v16 = vld [vmem:[%s2244_s0 + $0x2] sm:$0x3] }
  0x8d   :  { %1479 = vtanh.f32 %v173_v18  ;;  %v1428_v22 = vmul.f32 -1.442695, %v173_v18 }
  0x8e   :  { %1481 = vpow2.f32 %v1425_v21  ;;  %v1432_v21 = vld [vmem:[%s2245_s1 + $0xc] sm:$0x3] }
  0x8f   :  { %1483 = vpow2.f32 %v1428_v22 }
  0x91   :  { %v1478_v19 = vpop.eup %1477 }
  0x92   :  { %120 = vrot.lane.b32.xlu0 %v1478_v19, %s1659_s23 }
  0x93   :  { %v1480_v20 = vpop.eup %1479 }
  0x94   :  { %v1482_v23 = vpop.eup %1481 }
  0x95   :  { %v97_v24 = vadd.f32 1.0, %v1482_v23  ;;  %v1484_v25 = vpop.eup %1483 }
  0x96   :  { %v178_v26 = vadd.f32 1.0, %v1484_v25 }
  0x97   :  { %1485 = vrcp.f32 %v97_v24  ;;  %v109_v35 = vand.u32 2147483648, %v97_v24  ;;  %vm103_vm3 = vweird.f32 %v97_v24  ;;  %v107_v36 = vand.u32 2147483647, %v97_v24 }
  0x98   :  { %1487 = vrcp.f32 %v178_v26  ;;  %vm184_vm6 = vweird.f32 %v178_v26  ;;  %v190_v44 = vand.u32 2147483648, %v178_v26  ;;  %v188_v45 = vand.u32 2147483647, %v178_v26 }
  0x99   :  { %v110_v39 = vor.u32 1.1754944e-38, %v109_v35  ;;  %vm108_vm5 = vcmp.eq.f32.partialorder %v107_v36, 8.507059e+37 }
  0x9a   :  { %201 = vrot.lane.b32.xlu0 %v1480_v20, %s1659_s23  ;;  %v191_v47 = vor.u32 1.1754944e-38, %v190_v44  ;;  %vm189_vm9 = vcmp.eq.f32.partialorder %v188_v45, 8.507059e+37 }
  0x9d   :  { %v1486_v27 = vpop.eup %1485 }
  0x9e   :  { %v99_v28 = vmul.f32 %v1486_v27, %v97_v24  ;;  %v1488_v30 = vpop.eup %1487  ;;  %vm104_vm2 = vweird.f32 %v1486_v27 }
  0x9f   :  { %v180_v32 = vmul.f32 %v1488_v30, %v178_v26  ;;  %vm105_vm4 = vmor %vm103_vm3, %vm104_vm2  ;;  %vm185_vm7 = vweird.f32 %v1488_v30 }
  0xa0   :  { %v100_v29 = vsub.f32 1.0, %v99_v28  ;;  %vm186_vm8 = vmor %vm184_vm6, %vm185_vm7 }
  0xa1   :  { %v181_v34 = vsub.f32 1.0, %v180_v32 }
  0xa2   :  { %v101_v31 = vmul.f32 %v1486_v27, %v100_v29 }
  0xa3   :  { %v182_v38 = vmul.f32 %v1488_v30, %v181_v34 }
  0xa4   :  { %v102_v33 = vadd.f32 %v1486_v27, %v101_v31 }
  0xa5   :  { %v183_v42 = vadd.f32 %v1488_v30, %v182_v38 }
  0xa6   :  { %v106_v37 = vsel %vm105_vm4, %v1486_v27, %v102_v33 }
  0xa7   :  { %v111_v40 = vsel %vm108_vm5, %v110_v39, %v106_v37  ;;  %v187_v46 = vsel %vm186_vm8, %v1488_v30, %v183_v42 }
  0xa8   :  { %v192_v48 = vsel %vm189_vm9, %v191_v47, %v187_v46  ;;  %v118_v52 = vmul.f32 %v116_v51, %v111_v40 }
  0xa9   :  { %v199_v56 = vmul.f32 %v197_v55, %v192_v48 }
 0x104   :  { %v121_v41 = vpop.permute.xlu0 %120 }
 0x105   :  { %v123_v43 = vmul.f32 %v121_v41, %v111_v40 }
 0x107   :  { %125 = vrot.lane.b32.xlu2 %v123_v43, %s1658_s16 }
 0x10c   :  { %v202_v49 = vpop.permute.xlu0 %201 }
 0x10d   :  { %v204_v50 = vmul.f32 %v202_v49, %v192_v48 }
 0x10f   :  { %206 = vrot.lane.b32.xlu2 %v204_v50, %s1658_s16 }
 0x161   :  { %v126_v53 = vpop.permute.xlu2 %125 }
 0x162   :  { %v128_v54 = vadd.f32 %v126_v53, %v118_v52 }
 0x164   :  { %1489 = vtanh.f32 %v128_v54 }
 0x169   :  { %v207_v57 = vpop.permute.xlu2 %206 }
 0x16a   :  { %v1490_v58 = vpop.eup %1489  ;;  %v209_v59 = vadd.f32 %v207_v57, %v199_v56 }
 0x16b   :  { %131 = vrot.lane.b32.xlu0 %v1490_v58, %s1659_s23 }
 0x16c   :  { %1491 = vtanh.f32 %v209_v59 }
 0x172   :  { %v1492_v60 = vpop.eup %1491 }
 0x173   :  { %212 = vrot.lane.b32.xlu1 %v1492_v60, %s1659_s23 }
 0x17b   :  { %142 = vrot.lane.b32.xlu1 %v128_v54, %s1660_s24 }
 0x1dd   :  { %v132_v61 = vpop.permute.xlu0 %131 }
 0x1de   :  { %v134_v62 = vmul.f32 %v132_v61, %v111_v40 }
 0x1e0   :  { %136 = vrot.lane.b32.xlu2 %v134_v62, %s1658_s16 }
 0x1e5   :  { %v213_v63 = vpop.permute.xlu1 %212 }
 0x1e6   :  { %v215_v4 = vmul.f32 %v213_v63, %v192_v48 }
 0x1e8   :  { %217 = vrot.lane.b32.xlu0 %v215_v4, %s1658_s16  ;;  %222 = vrot.lane.b32.xlu2 %v209_v59, %s1660_s24 }
 0x1ed   :  { %v143_v9 = vpop.permute.xlu1 %142 }
 0x1ee   :  { %145 = vst.msk [vmem:[%s2251_s7] sm:$0x3] %vm53_vm0, %v143_v9 }
 0x1f5   :  { %v255_v10 = vld [vmem:[%s2251_s7] sm:$0x3] }
 0x1f6   :  { %277 = vrot.lane.b32.xlu2 %v255_v10, %s1658_s16 }
 0x23a   :  { %v137_v11 = vpop.permute.xlu2 %136 }
 0x23b   :  { %140 = vst.msk [vmem:[%s2250_s6] sm:$0x3] %vm53_vm0, %v137_v11 }
 0x23c   :  { %146 = vst.msk [vmem:[#allocation2] sm:$0x3] %vm53_vm0, %v137_v11 }
 0x242   :  { %v223_v12 = vpop.permute.xlu2 %222  ;;  %v230_v13 = vld [vmem:[%s2250_s6] sm:$0x3] }
 0x243   :  { %225 = vst.msk [vmem:[%s2253_s9] sm:$0x3] %vm53_vm0, %v223_v12  ;;  %1430 = vmatmul.msk.f32.vlgmr.msra.gmra.mxu2 %vm68_vm1, %v230_v13 }
 0x244   :  { %894 = vmatpush.msra.mxu2 %v1717_v0 }
 0x246   :  { %895 = vmatpush.msra.mxu2 %v1727_v2 }
 0x248   :  { %896 = vmatpush.msra.mxu2 %v1743_v5 }
 0x24a   :  { %897 = vmatpush.msra.mxu2 %v1765_v7  ;;  %v336_v20 = vld [vmem:[%s2253_s9] sm:$0x3] }
 0x250   :  { %v278_v55 = vpop.permute.xlu2 %277 }
 0x25a   :  { %v218_v14 = vpop.permute.xlu0 %217 }
 0x25b   :  { %220 = vst.msk [vmem:[%s2252_s8] sm:$0x3] %vm53_vm0, %v218_v14 }
 0x25c   :  { %227 = vst.msk [vmem:[#allocation4 + $0xe] sm:$0x3] %vm53_vm0, %v218_v14 }
 0x262   :  { %v311_v15 = vld [vmem:[%s2252_s8] sm:$0x3] }
 0x263   :  { %1433 = vmatmul.msk.f32.vlgmr.msra.gmra.mxu3 %vm68_vm1, %v311_v15 }
 0x264   :  { %975 = vmatpush.msra.mxu3 %v1722_v1 }
 0x266   :  { %976 = vmatpush.msra.mxu3 %v1734_v3 }
 0x268   :  { %977 = vmatpush.msra.mxu3 %v1748_v6 }
 0x26a   :  { %978 = vmatpush.msra.mxu3 %v1770_v8 }
 0x2c6   :  { %v251_v17 = vpop.f32.mrf.mxu2 }
 0x2c7   :  { %v254_v18 = vadd.f32 %v1429_v16, %v251_v17 }
 0x2c9   :  { %1493 = vtanh.f32 %v254_v18  ;;  %v1431_v25 = vmul.f32 -1.442695, %v254_v18 }
 0x2cf   :  { %v1494_v19 = vpop.eup %1493 }
 0x2d0   :  { %282 = vrot.lane.b32.xlu0 %v1494_v19, %s1659_s23 }
 0x2d8   :  { %358 = vrot.lane.b32.xlu0 %v336_v20, %s1658_s16  ;;  %v1435_v20 = vld [vmem:[%s2244_s0 + $0x4] sm:$0x3] }
 0x2e6   :  { %v332_v22 = vpop.f32.mrf.mxu3 }
 0x2e7   :  { %v335_v23 = vadd.f32 %v1432_v21, %v332_v22 }
 0x2e9   :  { %1495 = vtanh.f32 %v335_v23  ;;  %v1434_v31 = vmul.f32 -1.442695, %v335_v23 }
 0x2ea   :  { %1497 = vpow2.f32 %v1431_v25  ;;  %v1438_v25 = vld [vmem:[%s2245_s1 + $0xa] sm:$0x3] }
 0x2ef   :  { %v1496_v24 = vpop.eup %1495 }
 0x2f0   :  { %363 = vrot.lane.b32.xlu1 %v1496_v24, %s1659_s23  ;;  %v1498_v26 = vpop.eup %1497 }
 0x2f1   :  { %v259_v27 = vadd.f32 1.0, %v1498_v26 }
 0x2f3   :  { %1499 = vrcp.f32 %v259_v27  ;;  %v271_v34 = vand.u32 2147483648, %v259_v27  ;;  %vm265_vm11 = vweird.f32 %v259_v27  ;;  %v269_v35 = vand.u32 2147483647, %v259_v27 }
 0x2f4   :  { %1501 = vpow2.f32 %v1434_v31 }
 0x2f5   :  { %v272_v38 = vor.u32 1.1754944e-38, %v271_v34  ;;  %vm270_vm13 = vcmp.eq.f32.partialorder %v269_v35, 8.507059e+37 }
 0x2f9   :  { %v1500_v28 = vpop.eup %1499 }
 0x2fa   :  { %v261_v29 = vmul.f32 %v1500_v28, %v259_v27  ;;  %vm266_vm10 = vweird.f32 %v1500_v28  ;;  %v1502_v36 = vpop.eup %1501 }
 0x2fb   :  { %vm267_vm12 = vmor %vm265_vm11, %vm266_vm10  ;;  %v340_v39 = vadd.f32 1.0, %v1502_v36 }
 0x2fc   :  { %v262_v30 = vsub.f32 1.0, %v261_v29 }
 0x2fd   :  { %1503 = vrcp.f32 %v340_v39  ;;  %v352_v48 = vand.u32 2147483648, %v340_v39  ;;  %vm346_vm15 = vweird.f32 %v340_v39  ;;  %v350_v49 = vand.u32 2147483647, %v340_v39 }
 0x2fe   :  { %v263_v32 = vmul.f32 %v1500_v28, %v262_v30 }
 0x2ff   :  { %v353_v51 = vor.u32 1.1754944e-38, %v352_v48  ;;  %vm351_vm3 = vcmp.eq.f32.partialorder %v350_v49, 8.507059e+37 }
 0x300   :  { %v264_v33 = vadd.f32 %v1500_v28, %v263_v32 }
 0x302   :  { %v268_v37 = vsel %vm267_vm12, %v1500_v28, %v264_v33 }
 0x303   :  { %v273_v40 = vsel %vm270_vm13, %v272_v38, %v268_v37  ;;  %v1504_v43 = vpop.eup %1503 }
 0x304   :  { %v342_v44 = vmul.f32 %v1504_v43, %v340_v39  ;;  %vm347_vm14 = vweird.f32 %v1504_v43  ;;  %v280_v56 = vmul.f32 %v278_v55, %v273_v40 }
 0x305   :  { %vm348_vm2 = vmor %vm346_vm15, %vm347_vm14 }
 0x306   :  { %v343_v45 = vsub.f32 1.0, %v342_v44 }
 0x308   :  { %v344_v46 = vmul.f32 %v1504_v43, %v343_v45 }
 0x30a   :  { %v345_v47 = vadd.f32 %v1504_v43, %v344_v46 }
 0x30c   :  { %v349_v50 = vsel %vm348_vm2, %v1504_v43, %v345_v47 }
 0x30d   :  { %v354_v52 = vsel %vm351_vm3, %v353_v51, %v349_v50 }
 0x342   :  { %v283_v41 = vpop.permute.xlu0 %282 }
 0x343   :  { %v285_v42 = vmul.f32 %v283_v41, %v273_v40 }
 0x345   :  { %287 = vrot.lane.b32.xlu1 %v285_v42, %s1658_s16 }
 0x34a   :  { %v359_v59 = vpop.permute.xlu0 %358 }
 0x34b   :  { %v361_v60 = vmul.f32 %v359_v59, %v354_v52 }
 0x362   :  { %v364_v53 = vpop.permute.xlu1 %363 }
 0x363   :  { %v366_v54 = vmul.f32 %v364_v53, %v354_v52 }
 0x365   :  { %368 = vrot.lane.b32.xlu2 %v366_v54, %s1658_s16 }
 0x3b7   :  { %v288_v57 = vpop.permute.xlu1 %287 }
 0x3b8   :  { %v290_v58 = vadd.f32 %v288_v57, %v280_v56 }
 0x3ba   :  { %1505 = vtanh.f32 %v290_v58 }
 0x3bf   :  { %v369_v61 = vpop.permute.xlu2 %368 }
 0x3c0   :  { %v1506_v62 = vpop.eup %1505  ;;  %v371_v63 = vadd.f32 %v369_v61, %v361_v60 }
 0x3c1   :  { %293 = vrot.lane.b32.xlu0 %v1506_v62, %s1659_s23 }
 0x3c2   :  { %1507 = vtanh.f32 %v371_v63 }
 0x3c8   :  { %v1508_v4 = vpop.eup %1507 }
 0x3c9   :  { %374 = vrot.lane.b32.xlu1 %v1508_v4, %s1659_s23 }
 0x3d1   :  { %303 = vrot.lane.b32.xlu1 %v290_v58, %s1660_s24 }
 0x433   :  { %v294_v9 = vpop.permute.xlu0 %293 }
 0x434   :  { %v296_v10 = vmul.f32 %v294_v9, %v273_v40 }
 0x436   :  { %298 = vrot.lane.b32.xlu2 %v296_v10, %s1658_s16 }
 0x43b   :  { %v375_v11 = vpop.permute.xlu1 %374 }
 0x43c   :  { %v377_v12 = vmul.f32 %v375_v11, %v354_v52 }
 0x43e   :  { %379 = vrot.lane.b32.xlu0 %v377_v12, %s1658_s16  ;;  %384 = vrot.lane.b32.xlu2 %v371_v63, %s1660_s24 }
 0x443   :  { %v304_v13 = vpop.permute.xlu1 %303 }
 0x444   :  { %306 = vst.msk [vmem:[%s2251_s7] sm:$0x3] %vm53_vm0, %v304_v13 }
 0x44b   :  { %v417_v14 = vld [vmem:[%s2251_s7] sm:$0x3] }
 0x44c   :  { %439 = vrot.lane.b32.xlu2 %v417_v14, %s1658_s16 }
 0x490   :  { %v299_v15 = vpop.permute.xlu2 %298 }
 0x491   :  { %301 = vst.msk [vmem:[%s2250_s6] sm:$0x3] %vm53_vm0, %v299_v15 }
 0x492   :  { %308 = vst.msk [vmem:[#allocation2 + $0x2] sm:$0x3] %vm53_vm0, %v299_v15 }
 0x498   :  { %v385_v16 = vpop.permute.xlu2 %384  ;;  %v392_v17 = vld [vmem:[%s2250_s6] sm:$0x3] }
 0x499   :  { %387 = vst.msk [vmem:[%s2253_s9] sm:$0x3] %vm53_vm0, %v385_v16  ;;  %1436 = vmatmul.msk.f32.vlgmr.msrb.gmra.mxu0 %vm68_vm1, %v392_v17 }
 0x49a   :  { %1056 = vmatpush.msrb.mxu0 %v1717_v0 }
 0x49c   :  { %1057 = vmatpush.msrb.mxu0 %v1727_v2 }
 0x49e   :  { %1058 = vmatpush.msrb.mxu0 %v1743_v5 }
 0x4a0   :  { %1059 = vmatpush.msrb.mxu0 %v1765_v7  ;;  %v498_v24 = vld [vmem:[%s2253_s9] sm:$0x3] }
 0x4a6   :  { %v440_v59 = vpop.permute.xlu2 %439 }
 0x4b0   :  { %v380_v18 = vpop.permute.xlu0 %379 }
 0x4b1   :  { %382 = vst.msk [vmem:[%s2252_s8] sm:$0x3] %vm53_vm0, %v380_v18 }
 0x4b2   :  { %389 = vst.msk [vmem:[#allocation4 + $0xc] sm:$0x3] %vm53_vm0, %v380_v18 }
 0x4b8   :  { %v473_v19 = vld [vmem:[%s2252_s8] sm:$0x3] }
 0x4b9   :  { %1439 = vmatmul.msk.f32.vlgmr.msrb.gmra.mxu1 %vm68_vm1, %v473_v19 }
 0x4ba   :  { %1137 = vmatpush.msrb.mxu1 %v1722_v1 }
 0x4bc   :  { %1138 = vmatpush.msrb.mxu1 %v1734_v3 }
 0x4be   :  { %1139 = vmatpush.msrb.mxu1 %v1748_v6 }
 0x4c0   :  { %1140 = vmatpush.msrb.mxu1 %v1770_v8 }
 0x516   :  { %v413_v21 = vpop.f32.mrf.mxu0 }
 0x517   :  { %v416_v22 = vadd.f32 %v1435_v20, %v413_v21 }
 0x519   :  { %1509 = vtanh.f32 %v416_v22  ;;  %v1437_v29 = vmul.f32 -1.442695, %v416_v22 }
 0x51f   :  { %v1510_v23 = vpop.eup %1509 }
 0x520   :  { %444 = vrot.lane.b32.xlu0 %v1510_v23, %s1659_s23 }
 0x528   :  { %520 = vrot.lane.b32.xlu0 %v498_v24, %s1658_s16 }
 0x536   :  { %v494_v26 = vpop.f32.mrf.mxu1 }
 0x537   :  { %v497_v27 = vadd.f32 %v1438_v25, %v494_v26 }
 0x539   :  { %1511 = vtanh.f32 %v497_v27  ;;  %v1440_v35 = vmul.f32 -1.442695, %v497_v27 }
 0x53a   :  { %1513 = vpow2.f32 %v1437_v29 }
 0x53f   :  { %v1512_v28 = vpop.eup %1511 }
 0x540   :  { %525 = vrot.lane.b32.xlu1 %v1512_v28, %s1659_s23  ;;  %v1514_v30 = vpop.eup %1513 }
 0x541   :  { %v421_v31 = vadd.f32 1.0, %v1514_v30 }
 0x543   :  { %1515 = vrcp.f32 %v421_v31  ;;  %v433_v38 = vand.u32 2147483648, %v421_v31  ;;  %vm427_vm5 = vweird.f32 %v421_v31  ;;  %v431_v39 = vand.u32 2147483647, %v421_v31 }
 0x544   :  { %1517 = vpow2.f32 %v1440_v35 }
 0x545   :  { %v434_v42 = vor.u32 1.1754944e-38, %v433_v38  ;;  %vm432_vm7 = vcmp.eq.f32.partialorder %v431_v39, 8.507059e+37 }
 0x549   :  { %v1516_v32 = vpop.eup %1515 }
 0x54a   :  { %v423_v33 = vmul.f32 %v1516_v32, %v421_v31  ;;  %vm428_vm4 = vweird.f32 %v1516_v32  ;;  %v1518_v40 = vpop.eup %1517 }
 0x54b   :  { %vm429_vm6 = vmor %vm427_vm5, %vm428_vm4  ;;  %v502_v43 = vadd.f32 1.0, %v1518_v40 }
 0x54c   :  { %v424_v34 = vsub.f32 1.0, %v423_v33 }
 0x54d   :  { %1519 = vrcp.f32 %v502_v43  ;;  %v514_v52 = vand.u32 2147483648, %v502_v43  ;;  %vm508_vm9 = vweird.f32 %v502_v43  ;;  %v512_v53 = vand.u32 2147483647, %v502_v43 }
 0x54e   :  { %v425_v36 = vmul.f32 %v1516_v32, %v424_v34 }
 0x54f   :  { %v515_v55 = vor.u32 1.1754944e-38, %v514_v52  ;;  %vm513_vm11 = vcmp.eq.f32.partialorder %v512_v53, 8.507059e+37 }
 0x550   :  { %v426_v37 = vadd.f32 %v1516_v32, %v425_v36 }
 0x552   :  { %v430_v41 = vsel %vm429_vm6, %v1516_v32, %v426_v37 }
 0x553   :  { %v435_v44 = vsel %vm432_vm7, %v434_v42, %v430_v41  ;;  %v1520_v47 = vpop.eup %1519 }
 0x554   :  { %v504_v48 = vmul.f32 %v1520_v47, %v502_v43  ;;  %vm509_vm8 = vweird.f32 %v1520_v47  ;;  %v442_v60 = vmul.f32 %v440_v59, %v435_v44 }
 0x555   :  { %vm510_vm10 = vmor %vm508_vm9, %vm509_vm8 }
 0x556   :  { %v505_v49 = vsub.f32 1.0, %v504_v48 }
 0x558   :  { %v506_v50 = vmul.f32 %v1520_v47, %v505_v49 }
 0x55a   :  { %v507_v51 = vadd.f32 %v1520_v47, %v506_v50 }
 0x55c   :  { %v511_v54 = vsel %vm510_vm10, %v1520_v47, %v507_v51 }
 0x55d   :  { %v516_v56 = vsel %vm513_vm11, %v515_v55, %v511_v54 }
 0x592   :  { %v445_v45 = vpop.permute.xlu0 %444 }
 0x593   :  { %v447_v46 = vmul.f32 %v445_v45, %v435_v44 }
 0x595   :  { %449 = vrot.lane.b32.xlu1 %v447_v46, %s1658_s16 }
 0x59a   :  { %v521_v63 = vpop.permute.xlu0 %520 }
 0x59b   :  { %v523_v4 = vmul.f32 %v521_v63, %v516_v56 }
 0x5b2   :  { %v526_v57 = vpop.permute.xlu1 %525 }
 0x5b3   :  { %v528_v58 = vmul.f32 %v526_v57, %v516_v56 }
 0x5b5   :  { %530 = vrot.lane.b32.xlu2 %v528_v58, %s1658_s16 }
 0x607   :  { %v450_v61 = vpop.permute.xlu1 %449 }
 0x608   :  { %v452_v62 = vadd.f32 %v450_v61, %v442_v60 }
 0x60a   :  { %1521 = vtanh.f32 %v452_v62 }
 0x60f   :  { %v531_v9 = vpop.permute.xlu2 %530 }
 0x610   :  { %v1522_v10 = vpop.eup %1521  ;;  %v533_v11 = vadd.f32 %v531_v9, %v523_v4 }
 0x611   :  { %455 = vrot.lane.b32.xlu0 %v1522_v10, %s1659_s23 }
 0x612   :  { %1523 = vtanh.f32 %v533_v11 }
 0x618   :  { %v1524_v12 = vpop.eup %1523 }
 0x619   :  { %536 = vrot.lane.b32.xlu1 %v1524_v12, %s1659_s23 }
 0x621   :  { %465 = vrot.lane.b32.xlu1 %v452_v62, %s1660_s24 }
 0x683   :  { %v456_v13 = vpop.permute.xlu0 %455 }
 0x684   :  { %v458_v14 = vmul.f32 %v456_v13, %v435_v44 }
 0x686   :  { %460 = vrot.lane.b32.xlu2 %v458_v14, %s1658_s16 }
 0x68b   :  { %v537_v15 = vpop.permute.xlu1 %536 }
 0x68c   :  { %v539_v16 = vmul.f32 %v537_v15, %v516_v56 }
 0x68e   :  { %541 = vrot.lane.b32.xlu0 %v539_v16, %s1658_s16  ;;  %546 = vrot.lane.b32.xlu2 %v533_v11, %s1660_s24 }
 0x693   :  { %v466_v17 = vpop.permute.xlu1 %465 }
 0x694   :  { %468 = vst.msk [vmem:[%s2251_s7] sm:$0x3] %vm53_vm0, %v466_v17 }
 0x69b   :  { %v579_v18 = vld [vmem:[%s2251_s7] sm:$0x3] }
 0x69c   :  { %601 = vrot.lane.b32.xlu2 %v579_v18, %s1658_s16 }
 0x6e0   :  { %v461_v19 = vpop.permute.xlu2 %460 }
 0x6e1   :  { %463 = vst.msk [vmem:[%s2250_s6] sm:$0x3] %vm53_vm0, %v461_v19 }
 0x6e2   :  { %470 = vst.msk [vmem:[#allocation2 + $0x4] sm:$0x3] %vm53_vm0, %v461_v19 }
 0x6e8   :  { %v547_v20 = vpop.permute.xlu2 %546  ;;  %v554_v21 = vld [vmem:[%s2250_s6] sm:$0x3] }
 0x6e9   :  { %549 = vst.msk [vmem:[%s2253_s9] sm:$0x3] %vm53_vm0, %v547_v20  ;;  %1442 = vmatmul.msk.f32.vlgmr.msrb.gmra.mxu2 %vm68_vm1, %v554_v21  ;;  %v1447_v20 = vld [vmem:[%s2244_s0 + $0x8] sm:$0x3] }
 0x6ea   :  { %1218 = vmatpush.msrb.mxu2 %v1717_v0  ;;  %v1441_v0 = vld [vmem:[%s2244_s0 + $0x6] sm:$0x3] }
 0x6ec   :  { %1219 = vmatpush.msrb.mxu2 %v1727_v2 }
 0x6ee   :  { %1220 = vmatpush.msrb.mxu2 %v1743_v5 }
 0x6f0   :  { %1221 = vmatpush.msrb.mxu2 %v1765_v7 }
 0x6f6   :  { %v602_v55 = vpop.permute.xlu2 %601 }
 0x700   :  { %v542_v22 = vpop.permute.xlu0 %541 }
 0x701   :  { %544 = vst.msk [vmem:[%s2252_s8] sm:$0x3] %vm53_vm0, %v542_v22 }
 0x702   :  { %551 = vst.msk [vmem:[#allocation4 + $0xa] sm:$0x3] %vm53_vm0, %v542_v22 }
 0x708   :  { %v635_v23 = vld [vmem:[%s2252_s8] sm:$0x3] }
 0x709   :  { %1445 = vmatmul.msk.f32.vlgmr.msrb.gmra.mxu3 %vm68_vm1, %v635_v23 }
 0x70a   :  { %1298 = vmatpush.msrb.mxu3 %v1722_v1  ;;  %v660_v1 = vld [vmem:[%s2253_s9] sm:$0x3] }
 0x70c   :  { %1299 = vmatpush.msrb.mxu3 %v1734_v3  ;;  %v1444_v3 = vld [vmem:[%s2245_s1 + $0x8] sm:$0x3] }
 0x70e   :  { %1300 = vmatpush.msrb.mxu3 %v1748_v6 }
 0x710   :  { %1301 = vmatpush.msrb.mxu3 %v1770_v8 }
 0x76c   :  { %v575_v2 = vpop.f32.mrf.mxu2 }
 0x76d   :  { %v578_v5 = vadd.f32 %v1441_v0, %v575_v2  ;;  %v1450_v2 = vld [vmem:[%s2245_s1 + $0x6] sm:$0x3] }
 0x76f   :  { %1525 = vtanh.f32 %v578_v5  ;;  %v1443_v25 = vmul.f32 -1.442695, %v578_v5 }
 0x775   :  { %v1526_v7 = vpop.eup %1525 }
 0x776   :  { %606 = vrot.lane.b32.xlu0 %v1526_v7, %s1659_s23 }
 0x77e   :  { %682 = vrot.lane.b32.xlu0 %v660_v1, %s1658_s16 }
 0x78c   :  { %v656_v6 = vpop.f32.mrf.mxu3 }
 0x78d   :  { %v659_v8 = vadd.f32 %v1444_v3, %v656_v6 }
 0x78f   :  { %1527 = vtanh.f32 %v659_v8  ;;  %v1446_v31 = vmul.f32 -1.442695, %v659_v8 }
 0x790   :  { %1529 = vpow2.f32 %v1443_v25 }
 0x795   :  { %v1528_v24 = vpop.eup %1527 }
 0x796   :  { %687 = vrot.lane.b32.xlu1 %v1528_v24, %s1659_s23  ;;  %v1530_v26 = vpop.eup %1529 }
 0x797   :  { %v583_v27 = vadd.f32 1.0, %v1530_v26 }
 0x799   :  { %1531 = vrcp.f32 %v583_v27  ;;  %v595_v34 = vand.u32 2147483648, %v583_v27  ;;  %vm589_vm13 = vweird.f32 %v583_v27  ;;  %v593_v35 = vand.u32 2147483647, %v583_v27 }
 0x79a   :  { %1533 = vpow2.f32 %v1446_v31 }
 0x79b   :  { %v596_v38 = vor.u32 1.1754944e-38, %v595_v34  ;;  %vm594_vm15 = vcmp.eq.f32.partialorder %v593_v35, 8.507059e+37 }
 0x79f   :  { %v1532_v28 = vpop.eup %1531 }
 0x7a0   :  { %v585_v29 = vmul.f32 %v1532_v28, %v583_v27  ;;  %vm590_vm12 = vweird.f32 %v1532_v28  ;;  %v1534_v36 = vpop.eup %1533 }
 0x7a1   :  { %vm591_vm14 = vmor %vm589_vm13, %vm590_vm12  ;;  %v664_v39 = vadd.f32 1.0, %v1534_v36 }
 0x7a2   :  { %v586_v30 = vsub.f32 1.0, %v585_v29 }
 0x7a3   :  { %1535 = vrcp.f32 %v664_v39  ;;  %v676_v48 = vand.u32 2147483648, %v664_v39  ;;  %vm670_vm3 = vweird.f32 %v664_v39  ;;  %v674_v49 = vand.u32 2147483647, %v664_v39 }
 0x7a4   :  { %v587_v32 = vmul.f32 %v1532_v28, %v586_v30 }
 0x7a5   :  { %v677_v51 = vor.u32 1.1754944e-38, %v676_v48  ;;  %vm675_vm5 = vcmp.eq.f32.partialorder %v674_v49, 8.507059e+37 }
 0x7a6   :  { %v588_v33 = vadd.f32 %v1532_v28, %v587_v32 }
 0x7a8   :  { %v592_v37 = vsel %vm591_vm14, %v1532_v28, %v588_v33 }
 0x7a9   :  { %v597_v40 = vsel %vm594_vm15, %v596_v38, %v592_v37  ;;  %v1536_v43 = vpop.eup %1535 }
 0x7aa   :  { %v666_v44 = vmul.f32 %v1536_v43, %v664_v39  ;;  %vm671_vm2 = vweird.f32 %v1536_v43  ;;  %v604_v56 = vmul.f32 %v602_v55, %v597_v40 }
 0x7ab   :  { %vm672_vm4 = vmor %vm670_vm3, %vm671_vm2 }
 0x7ac   :  { %v667_v45 = vsub.f32 1.0, %v666_v44 }
 0x7ae   :  { %v668_v46 = vmul.f32 %v1536_v43, %v667_v45 }
 0x7b0   :  { %v669_v47 = vadd.f32 %v1536_v43, %v668_v46 }
 0x7b2   :  { %v673_v50 = vsel %vm672_vm4, %v1536_v43, %v669_v47 }
 0x7b3   :  { %v678_v52 = vsel %vm675_vm5, %v677_v51, %v673_v50 }
 0x7e8   :  { %v607_v41 = vpop.permute.xlu0 %606 }
 0x7e9   :  { %v609_v42 = vmul.f32 %v607_v41, %v597_v40 }
 0x7eb   :  { %611 = vrot.lane.b32.xlu1 %v609_v42, %s1658_s16 }
 0x7f0   :  { %v683_v59 = vpop.permute.xlu0 %682 }
 0x7f1   :  { %v685_v60 = vmul.f32 %v683_v59, %v678_v52 }
 0x808   :  { %v688_v53 = vpop.permute.xlu1 %687 }
 0x809   :  { %v690_v54 = vmul.f32 %v688_v53, %v678_v52 }
 0x80b   :  { %692 = vrot.lane.b32.xlu2 %v690_v54, %s1658_s16 }
 0x85d   :  { %v612_v57 = vpop.permute.xlu1 %611 }
 0x85e   :  { %v614_v58 = vadd.f32 %v612_v57, %v604_v56 }
 0x860   :  { %1537 = vtanh.f32 %v614_v58 }
 0x865   :  { %v693_v61 = vpop.permute.xlu2 %692 }
 0x866   :  { %v1538_v62 = vpop.eup %1537  ;;  %v695_v63 = vadd.f32 %v693_v61, %v685_v60 }
 0x867   :  { %617 = vrot.lane.b32.xlu0 %v1538_v62, %s1659_s23 }
 0x868   :  { %1539 = vtanh.f32 %v695_v63 }
 0x86e   :  { %v1540_v4 = vpop.eup %1539 }
 0x86f   :  { %698 = vrot.lane.b32.xlu1 %v1540_v4, %s1659_s23 }
 0x877   :  { %627 = vrot.lane.b32.xlu1 %v614_v58, %s1660_s24 }
 0x8d9   :  { %v618_v9 = vpop.permute.xlu0 %617 }
 0x8da   :  { %v620_v10 = vmul.f32 %v618_v9, %v597_v40 }
 0x8dc   :  { %622 = vrot.lane.b32.xlu2 %v620_v10, %s1658_s16 }
 0x8e1   :  { %v699_v11 = vpop.permute.xlu1 %698 }
 0x8e2   :  { %v701_v12 = vmul.f32 %v699_v11, %v678_v52 }
 0x8e4   :  { %703 = vrot.lane.b32.xlu0 %v701_v12, %s1658_s16  ;;  %708 = vrot.lane.b32.xlu2 %v695_v63, %s1660_s24 }
 0x8e9   :  { %v628_v13 = vpop.permute.xlu1 %627 }
 0x8ea   :  { %630 = vst.msk [vmem:[%s2251_s7] sm:$0x3] %vm53_vm0, %v628_v13 }
 0x8f1   :  { %v741_v14 = vld [vmem:[%s2251_s7] sm:$0x3] }
 0x8f2   :  { %763 = vrot.lane.b32.xlu2 %v741_v14, %s1658_s16 }
 0x936   :  { %v623_v15 = vpop.permute.xlu2 %622 }
 0x937   :  { %625 = vst.msk [vmem:[%s2250_s6] sm:$0x3] %vm53_vm0, %v623_v15 }
 0x938   :  { %632 = vst.msk [vmem:[#allocation2 + $0x6] sm:$0x3] %vm53_vm0, %v623_v15 }
 0x93e   :  { %v709_v16 = vpop.permute.xlu2 %708  ;;  %v716_v17 = vld [vmem:[%s2250_s6] sm:$0x3] }
 0x93f   :  { %711 = vst.msk [vmem:[%s2253_s9] sm:$0x3] %vm53_vm0, %v709_v16  ;;  %1448 = vmatmul.msk.f32.vlgmr.msra.gmra.mxu0 %vm68_vm1, %v716_v17  ;;  %v1453_v16 = vld [vmem:[%s2244_s0 + $0xa] sm:$0x3] }
 0x946   :  { %v822_v0 = vld [vmem:[%s2253_s9] sm:$0x3] }
 0x94c   :  { %v764_v51 = vpop.permute.xlu2 %763 }
 0x956   :  { %v704_v18 = vpop.permute.xlu0 %703 }
 0x957   :  { %706 = vst.msk [vmem:[%s2252_s8] sm:$0x3] %vm53_vm0, %v704_v18 }
 0x958   :  { %713 = vst.msk [vmem:[#allocation4 + $0x8] sm:$0x3] %vm53_vm0, %v704_v18 }
 0x95e   :  { %v797_v19 = vld [vmem:[%s2252_s8] sm:$0x3] }
 0x95f   :  { %1451 = vmatmul.msk.f32.vlgmr.msra.gmra.mxu1 %vm68_vm1, %v797_v19 }
 0x9bc   :  { %v737_v21 = vpop.f32.mrf.mxu0 }
 0x9bd   :  { %v740_v22 = vadd.f32 %v1447_v20, %v737_v21  ;;  %v1456_v21 = vld [vmem:[%s2245_s1 + $0x4] sm:$0x3] }
 0x9bf   :  { %1541 = vtanh.f32 %v740_v22  ;;  %v1449_v3 = vmul.f32 -1.442695, %v740_v22 }
 0x9c5   :  { %v1542_v23 = vpop.eup %1541 }
 0x9c6   :  { %768 = vrot.lane.b32.xlu0 %v1542_v23, %s1659_s23 }
 0x9ce   :  { %844 = vrot.lane.b32.xlu0 %v822_v0, %s1658_s16 }
 0x9dc   :  { %v818_v5 = vpop.f32.mrf.mxu1 }
 0x9dd   :  { %v821_v7 = vadd.f32 %v1450_v2, %v818_v5 }
 0x9df   :  { %1543 = vtanh.f32 %v821_v7  ;;  %v1452_v27 = vmul.f32 -1.442695, %v821_v7 }
 0x9e0   :  { %1545 = vpow2.f32 %v1449_v3 }
 0x9e5   :  { %v1544_v1 = vpop.eup %1543 }
 0x9e6   :  { %849 = vrot.lane.b32.xlu1 %v1544_v1, %s1659_s23  ;;  %v1546_v6 = vpop.eup %1545 }
 0x9e7   :  { %v745_v8 = vadd.f32 1.0, %v1546_v6 }
 0x9e9   :  { %1547 = vrcp.f32 %v745_v8  ;;  %v757_v30 = vand.u32 2147483648, %v745_v8  ;;  %vm751_vm7 = vweird.f32 %v745_v8  ;;  %v755_v31 = vand.u32 2147483647, %v745_v8 }
 0x9ea   :  { %1549 = vpow2.f32 %v1452_v27 }
 0x9eb   :  { %v758_v34 = vor.u32 1.1754944e-38, %v757_v30  ;;  %vm756_vm9 = vcmp.eq.f32.partialorder %v755_v31, 8.507059e+37 }
 0x9ef   :  { %v1548_v24 = vpop.eup %1547 }
 0x9f0   :  { %v747_v25 = vmul.f32 %v1548_v24, %v745_v8  ;;  %vm752_vm6 = vweird.f32 %v1548_v24  ;;  %v1550_v32 = vpop.eup %1549 }
 0x9f1   :  { %vm753_vm8 = vmor %vm751_vm7, %vm752_vm6  ;;  %v826_v35 = vadd.f32 1.0, %v1550_v32 }
 0x9f2   :  { %v748_v26 = vsub.f32 1.0, %v747_v25 }
 0x9f3   :  { %1551 = vrcp.f32 %v826_v35  ;;  %v838_v44 = vand.u32 2147483648, %v826_v35  ;;  %vm832_vm11 = vweird.f32 %v826_v35  ;;  %v836_v45 = vand.u32 2147483647, %v826_v35 }
 0x9f4   :  { %v749_v28 = vmul.f32 %v1548_v24, %v748_v26 }
 0x9f5   :  { %v839_v47 = vor.u32 1.1754944e-38, %v838_v44  ;;  %vm837_vm13 = vcmp.eq.f32.partialorder %v836_v45, 8.507059e+37 }
 0x9f6   :  { %v750_v29 = vadd.f32 %v1548_v24, %v749_v28 }
 0x9f8   :  { %v754_v33 = vsel %vm753_vm8, %v1548_v24, %v750_v29 }
 0x9f9   :  { %v759_v36 = vsel %vm756_vm9, %v758_v34, %v754_v33  ;;  %v1552_v39 = vpop.eup %1551 }
 0x9fa   :  { %v828_v40 = vmul.f32 %v1552_v39, %v826_v35  ;;  %vm833_vm10 = vweird.f32 %v1552_v39  ;;  %v766_v52 = vmul.f32 %v764_v51, %v759_v36 }
 0x9fb   :  { %vm834_vm12 = vmor %vm832_vm11, %vm833_vm10 }
 0x9fc   :  { %v829_v41 = vsub.f32 1.0, %v828_v40 }
 0x9fe   :  { %v830_v42 = vmul.f32 %v1552_v39, %v829_v41 }
 0xa00   :  { %v831_v43 = vadd.f32 %v1552_v39, %v830_v42 }
 0xa02   :  { %v835_v46 = vsel %vm834_vm12, %v1552_v39, %v831_v43 }
 0xa03   :  { %v840_v48 = vsel %vm837_vm13, %v839_v47, %v835_v46 }
 0xa38   :  { %v769_v37 = vpop.permute.xlu0 %768 }
 0xa39   :  { %v771_v38 = vmul.f32 %v769_v37, %v759_v36 }
 0xa3b   :  { %773 = vrot.lane.b32.xlu1 %v771_v38, %s1658_s16 }
 0xa40   :  { %v845_v55 = vpop.permute.xlu0 %844 }
 0xa41   :  { %v847_v56 = vmul.f32 %v845_v55, %v840_v48 }
 0xa58   :  { %v850_v49 = vpop.permute.xlu1 %849 }
 0xa59   :  { %v852_v50 = vmul.f32 %v850_v49, %v840_v48 }
 0xa5b   :  { %854 = vrot.lane.b32.xlu2 %v852_v50, %s1658_s16 }
 0xaad   :  { %v774_v53 = vpop.permute.xlu1 %773 }
 0xaae   :  { %v776_v54 = vadd.f32 %v774_v53, %v766_v52 }
 0xab0   :  { %1553 = vtanh.f32 %v776_v54 }
 0xab5   :  { %v855_v57 = vpop.permute.xlu2 %854 }
 0xab6   :  { %v1554_v58 = vpop.eup %1553  ;;  %v857_v59 = vadd.f32 %v855_v57, %v847_v56 }
 0xab7   :  { %779 = vrot.lane.b32.xlu0 %v1554_v58, %s1659_s23 }
 0xab8   :  { %1555 = vtanh.f32 %v857_v59 }
 0xabe   :  { %v1556_v60 = vpop.eup %1555 }
 0xabf   :  { %860 = vrot.lane.b32.xlu1 %v1556_v60, %s1659_s23 }
 0xac7   :  { %789 = vrot.lane.b32.xlu1 %v776_v54, %s1660_s24 }
 0xb29   :  { %v780_v61 = vpop.permute.xlu0 %779 }
 0xb2a   :  { %v782_v62 = vmul.f32 %v780_v61, %v759_v36 }
 0xb2c   :  { %784 = vrot.lane.b32.xlu2 %v782_v62, %s1658_s16 }
 0xb31   :  { %v861_v63 = vpop.permute.xlu1 %860 }
 0xb32   :  { %v863_v4 = vmul.f32 %v861_v63, %v840_v48 }
 0xb34   :  { %865 = vrot.lane.b32.xlu0 %v863_v4, %s1658_s16  ;;  %870 = vrot.lane.b32.xlu2 %v857_v59, %s1660_s24 }
 0xb39   :  { %v790_v9 = vpop.permute.xlu1 %789 }
 0xb3a   :  { %792 = vst.msk [vmem:[%s2251_s7] sm:$0x3] %vm53_vm0, %v790_v9 }
 0xb41   :  { %v903_v10 = vld [vmem:[%s2251_s7] sm:$0x3] }
 0xb42   :  { %925 = vrot.lane.b32.xlu2 %v903_v10, %s1658_s16 }
 0xb86   :  { %v785_v11 = vpop.permute.xlu2 %784 }
 0xb87   :  { %787 = vst.msk [vmem:[%s2250_s6] sm:$0x3] %vm53_vm0, %v785_v11 }
 0xb88   :  { %794 = vst.msk [vmem:[#allocation2 + $0x8] sm:$0x3] %vm53_vm0, %v785_v11 }
 0xb8e   :  { %v871_v12 = vpop.permute.xlu2 %870  ;;  %v878_v13 = vld [vmem:[%s2250_s6] sm:$0x3] }
 0xb8f   :  { %873 = vst.msk [vmem:[%s2253_s9] sm:$0x3] %vm53_vm0, %v871_v12  ;;  %1454 = vmatmul.msk.f32.vlgmr.msra.gmra.mxu2 %vm68_vm1, %v878_v13  ;;  %v1459_v12 = vld [vmem:[%s2244_s0 + $0xc] sm:$0x3] }
 0xb96   :  { %v984_v20 = vld [vmem:[%s2253_s9] sm:$0x3] }
 0xb9c   :  { %v926_v47 = vpop.permute.xlu2 %925 }
 0xba6   :  { %v866_v14 = vpop.permute.xlu0 %865 }
 0xba7   :  { %868 = vst.msk [vmem:[%s2252_s8] sm:$0x3] %vm53_vm0, %v866_v14 }
 0xba8   :  { %875 = vst.msk [vmem:[#allocation4 + $0x6] sm:$0x3] %vm53_vm0, %v866_v14 }
 0xbae   :  { %v959_v15 = vld [vmem:[%s2252_s8] sm:$0x3] }
 0xbaf   :  { %1457 = vmatmul.msk.f32.vlgmr.msra.gmra.mxu3 %vm68_vm1, %v959_v15 }
 0xc12   :  { %v899_v17 = vpop.f32.mrf.mxu2 }
 0xc13   :  { %v902_v18 = vadd.f32 %v1453_v16, %v899_v17  ;;  %v1462_v17 = vld [vmem:[%s2245_s1 + $0x2] sm:$0x3] }
 0xc15   :  { %1557 = vtanh.f32 %v902_v18  ;;  %v1455_v2 = vmul.f32 -1.442695, %v902_v18 }
 0xc1b   :  { %v1558_v19 = vpop.eup %1557 }
 0xc1c   :  { %930 = vrot.lane.b32.xlu0 %v1558_v19, %s1659_s23 }
 0xc24   :  { %1006 = vrot.lane.b32.xlu0 %v984_v20, %s1658_s16 }
 0xc32   :  { %v980_v22 = vpop.f32.mrf.mxu3 }
 0xc33   :  { %v983_v23 = vadd.f32 %v1456_v21, %v980_v22 }
 0xc35   :  { %1559 = vtanh.f32 %v983_v23  ;;  %v1458_v8 = vmul.f32 -1.442695, %v983_v23 }
 0xc36   :  { %1561 = vpow2.f32 %v1455_v2 }
 0xc3b   :  { %v1560_v0 = vpop.eup %1559 }
 0xc3c   :  { %1011 = vrot.lane.b32.xlu1 %v1560_v0, %s1659_s23  ;;  %v1562_v5 = vpop.eup %1561 }
 0xc3d   :  { %v907_v7 = vadd.f32 1.0, %v1562_v5 }
 0xc3f   :  { %1563 = vrcp.f32 %v907_v7  ;;  %v919_v26 = vand.u32 2147483648, %v907_v7  ;;  %vm913_vm15 = vweird.f32 %v907_v7  ;;  %v917_v27 = vand.u32 2147483647, %v907_v7 }
 0xc40   :  { %1565 = vpow2.f32 %v1458_v8 }
 0xc41   :  { %v920_v30 = vor.u32 1.1754944e-38, %v919_v26  ;;  %vm918_vm3 = vcmp.eq.f32.partialorder %v917_v27, 8.507059e+37 }
 0xc45   :  { %v1564_v1 = vpop.eup %1563 }
 0xc46   :  { %v909_v3 = vmul.f32 %v1564_v1, %v907_v7  ;;  %vm914_vm14 = vweird.f32 %v1564_v1  ;;  %v1566_v28 = vpop.eup %1565 }
 0xc47   :  { %vm915_vm2 = vmor %vm913_vm15, %vm914_vm14  ;;  %v988_v31 = vadd.f32 1.0, %v1566_v28 }
 0xc48   :  { %v910_v6 = vsub.f32 1.0, %v909_v3 }
 0xc49   :  { %1567 = vrcp.f32 %v988_v31  ;;  %v1000_v40 = vand.u32 2147483648, %v988_v31  ;;  %vm994_vm5 = vweird.f32 %v988_v31  ;;  %v998_v41 = vand.u32 2147483647, %v988_v31 }
 0xc4a   :  { %v911_v24 = vmul.f32 %v1564_v1, %v910_v6 }
 0xc4b   :  { %v1001_v43 = vor.u32 1.1754944e-38, %v1000_v40  ;;  %vm999_vm7 = vcmp.eq.f32.partialorder %v998_v41, 8.507059e+37 }
 0xc4c   :  { %v912_v25 = vadd.f32 %v1564_v1, %v911_v24 }
 0xc4e   :  { %v916_v29 = vsel %vm915_vm2, %v1564_v1, %v912_v25 }
 0xc4f   :  { %v921_v32 = vsel %vm918_vm3, %v920_v30, %v916_v29  ;;  %v1568_v35 = vpop.eup %1567 }
 0xc50   :  { %v990_v36 = vmul.f32 %v1568_v35, %v988_v31  ;;  %vm995_vm4 = vweird.f32 %v1568_v35  ;;  %v928_v48 = vmul.f32 %v926_v47, %v921_v32 }
 0xc51   :  { %vm996_vm6 = vmor %vm994_vm5, %vm995_vm4 }
 0xc52   :  { %v991_v37 = vsub.f32 1.0, %v990_v36 }
 0xc54   :  { %v992_v38 = vmul.f32 %v1568_v35, %v991_v37 }
 0xc56   :  { %v993_v39 = vadd.f32 %v1568_v35, %v992_v38 }
 0xc58   :  { %v997_v42 = vsel %vm996_vm6, %v1568_v35, %v993_v39 }
 0xc59   :  { %v1002_v44 = vsel %vm999_vm7, %v1001_v43, %v997_v42 }
 0xc8e   :  { %v931_v33 = vpop.permute.xlu0 %930 }
 0xc8f   :  { %v933_v34 = vmul.f32 %v931_v33, %v921_v32 }
 0xc91   :  { %935 = vrot.lane.b32.xlu1 %v933_v34, %s1658_s16 }
 0xc96   :  { %v1007_v51 = vpop.permute.xlu0 %1006 }
 0xc97   :  { %v1009_v52 = vmul.f32 %v1007_v51, %v1002_v44 }
 0xcae   :  { %v1012_v45 = vpop.permute.xlu1 %1011 }
 0xcaf   :  { %v1014_v46 = vmul.f32 %v1012_v45, %v1002_v44 }
 0xcb1   :  { %1016 = vrot.lane.b32.xlu2 %v1014_v46, %s1658_s16 }
 0xd03   :  { %v936_v49 = vpop.permute.xlu1 %935 }
 0xd04   :  { %v938_v50 = vadd.f32 %v936_v49, %v928_v48 }
 0xd06   :  { %1569 = vtanh.f32 %v938_v50 }
 0xd0b   :  { %v1017_v53 = vpop.permute.xlu2 %1016 }
 0xd0c   :  { %v1570_v54 = vpop.eup %1569  ;;  %v1019_v55 = vadd.f32 %v1017_v53, %v1009_v52 }
 0xd0d   :  { %941 = vrot.lane.b32.xlu0 %v1570_v54, %s1659_s23 }
 0xd0e   :  { %1571 = vtanh.f32 %v1019_v55 }
 0xd14   :  { %v1572_v56 = vpop.eup %1571 }
 0xd15   :  { %1022 = vrot.lane.b32.xlu1 %v1572_v56, %s1659_s23 }
 0xd1d   :  { %951 = vrot.lane.b32.xlu1 %v938_v50, %s1660_s24 }
 0xd7f   :  { %v942_v57 = vpop.permute.xlu0 %941 }
 0xd80   :  { %v944_v58 = vmul.f32 %v942_v57, %v921_v32 }
 0xd82   :  { %946 = vrot.lane.b32.xlu2 %v944_v58, %s1658_s16 }
 0xd87   :  { %v1023_v59 = vpop.permute.xlu1 %1022 }
 0xd88   :  { %v1025_v60 = vmul.f32 %v1023_v59, %v1002_v44 }
 0xd8a   :  { %1027 = vrot.lane.b32.xlu0 %v1025_v60, %s1658_s16  ;;  %1032 = vrot.lane.b32.xlu2 %v1019_v55, %s1660_s24 }
 0xd8f   :  { %v952_v61 = vpop.permute.xlu1 %951 }
 0xd90   :  { %954 = vst.msk [vmem:[%s2251_s7] sm:$0x3] %vm53_vm0, %v952_v61 }
 0xd97   :  { %v1065_v62 = vld [vmem:[%s2251_s7] sm:$0x3] }
 0xd98   :  { %1087 = vrot.lane.b32.xlu2 %v1065_v62, %s1658_s16 }
 0xddc   :  { %v947_v63 = vpop.permute.xlu2 %946 }
 0xddd   :  { %949 = vst.msk [vmem:[%s2250_s6] sm:$0x3] %vm53_vm0, %v947_v63 }
 0xdde   :  { %956 = vst.msk [vmem:[#allocation2 + $0xa] sm:$0x3] %vm53_vm0, %v947_v63 }
 0xde4   :  { %v1033_v4 = vpop.permute.xlu2 %1032  ;;  %v1040_v9 = vld [vmem:[%s2250_s6] sm:$0x3] }
 0xde5   :  { %1035 = vst.msk [vmem:[%s2253_s9] sm:$0x3] %vm53_vm0, %v1033_v4  ;;  %1460 = vmatmul.msk.f32.vlgmr.msrb.gmra.mxu0 %vm68_vm1, %v1040_v9  ;;  %v1465_v4 = vld [vmem:[%s2244_s0 + $0xe] sm:$0x3] }
 0xdec   :  { %v1146_v16 = vld [vmem:[%s2253_s9] sm:$0x3] }
 0xdf2   :  { %v1088_v43 = vpop.permute.xlu2 %1087 }
 0xdfc   :  { %v1028_v10 = vpop.permute.xlu0 %1027 }
 0xdfd   :  { %1030 = vst.msk [vmem:[%s2252_s8] sm:$0x3] %vm53_vm0, %v1028_v10 }
 0xdfe   :  { %1037 = vst.msk [vmem:[#allocation4 + $0x4] sm:$0x3] %vm53_vm0, %v1028_v10 }
 0xe04   :  { %v1121_v11 = vld [vmem:[%s2252_s8] sm:$0x3] }
 0xe05   :  { %1463 = vmatmul.msk.f32.vlgmr.msrb.gmra.mxu1 %vm68_vm1, %v1121_v11 }
 0xe62   :  { %v1061_v13 = vpop.f32.mrf.mxu0 }
 0xe63   :  { %v1064_v14 = vadd.f32 %v1459_v12, %v1061_v13  ;;  %v1281_v13 = vld [vmem:[%s2245_s1] sm:$0x3] }
 0xe65   :  { %1573 = vtanh.f32 %v1064_v14  ;;  %v1461_v21 = vmul.f32 -1.442695, %v1064_v14 }
 0xe6b   :  { %v1574_v15 = vpop.eup %1573 }
 0xe6c   :  { %1092 = vrot.lane.b32.xlu0 %v1574_v15, %s1659_s23 }
 0xe74   :  { %1168 = vrot.lane.b32.xlu0 %v1146_v16, %s1658_s16 }
 0xe82   :  { %v1142_v18 = vpop.f32.mrf.mxu1 }
 0xe83   :  { %v1145_v19 = vadd.f32 %v1462_v17, %v1142_v18 }
 0xe85   :  { %1575 = vtanh.f32 %v1145_v19  ;;  %v1464_v7 = vmul.f32 -1.442695, %v1145_v19 }
 0xe86   :  { %1577 = vpow2.f32 %v1461_v21 }
 0xe8b   :  { %v1576_v20 = vpop.eup %1575 }
 0xe8c   :  { %1173 = vrot.lane.b32.xlu1 %v1576_v20, %s1659_s23  ;;  %v1578_v22 = vpop.eup %1577 }
 0xe8d   :  { %v1069_v23 = vadd.f32 1.0, %v1578_v22 }
 0xe8f   :  { %1579 = vrcp.f32 %v1069_v23  ;;  %v1081_v6 = vand.u32 2147483648, %v1069_v23  ;;  %vm1075_vm9 = vweird.f32 %v1069_v23  ;;  %v1079_v8 = vand.u32 2147483647, %v1069_v23 }
 0xe90   :  { %1581 = vpow2.f32 %v1464_v7 }
 0xe91   :  { %v1082_v26 = vor.u32 1.1754944e-38, %v1081_v6  ;;  %vm1080_vm11 = vcmp.eq.f32.partialorder %v1079_v8, 8.507059e+37 }
 0xe95   :  { %v1580_v0 = vpop.eup %1579 }
 0xe96   :  { %v1071_v2 = vmul.f32 %v1580_v0, %v1069_v23  ;;  %vm1076_vm8 = vweird.f32 %v1580_v0  ;;  %v1582_v24 = vpop.eup %1581 }
 0xe97   :  { %vm1077_vm10 = vmor %vm1075_vm9, %vm1076_vm8  ;;  %v1150_v27 = vadd.f32 1.0, %v1582_v24 }
 0xe98   :  { %v1072_v5 = vsub.f32 1.0, %v1071_v2 }
 0xe99   :  { %1583 = vrcp.f32 %v1150_v27  ;;  %v1162_v36 = vand.u32 2147483648, %v1150_v27  ;;  %vm1156_vm13 = vweird.f32 %v1150_v27  ;;  %v1160_v37 = vand.u32 2147483647, %v1150_v27 }
 0xe9a   :  { %v1073_v1 = vmul.f32 %v1580_v0, %v1072_v5 }
 0xe9b   :  { %v1163_v39 = vor.u32 1.1754944e-38, %v1162_v36  ;;  %vm1161_vm15 = vcmp.eq.f32.partialorder %v1160_v37, 8.507059e+37 }
 0xe9c   :  { %v1074_v3 = vadd.f32 %v1580_v0, %v1073_v1 }
 0xe9e   :  { %v1078_v25 = vsel %vm1077_vm10, %v1580_v0, %v1074_v3 }
 0xe9f   :  { %v1083_v28 = vsel %vm1080_vm11, %v1082_v26, %v1078_v25  ;;  %v1584_v31 = vpop.eup %1583 }
 0xea0   :  { %v1152_v32 = vmul.f32 %v1584_v31, %v1150_v27  ;;  %vm1157_vm12 = vweird.f32 %v1584_v31  ;;  %v1090_v44 = vmul.f32 %v1088_v43, %v1083_v28 }
 0xea1   :  { %vm1158_vm14 = vmor %vm1156_vm13, %vm1157_vm12 }
 0xea2   :  { %v1153_v33 = vsub.f32 1.0, %v1152_v32 }
 0xea4   :  { %v1154_v34 = vmul.f32 %v1584_v31, %v1153_v33 }
 0xea6   :  { %v1155_v35 = vadd.f32 %v1584_v31, %v1154_v34 }
 0xea8   :  { %v1159_v38 = vsel %vm1158_vm14, %v1584_v31, %v1155_v35 }
 0xea9   :  { %v1164_v40 = vsel %vm1161_vm15, %v1163_v39, %v1159_v38 }
 0xede   :  { %v1093_v29 = vpop.permute.xlu0 %1092 }
 0xedf   :  { %v1095_v30 = vmul.f32 %v1093_v29, %v1083_v28 }
 0xee1   :  { %1097 = vrot.lane.b32.xlu1 %v1095_v30, %s1658_s16 }
 0xee6   :  { %v1169_v47 = vpop.permute.xlu0 %1168 }
 0xee7   :  { %v1171_v48 = vmul.f32 %v1169_v47, %v1164_v40 }
 0xefe   :  { %v1174_v41 = vpop.permute.xlu1 %1173 }
 0xeff   :  { %v1176_v42 = vmul.f32 %v1174_v41, %v1164_v40 }
 0xf01   :  { %1178 = vrot.lane.b32.xlu2 %v1176_v42, %s1658_s16 }
 0xf53   :  { %v1098_v45 = vpop.permute.xlu1 %1097 }
 0xf54   :  { %v1100_v46 = vadd.f32 %v1098_v45, %v1090_v44 }
 0xf56   :  { %1585 = vtanh.f32 %v1100_v46 }
 0xf5b   :  { %v1179_v49 = vpop.permute.xlu2 %1178 }
 0xf5c   :  { %v1586_v50 = vpop.eup %1585  ;;  %v1181_v51 = vadd.f32 %v1179_v49, %v1171_v48 }
 0xf5d   :  { %1103 = vrot.lane.b32.xlu0 %v1586_v50, %s1659_s23 }
 0xf5e   :  { %1587 = vtanh.f32 %v1181_v51 }
 0xf64   :  { %v1588_v52 = vpop.eup %1587 }
 0xf65   :  { %1184 = vrot.lane.b32.xlu1 %v1588_v52, %s1659_s23 }
 0xf6d   :  { %1113 = vrot.lane.b32.xlu1 %v1100_v46, %s1660_s24 }
 0xfcf   :  { %v1104_v53 = vpop.permute.xlu0 %1103 }
 0xfd0   :  { %v1106_v54 = vmul.f32 %v1104_v53, %v1083_v28 }
 0xfd2   :  { %1108 = vrot.lane.b32.xlu2 %v1106_v54, %s1658_s16 }
 0xfd7   :  { %v1185_v55 = vpop.permute.xlu1 %1184 }
 0xfd8   :  { %v1187_v56 = vmul.f32 %v1185_v55, %v1164_v40 }
 0xfda   :  { %1189 = vrot.lane.b32.xlu0 %v1187_v56, %s1658_s16  ;;  %1194 = vrot.lane.b32.xlu2 %v1181_v51, %s1660_s24 }
 0xfdf   :  { %v1114_v57 = vpop.permute.xlu1 %1113 }
 0xfe0   :  { %1116 = vst.msk [vmem:[%s2251_s7] sm:$0x3] %vm53_vm0, %v1114_v57 }
 0xfe7   :  { %v1227_v58 = vld [vmem:[%s2251_s7] sm:$0x3] }
 0xfe8   :  { %1249 = vrot.lane.b32.xlu2 %v1227_v58, %s1658_s16 }
0x102c   :  { %v1109_v59 = vpop.permute.xlu2 %1108 }
0x102d   :  { %1111 = vst.msk [vmem:[%s2250_s6] sm:$0x3] %vm53_vm0, %v1109_v59 }
0x102e   :  { %1118 = vst.msk [vmem:[#allocation2 + $0xc] sm:$0x3] %vm53_vm0, %v1109_v59 }
0x1034   :  { %v1195_v60 = vpop.permute.xlu2 %1194  ;;  %v1202_v61 = vld [vmem:[%s2250_s6] sm:$0x3] }
0x1035   :  { %1197 = vst.msk [vmem:[%s2253_s9] sm:$0x3] %vm53_vm0, %v1195_v60  ;;  %1466 = vmatmul.msk.f32.vlgmr.msrb.gmra.mxu2 %vm68_vm1, %v1202_v61 }
0x103c   :  { %v1307_v12 = vld [vmem:[%s2253_s9] sm:$0x3] }
0x1042   :  { %v1250_v39 = vpop.permute.xlu2 %1249 }
0x104c   :  { %v1190_v62 = vpop.permute.xlu0 %1189 }
0x104d   :  { %1192 = vst.msk [vmem:[%s2252_s8] sm:$0x3] %vm53_vm0, %v1190_v62 }
0x104e   :  { %1199 = vst.msk [vmem:[#allocation4 + $0x2] sm:$0x3] %vm53_vm0, %v1190_v62 }
0x1054   :  { %v1282_v63 = vld [vmem:[%s2252_s8] sm:$0x3] }
0x1055   :  { %1468 = vmatmul.msk.f32.vlgmr.msrb.gmra.mxu3 %vm68_vm1, %v1282_v63 }
0x10b8   :  { %v1223_v9 = vpop.f32.mrf.mxu2 }
0x10b9   :  { %v1226_v10 = vadd.f32 %v1465_v4, %v1223_v9 }
0x10bb   :  { %1589 = vtanh.f32 %v1226_v10  ;;  %v1467_v17 = vmul.f32 -1.442695, %v1226_v10 }
0x10c1   :  { %v1590_v11 = vpop.eup %1589 }
0x10c2   :  { %1254 = vrot.lane.b32.xlu0 %v1590_v11, %s1659_s23 }
0x10ca   :  { %1329 = vrot.lane.b32.xlu0 %v1307_v12, %s1658_s16 }
0x10d8   :  { %v1303_v14 = vpop.f32.mrf.mxu3 }
0x10d9   :  { %v1306_v15 = vadd.f32 %v1303_v14, %v1281_v13 }
0x10db   :  { %1591 = vtanh.f32 %v1306_v15  ;;  %v1469_v23 = vmul.f32 -1.442695, %v1306_v15 }
0x10dc   :  { %1593 = vpow2.f32 %v1467_v17 }
0x10e1   :  { %v1592_v16 = vpop.eup %1591 }
0x10e2   :  { %1334 = vrot.lane.b32.xlu1 %v1592_v16, %s1659_s23  ;;  %v1594_v18 = vpop.eup %1593 }
0x10e3   :  { %v1231_v19 = vadd.f32 1.0, %v1594_v18 }
0x10e5   :  { %1595 = vrcp.f32 %v1231_v19  ;;  %v1243_v5 = vand.u32 2147483648, %v1231_v19  ;;  %vm1237_vm2 = vweird.f32 %v1231_v19  ;;  %v1241_v7 = vand.u32 2147483647, %v1231_v19 }
0x10e6   :  { %1597 = vpow2.f32 %v1469_v23 }
0x10e7   :  { %v1244_v6 = vor.u32 1.1754944e-38, %v1243_v5  ;;  %vm1242_vm4 = vcmp.eq.f32.partialorder %v1241_v7, 8.507059e+37 }
0x10eb   :  { %v1596_v20 = vpop.eup %1595 }
0x10ec   :  { %v1233_v21 = vmul.f32 %v1596_v20, %v1231_v19  ;;  %vm1238_vm1 = vweird.f32 %v1596_v20  ;;  %v1598_v1 = vpop.eup %1597 }
0x10ed   :  { %vm1239_vm3 = vmor %vm1237_vm2, %vm1238_vm1  ;;  %v1311_v8 = vadd.f32 1.0, %v1598_v1 }
0x10ee   :  { %v1234_v22 = vsub.f32 1.0, %v1233_v21 }
0x10ef   :  { %1599 = vrcp.f32 %v1311_v8  ;;  %v1323_v32 = vand.u32 2147483648, %v1311_v8  ;;  %vm1317_vm6 = vweird.f32 %v1311_v8  ;;  %v1321_v33 = vand.u32 2147483647, %v1311_v8 }
0x10f0   :  { %v1235_v0 = vmul.f32 %v1596_v20, %v1234_v22 }
0x10f1   :  { %v1324_v35 = vor.u32 1.1754944e-38, %v1323_v32  ;;  %vm1322_vm8 = vcmp.eq.f32.partialorder %v1321_v33, 8.507059e+37 }
0x10f2   :  { %v1236_v2 = vadd.f32 %v1596_v20, %v1235_v0 }
0x10f4   :  { %v1240_v3 = vsel %vm1239_vm3, %v1596_v20, %v1236_v2 }
0x10f5   :  { %v1245_v24 = vsel %vm1242_vm4, %v1244_v6, %v1240_v3  ;;  %v1600_v27 = vpop.eup %1599 }
0x10f6   :  { %v1313_v28 = vmul.f32 %v1600_v27, %v1311_v8  ;;  %vm1318_vm5 = vweird.f32 %v1600_v27  ;;  %v1252_v40 = vmul.f32 %v1250_v39, %v1245_v24 }
0x10f7   :  { %vm1319_vm7 = vmor %vm1317_vm6, %vm1318_vm5 }
0x10f8   :  { %v1314_v29 = vsub.f32 1.0, %v1313_v28 }
0x10fa   :  { %v1315_v30 = vmul.f32 %v1600_v27, %v1314_v29 }
0x10fc   :  { %v1316_v31 = vadd.f32 %v1600_v27, %v1315_v30 }
0x10fe   :  { %v1320_v34 = vsel %vm1319_vm7, %v1600_v27, %v1316_v31 }
0x10ff   :  { %v1325_v36 = vsel %vm1322_vm8, %v1324_v35, %v1320_v34 }
0x1134   :  { %v1255_v25 = vpop.permute.xlu0 %1254 }
0x1135   :  { %v1257_v26 = vmul.f32 %v1255_v25, %v1245_v24 }
0x1137   :  { %1259 = vrot.lane.b32.xlu1 %v1257_v26, %s1658_s16 }
0x113c   :  { %v1330_v43 = vpop.permute.xlu0 %1329 }
0x113d   :  { %v1332_v44 = vmul.f32 %v1330_v43, %v1325_v36 }
0x1154   :  { %v1335_v37 = vpop.permute.xlu1 %1334 }
0x1155   :  { %v1337_v38 = vmul.f32 %v1335_v37, %v1325_v36 }
0x1157   :  { %1339 = vrot.lane.b32.xlu2 %v1337_v38, %s1658_s16 }
0x11a9   :  { %v1260_v41 = vpop.permute.xlu1 %1259 }
0x11aa   :  { %v1262_v42 = vadd.f32 %v1260_v41, %v1252_v40 }
0x11ac   :  { %1601 = vtanh.f32 %v1262_v42 }
0x11b1   :  { %v1340_v45 = vpop.permute.xlu2 %1339 }
0x11b2   :  { %v1602_v46 = vpop.eup %1601  ;;  %v1342_v47 = vadd.f32 %v1340_v45, %v1332_v44 }
0x11b3   :  { %1265 = vrot.lane.b32.xlu0 %v1602_v46, %s1659_s23 }
0x11b4   :  { %1603 = vtanh.f32 %v1342_v47 }
0x11ba   :  { %v1604_v48 = vpop.eup %1603 }
0x11bb   :  { %1345 = vrot.lane.b32.xlu1 %v1604_v48, %s1659_s23  ;;  %s1364_s23 = sshll.u32 %s1661_s25, 4  ;;  %s1365_s23 = int_to_ptr.vmem [resolvable:$true] %s1364_s23 }
0x11c3   :  { %1275 = vrot.lane.b32.xlu1 %v1262_v42, %s1660_s24 }
0x1225   :  { %v1266_v49 = vpop.permute.xlu0 %1265 }
0x1226   :  { %v1268_v50 = vmul.f32 %v1266_v49, %v1245_v24 }
0x1228   :  { %1270 = vrot.lane.b32.xlu2 %v1268_v50, %s1658_s16 }
0x122d   :  { %v1346_v51 = vpop.permute.xlu1 %1345 }
0x122e   :  { %v1348_v52 = vmul.f32 %v1346_v51, %v1325_v36 }
0x1230   :  { %1350 = vrot.lane.b32.xlu0 %v1348_v52, %s1658_s16  ;;  %1355 = vrot.lane.b32.xlu2 %v1342_v47, %s1660_s24  ;;  %s1662_s24 = smov 2  }
0x1235   :  { %v1276_v53 = vpop.permute.xlu1 %1275 }
0x1236   :  { %1278 = vst.msk [vmem:[%s2251_s7] sm:$0x3] %vm53_vm0, %v1276_v53 }
0x1282   :  { %v1271_v54 = vpop.permute.xlu2 %1270 }
0x1283   :  { %1273 = vst.msk [vmem:[%s2250_s6] sm:$0x3] %vm53_vm0, %v1271_v54 }
0x1284   :  { %1280 = vst.msk [vmem:[#allocation2 + $0xe] sm:$0x3] %vm53_vm0, %v1271_v54 }
0x1285   :  { %1372 = dma.vmem_to_hbm [thread:$0]  %s1365_s23, 256, %s1367_s28, [#allocation3], %s1658_s16, %s1658_s16, %s1662_s24  }
0x128a   :  { %v1356_v55 = vpop.permute.xlu2 %1355 }
0x128b   :  { %1358 = vst.msk [vmem:[%s2253_s9] sm:$0x3] %vm53_vm0, %v1356_v55 }
0x12a2   :  { %v1351_v56 = vpop.permute.xlu0 %1350 }
0x12a3   :  { %1353 = vst.msk [vmem:[%s2252_s8] sm:$0x3] %vm53_vm0, %v1351_v56 }
0x12a4   :  { %1359 = vst.msk [vmem:[#allocation4] sm:$0x3] %vm53_vm0, %v1351_v56 }
0x12a5   :  { %1389 = dma.vmem_to_hbm [thread:$0]  %s1382_s11, 256, %s1384_s12, [#allocation5], %s1658_s16, %s1658_s16, %s1662_s24  }
0x12a6   :  { %1653 = dma.done.wait [#allocation3], 256  }
0x12a7   :  { %1654 = vsyncadd [#allocation3], 4294967040 }
0x12a8   :  { %1655 = dma.done.wait [#allocation5], 256  }
0x12a9   :  { %1656 = vsyncadd [#allocation5], 4294967040 }
0x12aa   :  { %1414 = vsyncpa [#allocation3], 1 }
0x12ab   :  { %1415 = vsyncpa [#allocation5], 1 }

</bundles_post_ra>
